<compile_context>
chip_gen: v7x
topology: tpu7x:2x2x1
jax: 0.10.0
libtpu: 0.0.40
codegen_flags: <defaults>
</compile_context>

<pallas_src>
import functools

import jax
import jax.numpy as jnp
from jax.experimental import pallas as pl
from jax.experimental.pallas import tpu as pltpu

EPS = 1e-5


def _round_up(x, m):
    return ((x + m - 1) // m) * m


def _default_vmem_limit():
    try:
        cap = int(pltpu.get_tpu_info().vmem_capacity_bytes)
    except Exception:
        cap = 64 * 1024 * 1024
    return int(min((cap * 3) // 4, 96 * 1024 * 1024))


_VMEM_LIMIT = _default_vmem_limit()


# ----------------------------------------------------------------------------
# Pallas kernel: one grid point == (batch element, output-row tile).
# ----------------------------------------------------------------------------
def _breakhis_kernel(xpad_ref, w1_ref, s1_ref, b1_ref, *rest,
                     th, wo, cin_pad, cpad, stride, has_proj):
    if has_proj:
        ws_ref, ss_ref, bs_ref, out_ref, col_ref = rest
    else:
        out_ref, col_ref = rest

    r = pl.program_id(1)
    m = th * wo
    row0 = pl.multiple_of(r * th * stride, th * stride)

    # ---- im2col: 9 lane-dense taps stored straight into VMEM scratch -------
    # col_ref is (m, 9*cin_pad); tap t = dy*3+dx occupies lanes
    # [t*cin_pad, (t+1)*cin_pad) -- a 128-aligned, full-width window.
    for dy in range(3):
        for dx in range(3):
            if stride == 1:
                tap = xpad_ref[0, pl.ds(row0 + dy, th), pl.ds(dx, wo), :]
            else:
                # TODO(synk): strided taps hit the sublane-gather path; for
                # stride-2 blocks pre-stage the needed rows via the row-tile
                # index_map so the in-kernel slices are unit-stride.
                tap = xpad_ref[0, pl.ds(row0 + dy, th, stride),
                               pl.ds(dx, wo, stride), :]
            t = dy * 3 + dx
            col_ref[:, t * cin_pad:(t + 1) * cin_pad] = tap.reshape(m, cin_pad)

    # ---- conv1 as a single MXU matmul (K = 9*cin_pad), f32 accumulation ----
    acc = jnp.dot(col_ref[...], w1_ref[...], preferred_element_type=jnp.float32)

    # ---- bn1 + relu (f32 epilogue; BN folded to scale/shift) ---------------
    out = jnp.maximum(acc * s1_ref[...] + b1_ref[...], 0.0)       # (m, cpad)

    # ---- shortcut: centre tap == the strided 1x1-conv input (already staged)
    x_center = col_ref[:, 4 * cin_pad:5 * cin_pad]                # (m, cin_pad)
    if has_proj:
        sc = (jnp.dot(x_center, ws_ref[...],
                      preferred_element_type=jnp.float32)
              * ss_ref[...] + bs_ref[...])
    else:
        # identity shortcut => cin == cout => cin_pad == cpad; padded lanes of
        # x are zero, so no extra lane-pad / concat is needed.
        sc = x_center.astype(jnp.float32)

    # ---- residual add + final relu; bf16, lane-dense (Cpad = k*128) store --
    res = jnp.maximum(out + sc, 0.0).astype(out_ref.dtype)
    out_ref[...] = res.reshape(1, th, wo, cpad)


# ----------------------------------------------------------------------------
# Parameter folding (BN running stats -> scale/shift, weights -> MXU slabs)
# ----------------------------------------------------------------------------
def _fold_params(params, cin_pad, cpad):
    cout, cin = params["w1"].shape[:2]

    # conv1 weight (Cout,Cin,3,3) -> (3,3,Cin_pad,Cpad) -> (9*Cin_pad, Cpad)
    w1 = jnp.transpose(params["w1"], (2, 3, 1, 0))                # (3,3,cin,cout)
    w1 = jnp.pad(w1, ((0, 0), (0, 0), (0, cin_pad - cin), (0, cpad - cout)))
    w1 = w1.reshape(9 * cin_pad, cpad).astype(jnp.bfloat16)

    s1 = params["bn1_gamma"] / jnp.sqrt(params["bn1_var"] + EPS)
    b1 = params["bn1_beta"] - params["bn1_mean"] * s1
    s1 = jnp.pad(s1, (0, cpad - cout)).reshape(1, cpad).astype(jnp.float32)
    b1 = jnp.pad(b1, (0, cpad - cout)).reshape(1, cpad).astype(jnp.float32)

    folded = {"w1": w1, "s1": s1, "b1": b1}

    if params["ws"] is not None:
        ws = jnp.transpose(params["ws"][:, :, 0, 0], (1, 0))      # (cin, cout)
        ws = jnp.pad(ws, ((0, cin_pad - cin), (0, cpad - cout))).astype(jnp.bfloat16)
        ss = params["bns_gamma"] / jnp.sqrt(params["bns_var"] + EPS)
        bs = params["bns_beta"] - params["bns_mean"] * ss
        ss = jnp.pad(ss, (0, cpad - cout)).reshape(1, cpad).astype(jnp.float32)
        bs = jnp.pad(bs, (0, cpad - cout)).reshape(1, cpad).astype(jnp.float32)
        folded.update({"ws": ws, "ss": ss, "bs": bs})
    return folded


# ----------------------------------------------------------------------------
# Production entry point: halo-padded, channel-padded NHWC bf16 in/out.
# (A chained ResNet keeps activations in this layout between blocks.)
# ----------------------------------------------------------------------------
def breakhis_block_padded(xpad, folded, *, stride=1, row_tile=None):
    n, hp, wp, cin_pad = xpad.shape
    h, w = hp - 2, wp - 2
    ho = (h + 2 - 3) // stride + 1
    wo = (w + 2 - 3) // stride + 1
    cpad = folded["w1"].shape[1]
    has_proj = "ws" in folded

    if row_tile is None:
        cap = max(1, 2048 // wo)                  # ~2K output pixels per tile
        row_tile = max(d for d in range(1, min(ho, cap) + 1) if ho % d == 0)
    assert ho % row_tile == 0, (ho, row_tile)
    th = row_tile
    n_rt = ho // th
    m_tile = th * wo

    kernel = functools.partial(
        _breakhis_kernel, th=th, wo=wo, cin_pad=cin_pad, cpad=cpad,
        stride=stride, has_proj=has_proj)

    inputs = [xpad, folded["w1"], folded["s1"], folded["b1"]]
    in_specs = [
        # Whole halo-padded image per batch element; block index is constant
        # across row tiles, so it is DMA'd once per batch and reused.
        pl.BlockSpec((1, hp, wp, cin_pad), lambda b, r: (b, 0, 0, 0)),
        pl.BlockSpec((9 * cin_pad, cpad), lambda b, r: (0, 0)),
        pl.BlockSpec((1, cpad), lambda b, r: (0, 0)),
        pl.BlockSpec((1, cpad), lambda b, r: (0, 0)),
    ]
    if has_proj:
        inputs += [folded["ws"], folded["ss"], folded["bs"]]
        in_specs += [
            pl.BlockSpec((cin_pad, cpad), lambda b, r: (0, 0)),
            pl.BlockSpec((1, cpad), lambda b, r: (0, 0)),
            pl.BlockSpec((1, cpad), lambda b, r: (0, 0)),
        ]

    flops = 2 * n * ho * wo * 9 * cin_pad * cpad
    if has_proj:
        flops += 2 * n * ho * wo * cin_pad * cpad
    bytes_accessed = (xpad.size * 2
                      + sum(v.size * v.dtype.itemsize for v in folded.values())
                      + n * ho * wo * cpad * 2)

    return pl.pallas_call(
        kernel,
        out_shape=jax.ShapeDtypeStruct((n, ho, wo, cpad), jnp.bfloat16),
        grid=(n, n_rt),
        in_specs=in_specs,
        out_specs=pl.BlockSpec((1, th, wo, cpad), lambda b, r: (b, r, 0, 0)),
        scratch_shapes=[pltpu.VMEM((m_tile, 9 * cin_pad), jnp.bfloat16)],
        compiler_params=pltpu.CompilerParams(
            dimension_semantics=("parallel", "parallel"),
            vmem_limit_bytes=_VMEM_LIMIT),
        cost_estimate=pl.CostEstimate(
            flops=int(flops), transcendentals=0,
            bytes_accessed=int(bytes_accessed)),
    )(*inputs)


# ----------------------------------------------------------------------------
# Test convenience wrapper: NCHW f32 in / NCHW f32 out (matches the module).
# The layout glue here is only for comparing against the PyTorch reference.
# ----------------------------------------------------------------------------
def breakhis_block(x_nchw, params, stride=1, row_tile=None):
    n, cin, h, w = x_nchw.shape
    cout = params["w1"].shape[0]
    cin_pad = _round_up(cin, 128)
    cpad = _round_up(cout, 128)

    # NCHW -> NHWC bf16; halo pad and channel pad fused into ONE pad op.
    x_nhwc = jnp.transpose(x_nchw, (0, 2, 3, 1)).astype(jnp.bfloat16)
    xpad = jnp.pad(x_nhwc, ((0, 0), (1, 1), (1, 1), (0, cin_pad - cin)))

    folded = _fold_params(params, cin_pad, cpad)
    out = breakhis_block_padded(xpad, folded, stride=stride, row_tile=row_tile)

    # In a chained network keep the padded NHWC bf16 output as-is; the
    # slice/transpose below exists only for the NCHW reference comparison.
    return jnp.transpose(out[:, :, :, :cout].astype(jnp.float32), (0, 3, 1, 2))


breakhis_block_jit = jax.jit(breakhis_block, static_argnames=("stride", "row_tile"))


# ----------------------------------------------------------------------------
# Deterministic parameter init (shapes per the module's __init__)
# ----------------------------------------------------------------------------
def init_params(key, in_planes, planes, stride):
    ks = jax.random.split(key, 10)
    p = {
        "w1": jax.random.normal(ks[0], (planes, in_planes, 3, 3), jnp.float32) * 0.1,
        "bn1_gamma": jax.random.uniform(ks[1], (planes,), jnp.float32, 0.5, 1.5),
        "bn1_beta": jax.random.normal(ks[2], (planes,), jnp.float32) * 0.1,
        "bn1_mean": jax.random.normal(ks[3], (planes,), jnp.float32) * 0.1,
        "bn1_var": jax.random.uniform(ks[4], (planes,), jnp.float32, 0.5, 1.5),
    }
    if stride != 1 or in_planes != planes:
        p.update({
            "ws": jax.random.normal(ks[5], (planes, in_planes, 1, 1), jnp.float32) * 0.1,
            "bns_gamma": jax.random.uniform(ks[6], (planes,), jnp.float32, 0.5, 1.5),
            "bns_beta": jax.random.normal(ks[7], (planes,), jnp.float32) * 0.1,
            "bns_mean": jax.random.normal(ks[8], (planes,), jnp.float32) * 0.1,
            "bns_var": jax.random.uniform(ks[9], (planes,), jnp.float32, 0.5, 1.5),
        })
    else:
        p["ws"] = None
    return p


# ----------------------------------------------------------------------------
# Pure-JAX reference (NCHW, mirrors the PyTorch forward in eval mode)
# ----------------------------------------------------------------------------
def reference(x, p, stride):
    def bn(y, g, b, m, v):
        return (y - m[None, :, None, None]) / jnp.sqrt(v[None, :, None, None] + EPS) \
               * g[None, :, None, None] + b[None, :, None, None]

    out = jax.lax.conv_general_dilated(
        x, p["w1"], (stride, stride), ((1, 1), (1, 1)),
        dimension_numbers=("NCHW", "OIHW", "NCHW"))
    out = jnp.maximum(bn(out, p["bn1_gamma"], p["bn1_beta"],
                         p["bn1_mean"], p["bn1_var"]), 0.0)
    if p["ws"] is not None:
        sc = jax.lax.conv_general_dilated(
            x, p["ws"], (stride, stride), ((0, 0), (0, 0)),
            dimension_numbers=("NCHW", "OIHW", "NCHW"))
        sc = bn(sc, p["bns_gamma"], p["bns_beta"], p["bns_mean"], p["bns_var"])
    else:
        sc = x
    return jnp.maximum(out + sc, 0.0)


if __name__ == "__main__":
    key = jax.random.PRNGKey(0)
    k_x, k_p, k_x2, k_p2 = jax.random.split(key, 4)

    # --- test 1: projection shortcut (in_planes != planes), stride=1,
    #             default row tiling (whole image in one row tile) -----------
    N, CIN, COUT, H, W, STRIDE = 2, 4, 8, 16, 16, 1
    x = jax.random.normal(k_x, (N, CIN, H, W), jnp.float32)
    params = init_params(k_p, CIN, COUT, STRIDE)

    out = jax.block_until_ready(breakhis_block_jit(x, params, stride=STRIDE))
    ref = reference(x, params, STRIDE)
    assert out.shape == ref.shape, (out.shape, ref.shape)
    assert jnp.allclose(out, ref, atol=5e-2, rtol=5e-2), \
        float(jnp.max(jnp.abs(out - ref)))

    # --- test 2: identity shortcut (in_planes == planes, stride == 1),
    #             explicit row_tile=8 to exercise the multi-row-tile grid ----
    x2 = jax.random.normal(k_x2, (N, COUT, H, W), jnp.float32)
    params2 = init_params(k_p2, COUT, COUT, 1)

    out2 = jax.block_until_ready(
        breakhis_block_jit(x2, params2, stride=1, row_tile=8))
    ref2 = reference(x2, params2, 1)
    assert out2.shape == ref2.shape, (out2.shape, ref2.shape)
    assert jnp.allclose(out2, ref2, atol=5e-2, rtol=5e-2), \
        float(jnp.max(jnp.abs(out2 - ref2)))

    print("KERNEL_OK")
</pallas_src>

<mosaic_0001>
module attributes {stable_mosaic.version = 11 : i64} {
  func.func @_breakhis_kernel(%arg0: i32, %arg1: i32, %arg2: memref<1x18x18x128xbf16, #tpu.memory_space<vmem>>, %arg3: memref<1152x128xbf16, #tpu.memory_space<vmem>>, %arg4: memref<1x128xf32, #tpu.memory_space<vmem>>, %arg5: memref<1x128xf32, #tpu.memory_space<vmem>>, %arg6: memref<128x128xbf16, #tpu.memory_space<vmem>>, %arg7: memref<1x128xf32, #tpu.memory_space<vmem>>, %arg8: memref<1x128xf32, #tpu.memory_space<vmem>>, %arg9: memref<1x16x16x128xbf16, #tpu.memory_space<vmem>>, %arg10: memref<256x1152xbf16, #tpu.memory_space<vmem>>) attributes {dimension_semantics = [#tpu.dimension_semantics<parallel>, #tpu.dimension_semantics<parallel>], iteration_bounds = array<i64: 2, 1>, scalar_prefetch = 0 : i64, scratch_operands = 1 : i64, tpu.core_type = #tpu.core_type<tc>, window_params = [{transform_indices = @transform_0, window_bounds = array<i64: 1, 18, 18, 128>}, {pipeline_mode = #tpu.pipeline_mode<synchronous>, transform_indices = @transform_1, window_bounds = array<i64: 1152, 128>}, {pipeline_mode = #tpu.pipeline_mode<synchronous>, transform_indices = @transform_2, window_bounds = array<i64: 1, 128>}, {pipeline_mode = #tpu.pipeline_mode<synchronous>, transform_indices = @transform_3, window_bounds = array<i64: 1, 128>}, {pipeline_mode = #tpu.pipeline_mode<synchronous>, transform_indices = @transform_4, window_bounds = array<i64: 128, 128>}, {pipeline_mode = #tpu.pipeline_mode<synchronous>, transform_indices = @transform_5, window_bounds = array<i64: 1, 128>}, {pipeline_mode = #tpu.pipeline_mode<synchronous>, transform_indices = @transform_6, window_bounds = array<i64: 1, 128>}, {transform_indices = @transform_7, window_bounds = array<i64: 1, 16, 16, 128>}]} {
    %c16_i32 = arith.constant 16 : i32
    %0 = arith.muli %arg1, %c16_i32 : i32
    %c1_i32 = arith.constant 1 : i32
    %1 = arith.muli %0, %c1_i32 : i32
    %2 = tpu.assume_multiple %1, 16 : i32
    %c0_i32 = arith.constant 0 : i32
    %3 = arith.addi %2, %c0_i32 : i32
    %c0 = arith.constant 0 : index
    %4 = arith.index_cast %3 : i32 to index
    %c0_0 = arith.constant 0 : index
    %c0_1 = arith.constant 0 : index
    %5 = vector.load %arg2[%c0, %4, %c0_0, %c0_1] : memref<1x18x18x128xbf16, #tpu.memory_space<vmem>>, vector<1x16x16x128xbf16>
    %6 = vector.shape_cast %5 : vector<1x16x16x128xbf16> to vector<16x16x128xbf16>
    %7 = vector.shape_cast %6 : vector<16x16x128xbf16> to vector<256x128xbf16>
    %c0_2 = arith.constant 0 : index
    %c0_3 = arith.constant 0 : index
    %8 = vector.load %arg10[%c0_2, %c0_3] : memref<256x1152xbf16, #tpu.memory_space<vmem>>, vector<256x128xbf16>
    tpu.vector_store %arg10[%c0_2, %c0_3], %7 {strides = array<i32>} : memref<256x1152xbf16, #tpu.memory_space<vmem>>, vector<256x128xbf16>,
    %c0_i32_4 = arith.constant 0 : i32
    %9 = arith.addi %2, %c0_i32_4 : i32
    %c0_5 = arith.constant 0 : index
    %10 = arith.index_cast %9 : i32 to index
    %c1 = arith.constant 1 : index
    %c0_6 = arith.constant 0 : index
    %11 = vector.load %arg2[%c0_5, %10, %c1, %c0_6] : memref<1x18x18x128xbf16, #tpu.memory_space<vmem>>, vector<1x16x16x128xbf16>
    %12 = vector.shape_cast %11 : vector<1x16x16x128xbf16> to vector<16x16x128xbf16>
    %13 = vector.shape_cast %12 : vector<16x16x128xbf16> to vector<256x128xbf16>
    %c0_7 = arith.constant 0 : index
    %c128 = arith.constant 128 : index
    %14 = vector.load %arg10[%c0_7, %c128] : memref<256x1152xbf16, #tpu.memory_space<vmem>>, vector<256x128xbf16>
    tpu.vector_store %arg10[%c0_7, %c128], %13 {strides = array<i32>} : memref<256x1152xbf16, #tpu.memory_space<vmem>>, vector<256x128xbf16>,
    %c0_i32_8 = arith.constant 0 : i32
    %15 = arith.addi %2, %c0_i32_8 : i32
    %c0_9 = arith.constant 0 : index
    %16 = arith.index_cast %15 : i32 to index
    %c2 = arith.constant 2 : index
    %c0_10 = arith.constant 0 : index
    %17 = vector.load %arg2[%c0_9, %16, %c2, %c0_10] : memref<1x18x18x128xbf16, #tpu.memory_space<vmem>>, vector<1x16x16x128xbf16>
    %18 = vector.shape_cast %17 : vector<1x16x16x128xbf16> to vector<16x16x128xbf16>
    %19 = vector.shape_cast %18 : vector<16x16x128xbf16> to vector<256x128xbf16>
    %c0_11 = arith.constant 0 : index
    %c256 = arith.constant 256 : index
    %20 = vector.load %arg10[%c0_11, %c256] : memref<256x1152xbf16, #tpu.memory_space<vmem>>, vector<256x128xbf16>
    tpu.vector_store %arg10[%c0_11, %c256], %19 {strides = array<i32>} : memref<256x1152xbf16, #tpu.memory_space<vmem>>, vector<256x128xbf16>,
    %c1_i32_12 = arith.constant 1 : i32
    %21 = arith.addi %2, %c1_i32_12 : i32
    %c0_13 = arith.constant 0 : index
    %22 = arith.index_cast %21 : i32 to index
    %c0_14 = arith.constant 0 : index
    %c0_15 = arith.constant 0 : index
    %23 = vector.load %arg2[%c0_13, %22, %c0_14, %c0_15] : memref<1x18x18x128xbf16, #tpu.memory_space<vmem>>, vector<1x16x16x128xbf16>
    %24 = vector.shape_cast %23 : vector<1x16x16x128xbf16> to vector<16x16x128xbf16>
    %25 = vector.shape_cast %24 : vector<16x16x128xbf16> to vector<256x128xbf16>
    %c0_16 = arith.constant 0 : index
    %c384 = arith.constant 384 : index
    %26 = vector.load %arg10[%c0_16, %c384] : memref<256x1152xbf16, #tpu.memory_space<vmem>>, vector<256x128xbf16>
    tpu.vector_store %arg10[%c0_16, %c384], %25 {strides = array<i32>} : memref<256x1152xbf16, #tpu.memory_space<vmem>>, vector<256x128xbf16>,
    %c1_i32_17 = arith.constant 1 : i32
    %27 = arith.addi %2, %c1_i32_17 : i32
    %c0_18 = arith.constant 0 : index
    %28 = arith.index_cast %27 : i32 to index
    %c1_19 = arith.constant 1 : index
    %c0_20 = arith.constant 0 : index
    %29 = vector.load %arg2[%c0_18, %28, %c1_19, %c0_20] : memref<1x18x18x128xbf16, #tpu.memory_space<vmem>>, vector<1x16x16x128xbf16>
    %30 = vector.shape_cast %29 : vector<1x16x16x128xbf16> to vector<16x16x128xbf16>
    %31 = vector.shape_cast %30 : vector<16x16x128xbf16> to vector<256x128xbf16>
    %c0_21 = arith.constant 0 : index
    %c512 = arith.constant 512 : index
    %32 = vector.load %arg10[%c0_21, %c512] : memref<256x1152xbf16, #tpu.memory_space<vmem>>, vector<256x128xbf16>
    tpu.vector_store %arg10[%c0_21, %c512], %31 {strides = array<i32>} : memref<256x1152xbf16, #tpu.memory_space<vmem>>, vector<256x128xbf16>,
    %c1_i32_22 = arith.constant 1 : i32
    %33 = arith.addi %2, %c1_i32_22 : i32
    %c0_23 = arith.constant 0 : index
    %34 = arith.index_cast %33 : i32 to index
    %c2_24 = arith.constant 2 : index
    %c0_25 = arith.constant 0 : index
    %35 = vector.load %arg2[%c0_23, %34, %c2_24, %c0_25] : memref<1x18x18x128xbf16, #tpu.memory_space<vmem>>, vector<1x16x16x128xbf16>
    %36 = vector.shape_cast %35 : vector<1x16x16x128xbf16> to vector<16x16x128xbf16>
    %37 = vector.shape_cast %36 : vector<16x16x128xbf16> to vector<256x128xbf16>
    %c0_26 = arith.constant 0 : index
    %c640 = arith.constant 640 : index
    %38 = vector.load %arg10[%c0_26, %c640] : memref<256x1152xbf16, #tpu.memory_space<vmem>>, vector<256x128xbf16>
    tpu.vector_store %arg10[%c0_26, %c640], %37 {strides = array<i32>} : memref<256x1152xbf16, #tpu.memory_space<vmem>>, vector<256x128xbf16>,
    %c2_i32 = arith.constant 2 : i32
    %39 = arith.addi %2, %c2_i32 : i32
    %c0_27 = arith.constant 0 : index
    %40 = arith.index_cast %39 : i32 to index
    %c0_28 = arith.constant 0 : index
    %c0_29 = arith.constant 0 : index
    %41 = vector.load %arg2[%c0_27, %40, %c0_28, %c0_29] : memref<1x18x18x128xbf16, #tpu.memory_space<vmem>>, vector<1x16x16x128xbf16>
    %42 = vector.shape_cast %41 : vector<1x16x16x128xbf16> to vector<16x16x128xbf16>
    %43 = vector.shape_cast %42 : vector<16x16x128xbf16> to vector<256x128xbf16>
    %c0_30 = arith.constant 0 : index
    %c768 = arith.constant 768 : index
    %44 = vector.load %arg10[%c0_30, %c768] : memref<256x1152xbf16, #tpu.memory_space<vmem>>, vector<256x128xbf16>
    tpu.vector_store %arg10[%c0_30, %c768], %43 {strides = array<i32>} : memref<256x1152xbf16, #tpu.memory_space<vmem>>, vector<256x128xbf16>,
    %c2_i32_31 = arith.constant 2 : i32
    %45 = arith.addi %2, %c2_i32_31 : i32
    %c0_32 = arith.constant 0 : index
    %46 = arith.index_cast %45 : i32 to index
    %c1_33 = arith.constant 1 : index
    %c0_34 = arith.constant 0 : index
    %47 = vector.load %arg2[%c0_32, %46, %c1_33, %c0_34] : memref<1x18x18x128xbf16, #tpu.memory_space<vmem>>, vector<1x16x16x128xbf16>
    %48 = vector.shape_cast %47 : vector<1x16x16x128xbf16> to vector<16x16x128xbf16>
    %49 = vector.shape_cast %48 : vector<16x16x128xbf16> to vector<256x128xbf16>
    %c0_35 = arith.constant 0 : index
    %c896 = arith.constant 896 : index
    %50 = vector.load %arg10[%c0_35, %c896] : memref<256x1152xbf16, #tpu.memory_space<vmem>>, vector<256x128xbf16>
    tpu.vector_store %arg10[%c0_35, %c896], %49 {strides = array<i32>} : memref<256x1152xbf16, #tpu.memory_space<vmem>>, vector<256x128xbf16>,
    %c2_i32_36 = arith.constant 2 : i32
    %51 = arith.addi %2, %c2_i32_36 : i32
    %c0_37 = arith.constant 0 : index
    %52 = arith.index_cast %51 : i32 to index
    %c2_38 = arith.constant 2 : index
    %c0_39 = arith.constant 0 : index
    %53 = vector.load %arg2[%c0_37, %52, %c2_38, %c0_39] : memref<1x18x18x128xbf16, #tpu.memory_space<vmem>>, vector<1x16x16x128xbf16>
    %54 = vector.shape_cast %53 : vector<1x16x16x128xbf16> to vector<16x16x128xbf16>
    %55 = vector.shape_cast %54 : vector<16x16x128xbf16> to vector<256x128xbf16>
    %c0_40 = arith.constant 0 : index
    %c1024 = arith.constant 1024 : index
    %56 = vector.load %arg10[%c0_40, %c1024] : memref<256x1152xbf16, #tpu.memory_space<vmem>>, vector<256x128xbf16>
    tpu.vector_store %arg10[%c0_40, %c1024], %55 {strides = array<i32>} : memref<256x1152xbf16, #tpu.memory_space<vmem>>, vector<256x128xbf16>,
    %c0_41 = arith.constant 0 : index
    %c0_42 = arith.constant 0 : index
    %57 = vector.load %arg10[%c0_41, %c0_42] : memref<256x1152xbf16, #tpu.memory_space<vmem>>, vector<256x1152xbf16>
    %c0_43 = arith.constant 0 : index
    %c0_44 = arith.constant 0 : index
    %58 = vector.load %arg3[%c0_43, %c0_44] : memref<1152x128xbf16, #tpu.memory_space<vmem>>, vector<1152x128xbf16>
    %cst = arith.constant dense<0.000000e+00> : vector<256x128xf32>
    %59 = tpu.matmul %57, %58, %cst {dimension_numbers = #tpu.dot_dimension_numbers<[1], [0], [0], [1], [0, 0, 1, 1], [], []>} : vector<256x1152xbf16>, vector<1152x128xbf16>, vector<256x128xf32> -> vector<256x128xf32>
    %c0_45 = arith.constant 0 : index
    %c0_46 = arith.constant 0 : index
    %60 = vector.load %arg4[%c0_45, %c0_46] : memref<1x128xf32, #tpu.memory_space<vmem>>, vector<1x128xf32>
    %61 = vector.broadcast %60 : vector<1x128xf32> to vector<256x128xf32>
    %62 = arith.mulf %59, %61 : vector<256x128xf32>
    %c0_47 = arith.constant 0 : index
    %c0_48 = arith.constant 0 : index
    %63 = vector.load %arg5[%c0_47, %c0_48] : memref<1x128xf32, #tpu.memory_space<vmem>>, vector<1x128xf32>
    %64 = vector.broadcast %63 : vector<1x128xf32> to vector<256x128xf32>
    %65 = arith.addf %62, %64 : vector<256x128xf32>
    %cst_49 = arith.constant 0.000000e+00 : f32
    %66 = vector.broadcast %cst_49 : f32 to vector<256x128xf32>
    %67 = arith.maximumf %65, %66 : vector<256x128xf32>
    %c0_50 = arith.constant 0 : index
    %c512_51 = arith.constant 512 : index
    %68 = vector.load %arg10[%c0_50, %c512_51] : memref<256x1152xbf16, #tpu.memory_space<vmem>>, vector<256x128xbf16>
    %c0_52 = arith.constant 0 : index
    %c0_53 = arith.constant 0 : index
    %69 = vector.load %arg6[%c0_52, %c0_53] : memref<128x128xbf16, #tpu.memory_space<vmem>>, vector<128x128xbf16>
    %cst_54 = arith.constant dense<0.000000e+00> : vector<256x128xf32>
    %70 = tpu.matmul %68, %69, %cst_54 {dimension_numbers = #tpu.dot_dimension_numbers<[1], [0], [0], [1], [0, 0, 1, 1], [], []>} : vector<256x128xbf16>, vector<128x128xbf16>, vector<256x128xf32> -> vector<256x128xf32>
    %c0_55 = arith.constant 0 : index
    %c0_56 = arith.constant 0 : index
    %71 = vector.load %arg7[%c0_55, %c0_56] : memref<1x128xf32, #tpu.memory_space<vmem>>, vector<1x128xf32>
    %72 = vector.broadcast %71 : vector<1x128xf32> to vector<256x128xf32>
    %73 = arith.mulf %70, %72 : vector<256x128xf32>
    %c0_57 = arith.constant 0 : index
    %c0_58 = arith.constant 0 : index
    %74 = vector.load %arg8[%c0_57, %c0_58] : memref<1x128xf32, #tpu.memory_space<vmem>>, vector<1x128xf32>
    %75 = vector.broadcast %74 : vector<1x128xf32> to vector<256x128xf32>
    %76 = arith.addf %73, %75 : vector<256x128xf32>
    %77 = arith.addf %67, %76 : vector<256x128xf32>
    %cst_59 = arith.constant 0.000000e+00 : f32
    %78 = vector.broadcast %cst_59 : f32 to vector<256x128xf32>
    %79 = arith.maximumf %77, %78 : vector<256x128xf32>
    %80 = arith.truncf %79 : vector<256x128xf32> to vector<256x128xbf16>
    %81 = vector.shape_cast %80 : vector<256x128xbf16> to vector<1x16x16x128xbf16>
    %c0_60 = arith.constant 0 : index
    %c0_61 = arith.constant 0 : index
    %c0_62 = arith.constant 0 : index
    %c0_63 = arith.constant 0 : index
    %82 = vector.load %arg9[%c0_60, %c0_61, %c0_62, %c0_63] : memref<1x16x16x128xbf16, #tpu.memory_space<vmem>>, vector<1x16x16x128xbf16>
    tpu.vector_store %arg9[%c0_60, %c0_61, %c0_62, %c0_63], %81 {strides = array<i32>} : memref<1x16x16x128xbf16, #tpu.memory_space<vmem>>, vector<1x16x16x128xbf16>,
    return
  }
  func.func @transform_0(%arg0: i32, %arg1: i32) -> (i32, i32, i32, i32) {
    %c0_i32 = arith.constant 0 : i32
    %c0_i32_0 = arith.constant 0 : i32
    %c0_i32_1 = arith.constant 0 : i32
    %c0_i32_2 = arith.constant 0 : i32
    return %arg0, %c0_i32, %c0_i32_0, %c0_i32_1 : i32, i32, i32, i32
  }
  func.func @transform_1(%arg0: i32, %arg1: i32) -> (i32, i32) {
    %c0_i32 = arith.constant 0 : i32
    %c0_i32_0 = arith.constant 0 : i32
    %c0_i32_1 = arith.constant 0 : i32
    return %c0_i32, %c0_i32_0 : i32, i32
  }
  func.func @transform_2(%arg0: i32, %arg1: i32) -> (i32, i32) {
    %c0_i32 = arith.constant 0 : i32
    %c0_i32_0 = arith.constant 0 : i32
    %c0_i32_1 = arith.constant 0 : i32
    return %c0_i32, %c0_i32_0 : i32, i32
  }
  func.func @transform_3(%arg0: i32, %arg1: i32) -> (i32, i32) {
    %c0_i32 = arith.constant 0 : i32
    %c0_i32_0 = arith.constant 0 : i32
    %c0_i32_1 = arith.constant 0 : i32
    return %c0_i32, %c0_i32_0 : i32, i32
  }
  func.func @transform_4(%arg0: i32, %arg1: i32) -> (i32, i32) {
    %c0_i32 = arith.constant 0 : i32
    %c0_i32_0 = arith.constant 0 : i32
    %c0_i32_1 = arith.constant 0 : i32
    return %c0_i32, %c0_i32_0 : i32, i32
  }
  func.func @transform_5(%arg0: i32, %arg1: i32) -> (i32, i32) {
    %c0_i32 = arith.constant 0 : i32
    %c0_i32_0 = arith.constant 0 : i32
    %c0_i32_1 = arith.constant 0 : i32
    return %c0_i32, %c0_i32_0 : i32, i32
  }
  func.func @transform_6(%arg0: i32, %arg1: i32) -> (i32, i32) {
    %c0_i32 = arith.constant 0 : i32
    %c0_i32_0 = arith.constant 0 : i32
    %c0_i32_1 = arith.constant 0 : i32
    return %c0_i32, %c0_i32_0 : i32, i32
  }
  func.func @transform_7(%arg0: i32, %arg1: i32) -> (i32, i32, i32, i32) {
    %c0_i32 = arith.constant 0 : i32
    %c0_i32_0 = arith.constant 0 : i32
    %c0_i32_1 = arith.constant 0 : i32
    return %arg0, %arg1, %c0_i32, %c0_i32_0 : i32, i32, i32, i32
  }
}

</mosaic_0001>

<bundles_post_ra>
// kernel: breakhis_block.1
= control target key start
LH: loop header
LB: loop body
LE: loop exit
PB: predicated region body
PF: predicated region fallthrough
CT: control target
= control target key end

     0   :  { %s6941_s24 = smov 0   ;;  %s6943_s25 = smov 0   ;;  %s8698_s0 = inlined_call_operand.vmem [shape: bf16[2,18,18,128], index: 0, kind: input, shape index: {}]   ;;  %s8699_s1 = inlined_call_operand.vmem [shape: bf16[1152,128], index: 1, kind: input, shape index: {}]   ;;  %s8700_s2 = inlined_call_operand.vmem [shape: f32[1,128], index: 2, kind: input, shape index: {}]   ;;  %s8701_s3 = inlined_call_operand.vmem [shape: f32[1,128], index: 3, kind: input, shape index: {}]   ;;  %s8702_s4 = inlined_call_operand.vmem [shape: bf16[128,128], index: 4, kind: input, shape index: {}]   ;;  %s8703_s5 = inlined_call_operand.vmem [shape: f32[1,128], index: 5, kind: input, shape index: {}]   ;;  %s8704_s6 = inlined_call_operand.vmem [shape: f32[1,128], index: 6, kind: input, shape index: {}]   ;;  %s8705_s7 = inlined_call_operand.vmem [shape: bf16[2,16,16,128], index: 7, kind: output, shape index: {}]  }
   0x1   :  { %s6945_s26 = smov 0  }
   0x2 LB: > { %s29_s27 = sadd.s32 1, %s6895_s25  ;;  %p5434_p0 = scmp.ge.s32.totalorder %s6899_s26, 1  ;;  %s6899_s26 = sphi %s6945_s26, %s17_s26   ;;  %s6895_s25 = sphi %s6943_s25, %s8762_s25   ;;  %s6891_s24 = sphi %s6941_s24, %s8761_s24  }
   0x3   : > { %p31_p1 = scmp.ge.s32.totalorder %s29_s27, 2  ;;  %p251_p2 = scmp.lt.s32.totalorder %s6899_s26, 3 }
   0x5   : > { %s8764_s27 = smov (%p31_p1, %s29_s27), 0  ;;  %p252_p3 = pnand %p5434_p0, %p251_p2 }
   0x7   : > { %255 = sbr.rel (%p252_p3) target bundleno = 625 (0x271), region = 48 }
   0xe   : > { %v6749_v0 = vld [vmem:[%s8699_s1 + $0x40] sm:$0xff]   ;;  %v6753_v4 = vld [vmem:[%s8699_s1 + $0x48] sm:$0xff]   ;;  %v6757_v8 = vld [vmem:[%s8699_s1 + $0x50] sm:$0xff]   ;;  %p288_p4 = scmp.lt.s32.totalorder %s6891_s24, 1  ;;  %vm1064_vm0 = vcmask 1042432   ;;  %vm1065_vm1 = vcmask 1046532  }
   0xf   : > { %v6750_v1 = vld [vmem:[%s8699_s1 + $0xc0] sm:$0xff]   ;;  %6132 = vmatprep.subr.bf16.mxu0 %v6749_v0  ;;  %v6754_v5 = vld [vmem:[%s8699_s1 + $0xc8] sm:$0xff]   ;;  %v6758_v9 = vld [vmem:[%s8699_s1 + $0xd0] sm:$0xff]   ;;  %vm501_vm2 = vsmask.f32 3328 }
  0x10   : > { %v6751_v2 = vld [vmem:[%s8699_s1] sm:$0xff]   ;;  %6244 = vmatprep.subr.bf16.mxu1 %v6750_v1  ;;  %v6755_v6 = vld [vmem:[%s8699_s1 + $0x8] sm:$0xff]   ;;  %v6759_v10 = vld [vmem:[%s8699_s1 + $0x10] sm:$0xff]   ;;  %s8766_s24 = smov (!%p288_p4, %s6891_s24), 1  ;;  %vm502_vm3 = vsmask.f32 7440 }
  0x11   : > { %v6752_v3 = vld [vmem:[%s8699_s1 + $0x80] sm:$0xff]   ;;  %6133 = vmatpush3.bf16.msra.mxu0 %v6751_v2  ;;  %v6756_v7 = vld [vmem:[%s8699_s1 + $0x88] sm:$0xff]   ;;  %v6760_v11 = vld [vmem:[%s8699_s1 + $0x90] sm:$0xff]   ;;  %s6724_s19 = smul.u32 216, %s8766_s24  ;;  %s6004_s10 = sshll.u32 %s8766_s24, 7 }
  0x12   : > { %6245 = vmatpush3.bf16.msra.mxu1 %v6752_v3  ;;  %6134 = vmatprep.subr.bf16.mxu0 %v6753_v4  ;;  %v6761_v12 = vld [vmem:[%s8699_s1 + $0x58] sm:$0xff]   ;;  %v6765_v16 = vld [vmem:[%s8699_s1 + $0x60] sm:$0xff]   ;;  %v6769_v20 = vld [vmem:[%s8699_s1 + $0x68] sm:$0xff]   ;;  %s8543_s13 = scalar_lea.vmem %s8705_s7, %s6004_s10 }
  0x13   : > { %6246 = vmatprep.subr.bf16.mxu1 %v6754_v5  ;;  %v6762_v13 = vld [vmem:[%s8699_s1 + $0xd8] sm:$0xff]   ;;  %v6766_v17 = vld [vmem:[%s8699_s1 + $0xe0] sm:$0xff]   ;;  %v6770_v21 = vld [vmem:[%s8699_s1 + $0xe8] sm:$0xff]   ;;  %s7059_s11 = scalar_lea.vmem %s8698_s0, %s6724_s19 }
  0x14   : > { %v6763_v14 = vld [vmem:[%s8699_s1 + $0x18] sm:$0xff]   ;;  %v6767_v18 = vld [vmem:[%s8699_s1 + $0x20] sm:$0xff]   ;;  %v6771_v22 = vld [vmem:[%s8699_s1 + $0x28] sm:$0xff]  }
  0x15   : > { %6135 = vmatpush3.bf16.msra.mxu0 %v6755_v6  ;;  %v6764_v15 = vld [vmem:[%s8699_s1 + $0x98] sm:$0xff]   ;;  %v6768_v19 = vld [vmem:[%s8699_s1 + $0xa0] sm:$0xff]   ;;  %v6772_v23 = vld [vmem:[%s8699_s1 + $0xa8] sm:$0xff]  }
  0x16   : > { %6247 = vmatpush3.bf16.msra.mxu1 %v6756_v7  ;;  %6136 = vmatprep.subr.bf16.mxu0 %v6757_v8  ;;  %v6773_v24 = vld [vmem:[%s8699_s1 + $0x70] sm:$0xff]   ;;  %v6777_v28 = vld [vmem:[%s8699_s1 + $0x78] sm:$0xff]   ;;  %v453_v32 = vld [vmem:[%s7059_s11] sm:$0xf] }
  0x17   : > { %6248 = vmatprep.subr.bf16.mxu1 %v6758_v9  ;;  %v6774_v25 = vld [vmem:[%s8699_s1 + $0xf0] sm:$0xff]   ;;  %v6778_v29 = vld [vmem:[%s8699_s1 + $0xf8] sm:$0xff]   ;;  %v454_v33 = vld [vmem:[%s7059_s11 + $0x4] sm:$0xf]  ;;  %v505_v35 = vshrl.u32 %v453_v32, 16  ;;  %v508_v36 = vshll.u32 %v453_v32, 16 }
  0x18   : > { %v6775_v26 = vld [vmem:[%s8699_s1 + $0x30] sm:$0xff]   ;;  %v6779_v30 = vld [vmem:[%s8699_s1 + $0x38] sm:$0xff]   ;;  %v455_v34 = vld [vmem:[%s7059_s11 + $0x8] sm:$0x1]  ;;  %v514_v37 = vshll.u32 %v454_v33, 16  ;;  %v518_v38 = vshrl.u32 %v454_v33, 16 }
  0x19   : > { %6137 = vmatpush3.bf16.msra.mxu0 %v6759_v10  ;;  %v6776_v27 = vld [vmem:[%s8699_s1 + $0xb0] sm:$0xff]   ;;  %v6780_v31 = vld [vmem:[%s8699_s1 + $0xb8] sm:$0xff]   ;;  %v524_v39 = vshll.u32 %v455_v34, 16  ;;  %v507_v41 = vrot.slane %v505_v35, 4  ;;  %v510_v42 = vrot.slane %v508_v36, 5  ;;  %vm7073_vm4 = vmor %vm1064_vm0, %vm1065_vm1 }
  0x1a   : > { %6249 = vmatpush3.bf16.msra.mxu1 %v6760_v11  ;;  %6138 = vmatprep.subr.bf16.mxu0 %v6761_v12  ;;  %v6781_v40 = vld [vmem:[%s7059_s11 + $0xc] sm:$0xff]   ;;  %v516_v43 = vrot.slane %v514_v37, 5  ;;  %v520_v44 = vrot.slane %v518_v38, 4  ;;  %v968_v48 = vld [vmem:[%s7059_s11] sm:$0xe]  ;;  %vm7082_vm5 = vmor %vm501_vm2, %vm502_vm3 }
  0x1b   : > { %6250 = vmatprep.subr.bf16.mxu1 %v6762_v13  ;;  %v526_v45 = vrot.slane %v524_v39, 5  ;;  %4068 = vmatprep.mubr.bf16.mxu1 %v6781_v40  ;;  %v511_v47 = vor.u32 %v510_v42, %v507_v41  ;;  %v969_v49 = vld [vmem:[%s7059_s11 + $0x4] sm:$0xf]  ;;  %v970_v50 = vld [vmem:[%s7059_s11 + $0x8] sm:$0x1]  ;;  %v5470_v53 = vrot.slane %v968_v48, 9 }
  0x1c   : > { %v521_v52 = vor.u32 %v520_v44, %v516_v43  ;;  %v1069_v54 = vrot.slane %v969_v49, 5  ;;  %v1072_v55 = vrot.slane %v970_v50, 5  ;;  %v6783_v56 = vld [vmem:[%s8699_s1 + $0x140] sm:$0xff]   ;;  %v456_v4 = vld [vmem:[%s7059_s11 + $0xc] sm:$0xf] }
  0x1d   : > { %6139 = vmatpush3.bf16.msra.mxu0 %v6763_v14  ;;  %v512_v57 = vrot.slane %v511_v47, 4  ;;  %v6782_v59 = vld [vmem:[%s7059_s11] sm:$0xff]   ;;  %v457_v7 = vld [vmem:[%s7059_s11 + $0x10] sm:$0xf]  ;;  %v458_v8 = vld [vmem:[%s7059_s11 + $0x14] sm:$0x1] }
  0x1e   : > { %6251 = vmatpush3.bf16.msra.mxu1 %v6764_v15  ;;  %6140 = vmatprep.subr.bf16.mxu0 %v6765_v16  ;;  %v522_v58 = vrot.slane %v521_v52, 4  ;;  %v1070_v60 = vsel %vm7073_vm4, %v5470_v53, %v1069_v54  ;;  %v1071_v61 = vrot.slane %v1069_v54, 4  ;;  %v6784_v63 = vld [vmem:[%s8699_s1 + $0x100] sm:$0xff]   ;;  %v529_v9 = vshrl.u32 %v456_v4, 16  ;;  %v6787_v14 = vld [vmem:[%s7059_s11 + $0x18] sm:$0xff]   ;;  %v6788_v34 = vld [vmem:[%s7059_s11 + $0xc] sm:$0xff]  }
  0x1f   : > { %6252 = vmatprep.subr.bf16.mxu1 %v6766_v17  ;;  %v517_v62 = vsel %vm7082_vm5, %v512_v57, %v516_v43  ;;  %v6785_v0 = vld [vmem:[%s8699_s1 + $0x1c0] sm:$0xff]   ;;  %v532_v10 = vshll.u32 %v456_v4, 16  ;;  %v538_v11 = vshll.u32 %v457_v7, 16  ;;  %v542_v12 = vshrl.u32 %v457_v7, 16  ;;  %v6791_v43 = vld [vmem:[%s8699_s1 + $0x148] sm:$0xff]   ;;  %v6790_v7 = vld [vmem:[%s7059_s11 + $0x18] sm:$0xff]  }
  0x20   : > { %v527_v1 = vsel %vm7082_vm5, %v522_v58, %v526_v45  ;;  %v1073_v2 = vsel %vm7073_vm4, %v1071_v61, %v1072_v55  ;;  %v6786_v3 = vld [vmem:[%s8699_s1 + $0x180] sm:$0xff]   ;;  %v548_v13 = vshll.u32 %v458_v8, 16  ;;  %v531_v15 = vrot.slane %v529_v9, 4  ;;  %v974_v54 = vld [vmem:[%s7059_s11 + $0x18] sm:$0xe]  ;;  %v6792_v61 = vld [vmem:[%s8699_s1 + $0x108] sm:$0xff]  }
  0x21   : > { %6141 = vmatpush3.bf16.msra.mxu0 %v6767_v18  ;;  %v5454_v5 = vcombine.low %v517_v62, %v527_v1  ;;  %v5486_v6 = vcombine.low %v1070_v60, %v1073_v2  ;;  %v534_v16 = vrot.slane %v532_v10, 5  ;;  %v540_v17 = vrot.slane %v538_v11, 5  ;;  %v6789_v38 = vld [vmem:[%s7059_s11 + $0x24] sm:$0xff]   ;;  %v975_v55 = vld [vmem:[%s7059_s11 + $0x1c] sm:$0xf] }
  0x22   : > { %6253 = vmatpush3.bf16.msra.mxu1 %v6768_v19  ;;  %6142 = vmatprep.subr.bf16.mxu0 %v6769_v20  ;;  %v544_v18 = vrot.slane %v542_v12, 4  ;;  %v550_v19 = vrot.slane %v548_v13, 5  ;;  %v976_v58 = vld [vmem:[%s7059_s11 + $0x20] sm:$0x1]  ;;  %v1083_v60 = vrot.slane %v975_v55, 5 }
  0x23   : > { %6254 = vmatprep.subr.bf16.mxu1 %v6770_v21  ;;  %3907 = vmatprep.mubr.bf16.mxu0 %v5454_v5  ;;  %v535_v20 = vor.u32 %v534_v16, %v531_v15  ;;  %v971_v21 = vld [vmem:[%s7059_s11 + $0xc] sm:$0xe]  ;;  %v462_v9 = vld [vmem:[%s7059_s11 + $0x24] sm:$0xf]  ;;  %v463_v12 = vld [vmem:[%s7059_s11 + $0x28] sm:$0xf] }
  0x24   : > { %v6794_v5 = vld [vmem:[%s8699_s1 + $0x188] sm:$0xff]   ;;  %v580_v15 = vshll.u32 %v462_v9, 16 }
  0x25   : > { %6143 = vmatpush3.bf16.msra.mxu0 %v6771_v22  ;;  %v972_v22 = vld [vmem:[%s7059_s11 + $0x10] sm:$0xf]  ;;  %v464_v13 = vld [vmem:[%s7059_s11 + $0x2c] sm:$0x1] }
  0x26   : > { %6255 = vmatpush3.bf16.msra.mxu1 %v6772_v23  ;;  %6144 = vmatprep.subr.bf16.mxu0 %v6773_v24  ;;  %v973_v23 = vld [vmem:[%s7059_s11 + $0x14] sm:$0x1]  ;;  %v545_v24 = vor.u32 %v544_v18, %v540_v17  ;;  %v590_v18 = vshrl.u32 %v463_v12, 16 }
  0x27   : > { %6256 = vmatprep.subr.bf16.mxu1 %v6774_v25  ;;  %v5471_v25 = vrot.slane %v971_v21, 9 }
  0x28   : > { %v546_v33 = vrot.slane %v545_v24, 4  ;;  %v592_v24 = vrot.slane %v590_v18, 4  ;;  %v469_v18 = vld [vmem:[%s7059_s11 + $0x40] sm:$0xf] }
  0x29   : > { %6145 = vmatpush3.bf16.msra.mxu0 %v6775_v26  ;;  %v1076_v26 = vrot.slane %v972_v22, 5  ;;  %v582_v22 = vrot.slane %v580_v15, 5  ;;  %v468_v15 = vld [vmem:[%s7059_s11 + $0x3c] sm:$0xf] }
  0x2a   : > { %6257 = vmatpush3.bf16.msra.mxu1 %v6776_v27  ;;  %6146 = vmatprep.subr.bf16.mxu0 %v6777_v28  ;;  %v1079_v27 = vrot.slane %v973_v23, 5  ;;  %v459_v28 = vld [vmem:[%s7059_s11 + $0x18] sm:$0xf]  ;;  %v551_v44 = vsel %vm7082_vm5, %v546_v33, %v550_v19  ;;  %v596_v19 = vshll.u32 %v464_v13, 16  ;;  %v6798_v13 = vld [vmem:[%s7059_s11 + $0x30] sm:$0xff]  }
  0x2b   : > { %6258 = vmatprep.subr.bf16.mxu1 %v6778_v29  ;;  %v536_v29 = vrot.slane %v535_v20, 4  ;;  %v553_v32 = vshrl.u32 %v459_v28, 16  ;;  %v1077_v35 = vsel %vm7073_vm4, %v5471_v25, %v1076_v26  ;;  %v1078_v36 = vrot.slane %v1076_v26, 4  ;;  %v6795_v20 = vld [vmem:[%s7059_s11 + $0x30] sm:$0xff]  }
  0x2c   : > { %v556_v37 = vshll.u32 %v459_v28, 16  ;;  %v598_v25 = vrot.slane %v596_v19, 5  ;;  %v978_v28 = vld [vmem:[%s7059_s11 + $0x28] sm:$0xf]  ;;  %v470_v19 = vld [vmem:[%s7059_s11 + $0x44] sm:$0x1] }
  0x2d   : > { %6147 = vmatpush3.bf16.msra.mxu0 %v6779_v30  ;;  %v460_v30 = vld [vmem:[%s7059_s11 + $0x1c] sm:$0xf]  ;;  %v541_v39 = vsel %vm7082_vm5, %v536_v29, %v540_v17  ;;  %v555_v40 = vrot.slane %v553_v32, 4  ;;  %v1080_v45 = vsel %vm7073_vm4, %v1078_v36, %v1079_v27  ;;  %v586_v17 = vshll.u32 %v463_v12, 16  ;;  %v977_v27 = vld [vmem:[%s7059_s11 + $0x24] sm:$0xe] }
  0x2e   : > { %6259 = vmatpush3.bf16.msra.mxu1 %v6780_v31  ;;  %6356 = vmatprep.subr.bf16.mxu0 %v6783_v56  ;;  %v461_v31 = vld [vmem:[%s7059_s11 + $0x20] sm:$0x1]  ;;  %v562_v41 = vshll.u32 %v460_v30, 16  ;;  %v566_v42 = vshrl.u32 %v460_v30, 16  ;;  %v558_v47 = vrot.slane %v556_v37, 5  ;;  %v5455_v49 = vcombine.low %v541_v39, %v551_v44 }
  0x2f   : > { %6468 = vmatprep.subr.bf16.mxu1 %v6785_v0  ;;  %v572_v48 = vshll.u32 %v461_v31, 16  ;;  %v5487_v50 = vcombine.low %v1077_v35, %v1080_v45  ;;  %v6793_v0 = vld [vmem:[%s8699_s1 + $0x1c8] sm:$0xff]   ;;  %v588_v23 = vrot.slane %v586_v17, 5  ;;  %v5473_v31 = vrot.slane %v977_v27, 9  ;;  %v466_v36 = vld [vmem:[%s7059_s11 + $0x34] sm:$0xf] }
  0x30   : > { %3908 = vmatmul.mubr.bf16.vlgmr.msra.gmra.mrb[0].mxu0 %v6782_v59  ;;  %v564_v52 = vrot.slane %v562_v41, 5  ;;  %v568_v53 = vrot.slane %v566_v42, 4  ;;  %v559_v56 = vor.u32 %v558_v47, %v555_v40  ;;  %v5472_v59 = vrot.slane %v974_v54, 9  ;;  %v979_v29 = vld [vmem:[%s7059_s11 + $0x2c] sm:$0x1]  ;;  %v6796_v40 = vld [vmem:[%s7059_s11 + $0x24] sm:$0xff]  }
  0x31   : > { %4069 = vmatmul.mubr.bf16.vlgmr.msra.gmra.mrb[0].mxu1 %v5486_v6  ;;  %6357 = vmatpush3.bf16.msra.mxu0 %v6784_v63  ;;  %v574_v57 = vrot.slane %v572_v48, 5  ;;  %v1086_v63 = vrot.slane %v976_v58, 5  ;;  %v593_v30 = vor.u32 %v592_v24, %v588_v23  ;;  %v1090_v32 = vrot.slane %v978_v28, 5  ;;  %v467_v37 = vld [vmem:[%s7059_s11 + $0x38] sm:$0x1]  ;;  %v6797_v44 = vld [vmem:[%s7059_s11 + $0x3c] sm:$0xff]  }
  0x32   : > { %6469 = vmatpush3.bf16.msra.mxu1 %v6786_v3  ;;  %4076 = vmatprep.mubr.bf16.mxu1 %v6787_v14  ;;  %v569_v62 = vor.u32 %v568_v53, %v564_v52  ;;  %v560_v1 = vrot.slane %v559_v56, 4  ;;  %v1084_v2 = vsel %vm7073_vm4, %v5472_v59, %v1083_v60  ;;  %v1085_v3 = vrot.slane %v1083_v60, 4  ;;  %v980_v60 = vld [vmem:[%s7059_s11 + $0x30] sm:$0xe] }
  0x33   : > { %6358 = vmatprep.subr.bf16.mxu0 %v6791_v43  ;;  %3915 = vmatprep.mubr.bf16.mxu0 %v5455_v49  ;;  %v577_v14 = vshrl.u32 %v462_v9, 16  ;;  %v1093_v33 = vrot.slane %v979_v29, 5  ;;  %v594_v39 = vrot.slane %v593_v30, 4  ;;  %v1091_v41 = vsel %vm7073_vm4, %v5473_v31, %v1090_v32 }
  0x34   : > { %v570_v4 = vrot.slane %v569_v62, 4  ;;  %6470 = vmatprep.subr.bf16.mxu1 %v6793_v0  ;;  %v565_v6 = vsel %vm7082_vm5, %v560_v1, %v564_v52  ;;  %v1087_v8 = vsel %vm7073_vm4, %v1085_v3, %v1086_v63  ;;  %v1092_v42 = vrot.slane %v1090_v32, 4  ;;  %v982_v0 = vld [vmem:[%s7059_s11 + $0x38] sm:$0x1]  ;;  %v6800_v3 = vld [vmem:[%s8699_s1 + $0x110] sm:$0xff]  }
  0x35   : > { %6359 = vmatpush3.bf16.msra.mxu0 %v6792_v61  ;;  %v5488_v11 = vcombine.low %v1084_v2, %v1087_v8  ;;  %v579_v21 = vrot.slane %v577_v14, 4  ;;  %v610_v48 = vshll.u32 %v466_v36, 16  ;;  %v614_v49 = vshrl.u32 %v466_v36, 16  ;;  %v981_v61 = vld [vmem:[%s7059_s11 + $0x34] sm:$0xf] }
  0x36   : > { %v575_v10 = vsel %vm7082_vm5, %v570_v4, %v574_v57  ;;  %6471 = vmatpush3.bf16.msra.mxu1 %v6794_v5  ;;  %v599_v52 = vsel %vm7082_vm5, %v594_v39, %v598_v25  ;;  %v1094_v53 = vsel %vm7073_vm4, %v1092_v42, %v1093_v33  ;;  %v620_v55 = vshll.u32 %v467_v37, 16  ;;  %v983_v33 = vld [vmem:[%s7059_s11 + $0x3c] sm:$0xe]  ;;  %v472_v42 = vld [vmem:[%s7059_s11 + $0x4c] sm:$0xf] }
  0x37   : > { %v5456_v16 = vcombine.low %v565_v6, %v575_v10  ;;  %v583_v26 = vor.u32 %v582_v22, %v579_v21  ;;  %v5489_v57 = vcombine.low %v1091_v41, %v1094_v53  ;;  %v612_v58 = vrot.slane %v610_v48, 5  ;;  %v6801_v6 = vld [vmem:[%s8699_s1 + $0x1d0] sm:$0xff]  }
  0x38   : > { %3916 = vmatmul.mubr.bf16.gmra.mrb[4].mxu0 %v6788_v34  ;;  %v465_v34 = vld [vmem:[%s7059_s11 + $0x30] sm:$0xf]  ;;  %v616_v59 = vrot.slane %v614_v49, 4  ;;  %v622_v63 = vrot.slane %v620_v55, 5  ;;  %v5474_v1 = vrot.slane %v980_v60, 9  ;;  %v1097_v2 = vrot.slane %v981_v61, 5  ;;  %6472 = vmatprep.subr.bf16.mxu1 %v6801_v6 }
  0x39   : > { %4077 = vmatmul.mubr.bf16.gmra.mrb[4].mxu1 %v5487_v50  ;;  %3923 = vmatprep.mubr.bf16.mxu0 %v5456_v16  ;;  %v584_v35 = vrot.slane %v583_v26, 4  ;;  %v604_v43 = vshll.u32 %v465_v34, 16  ;;  %v6799_v50 = vld [vmem:[%s8699_s1 + $0x150] sm:$0xff]   ;;  %v1100_v5 = vrot.slane %v982_v0, 5  ;;  %v628_v21 = vshll.u32 %v468_v15, 16  ;;  %v6803_v26 = vld [vmem:[%s7059_s11 + $0x48] sm:$0xff]  }
  0x3a   : > { %4084 = vmatprep.mubr.bf16.mxu1 %v6789_v38  ;;  %v601_v38 = vshrl.u32 %v465_v34, 16  ;;  %6360 = vmatprep.subr.bf16.mxu0 %v6799_v50  ;;  %v617_v4 = vor.u32 %v616_v59, %v612_v58  ;;  %v1098_v8 = vsel %vm7073_vm4, %v5474_v1, %v1097_v2  ;;  %v1099_v9 = vrot.slane %v1097_v2, 4  ;;  %v984_v34 = vld [vmem:[%s7059_s11 + $0x40] sm:$0xf]  ;;  %v986_v2 = vld [vmem:[%s7059_s11 + $0x48] sm:$0xe] }
  0x3b   : > { %v589_v45 = vsel %vm7082_vm5, %v584_v35, %v588_v23  ;;  %v606_v54 = vrot.slane %v604_v43, 5  ;;  %6361 = vmatpush3.bf16.msra.mxu0 %v6800_v3  ;;  %v634_v23 = vshll.u32 %v469_v18, 16  ;;  %v638_v24 = vshrl.u32 %v469_v18, 16  ;;  %v985_v35 = vld [vmem:[%s7059_s11 + $0x44] sm:$0x1] }
  0x3c   : > { %v603_v47 = vrot.slane %v601_v38, 4  ;;  %v5457_v56 = vcombine.low %v589_v45, %v599_v52  ;;  %v618_v10 = vrot.slane %v617_v4, 4  ;;  %v1101_v14 = vsel %vm7073_vm4, %v1099_v9, %v1100_v5  ;;  %v473_v43 = vld [vmem:[%s7059_s11 + $0x50] sm:$0x1]  ;;  %v6805_v52 = vld [vmem:[%s7059_s11 + $0x54] sm:$0xff]  }
  0x3d   : > { %v5490_v17 = vcombine.low %v1098_v8, %v1101_v14  ;;  %v644_v25 = vshll.u32 %v470_v19, 16  ;;  %v630_v28 = vrot.slane %v628_v21, 5  ;;  %v636_v29 = vrot.slane %v634_v23, 5  ;;  %v987_v3 = vld [vmem:[%s7059_s11 + $0x4c] sm:$0xf]  ;;  %v6808_v9 = vld [vmem:[%s8699_s1 + $0x118] sm:$0xff]  }
  0x3e   : > { %v607_v62 = vor.u32 %v606_v54, %v603_v47  ;;  %v623_v16 = vsel %vm7082_vm5, %v618_v10, %v622_v63  ;;  %v640_v30 = vrot.slane %v638_v24, 4  ;;  %v5475_v37 = vrot.slane %v983_v33, 9  ;;  %v6804_v47 = vld [vmem:[%s7059_s11 + $0x3c] sm:$0xff]   ;;  %v988_v6 = vld [vmem:[%s7059_s11 + $0x50] sm:$0x1]  ;;  %v6806_v19 = vld [vmem:[%s7059_s11 + $0x48] sm:$0xff]  }
  0x3f   : > { %v646_v31 = vrot.slane %v644_v25, 5  ;;  %v1104_v38 = vrot.slane %v984_v34, 5  ;;  %v1107_v39 = vrot.slane %v985_v35, 5  ;;  %v658_v55 = vshll.u32 %v472_v42, 16  ;;  %v474_v21 = vld [vmem:[%s7059_s11 + $0x54] sm:$0xf] }
  0x40   : > { %3924 = vmatmul.mubr.bf16.gmra.mrb[8].mxu0 %v6790_v7  ;;  %v608_v7 = vrot.slane %v607_v62, 4  ;;  %v641_v36 = vor.u32 %v640_v30, %v636_v29  ;;  %v668_v61 = vshll.u32 %v473_v43, 16  ;;  %v1111_v8 = vrot.slane %v987_v3, 5  ;;  %v475_v24 = vld [vmem:[%s7059_s11 + $0x58] sm:$0xf] }
  0x41   : > { %4085 = vmatmul.mubr.bf16.gmra.mrb[8].mxu1 %v5488_v11  ;;  %3931 = vmatprep.mubr.bf16.mxu0 %v5457_v56  ;;  %v6802_v11 = vld [vmem:[%s8699_s1 + $0x190] sm:$0xff]   ;;  %v1105_v48 = vsel %vm7073_vm4, %v5475_v37, %v1104_v38  ;;  %v1106_v49 = vrot.slane %v1104_v38, 4  ;;  %v662_v56 = vshrl.u32 %v472_v42, 16  ;;  %v660_v0 = vrot.slane %v658_v55, 5  ;;  %v476_v25 = vld [vmem:[%s7059_s11 + $0x5c] sm:$0x1] }
  0x42   : > { %4092 = vmatprep.mubr.bf16.mxu1 %v6795_v20  ;;  %v613_v12 = vsel %vm7082_vm5, %v608_v7, %v612_v58  ;;  %6473 = vmatpush3.bf16.msra.mxu1 %v6802_v11  ;;  %v625_v20 = vshrl.u32 %v468_v15, 16  ;;  %v642_v45 = vrot.slane %v641_v36, 4  ;;  %v670_v5 = vrot.slane %v668_v61, 5 }
  0x43   : > { %v5458_v22 = vcombine.low %v613_v12, %v623_v16  ;;  %v1108_v59 = vsel %vm7073_vm4, %v1106_v49, %v1107_v39  ;;  %v664_v1 = vrot.slane %v662_v56, 4  ;;  %v5476_v7 = vrot.slane %v986_v2, 9  ;;  %v6809_v12 = vld [vmem:[%s8699_s1 + $0x1d8] sm:$0xff]   ;;  %v989_v39 = vld [vmem:[%s7059_s11 + $0x54] sm:$0xe] }
  0x44   : > { %v627_v27 = vrot.slane %v625_v20, 4  ;;  %v647_v58 = vsel %vm7082_vm5, %v642_v45, %v646_v31  ;;  %v5491_v63 = vcombine.low %v1105_v48, %v1108_v59  ;;  %v1114_v11 = vrot.slane %v988_v6, 5  ;;  %6474 = vmatprep.subr.bf16.mxu1 %v6809_v12  ;;  %v478_v49 = vld [vmem:[%s7059_s11 + $0x64] sm:$0xf]  ;;  %v994_v12 = vld [vmem:[%s7059_s11 + $0x68] sm:$0x1] }
  0x45   : > { %v665_v10 = vor.u32 %v664_v1, %v660_v0  ;;  %v1112_v14 = vsel %vm7073_vm4, %v5476_v7, %v1111_v8  ;;  %v1113_v15 = vrot.slane %v1111_v8, 4  ;;  %v686_v30 = vshrl.u32 %v475_v24, 16  ;;  %v992_v8 = vld [vmem:[%s7059_s11 + $0x60] sm:$0xe] }
  0x46   : > { %v631_v32 = vor.u32 %v630_v28, %v627_v27  ;;  %v676_v27 = vshll.u32 %v474_v21, 16  ;;  %v692_v31 = vshll.u32 %v476_v25, 16  ;;  %v5477_v43 = vrot.slane %v989_v39, 9  ;;  %v6814_v25 = vld [vmem:[%s7059_s11 + $0x60] sm:$0xff]  }
  0x47   : > { %v666_v16 = vrot.slane %v665_v10, 4  ;;  %v1115_v20 = vsel %vm7073_vm4, %v1113_v15, %v1114_v11  ;;  %v688_v36 = vrot.slane %v686_v30, 4  ;;  %v706_v61 = vshll.u32 %v478_v49, 16  ;;  %v6816_v15 = vld [vmem:[%s8699_s1 + $0x120] sm:$0xff]   ;;  %v481_v30 = vld [vmem:[%s7059_s11 + $0x70] sm:$0xf] }
  0x48   : > { %3932 = vmatmul.mubr.bf16.gmra.mrb[12].mxu0 %v6796_v40  ;;  %v471_v40 = vld [vmem:[%s7059_s11 + $0x48] sm:$0xf]  ;;  %v632_v41 = vrot.slane %v631_v32, 4  ;;  %v5492_v23 = vcombine.low %v1112_v14, %v1115_v20  ;;  %v6811_v32 = vld [vmem:[%s7059_s11 + $0x60] sm:$0xff]   ;;  %v678_v34 = vrot.slane %v676_v27, 5  ;;  %v694_v37 = vrot.slane %v692_v31, 5 }
  0x49   : > { %4093 = vmatmul.mubr.bf16.gmra.mrb[12].mxu1 %v5489_v57  ;;  %3939 = vmatprep.mubr.bf16.mxu0 %v5458_v22  ;;  %v652_v50 = vshll.u32 %v471_v40, 16  ;;  %v6807_v57 = vld [vmem:[%s8699_s1 + $0x158] sm:$0xff]   ;;  %v671_v22 = vsel %vm7082_vm5, %v666_v16, %v670_v5  ;;  %v708_v6 = vrot.slane %v706_v61, 5  ;;  %v480_v27 = vld [vmem:[%s7059_s11 + $0x6c] sm:$0xf] }
  0x4a   : > { %4100 = vmatprep.mubr.bf16.mxu1 %v6797_v44  ;;  %v649_v44 = vshrl.u32 %v471_v40, 16  ;;  %v637_v53 = vsel %vm7082_vm5, %v632_v41, %v636_v29  ;;  %6362 = vmatprep.subr.bf16.mxu0 %v6807_v57  ;;  %v682_v29 = vshll.u32 %v475_v24, 16  ;;  %v990_v40 = vld [vmem:[%s7059_s11 + $0x58] sm:$0xf]  ;;  %v991_v41 = vld [vmem:[%s7059_s11 + $0x5c] sm:$0x1] }
  0x4b   : > { %v654_v60 = vrot.slane %v652_v50, 5  ;;  %v5459_v62 = vcombine.low %v637_v53, %v647_v58  ;;  %6363 = vmatpush3.bf16.msra.mxu0 %v6808_v9  ;;  %v1121_v45 = vrot.slane %v991_v41, 5  ;;  %v479_v50 = vld [vmem:[%s7059_s11 + $0x68] sm:$0x1]  ;;  %v6813_v58 = vld [vmem:[%s7059_s11 + $0x6c] sm:$0xff]  }
  0x4c   : > { %v651_v54 = vrot.slane %v649_v44, 4  ;;  %v684_v35 = vrot.slane %v682_v29, 5  ;;  %v1118_v44 = vrot.slane %v990_v40, 5  ;;  %v716_v3 = vshll.u32 %v479_v50, 16  ;;  %v993_v9 = vld [vmem:[%s7059_s11 + $0x64] sm:$0xf] }
  0x4d   : > { %v1125_v14 = vrot.slane %v993_v9, 5  ;;  %v482_v31 = vld [vmem:[%s7059_s11 + $0x74] sm:$0x1] }
  0x4e   : > { %v655_v4 = vor.u32 %v654_v60, %v651_v54  ;;  %v689_v42 = vor.u32 %v688_v36, %v684_v35  ;;  %v6812_v54 = vld [vmem:[%s7059_s11 + $0x54] sm:$0xff]   ;;  %v1119_v55 = vsel %vm7073_vm4, %v5477_v43, %v1118_v44  ;;  %v1120_v56 = vrot.slane %v1118_v44, 4 }
  0x4f   : > { %v718_v11 = vrot.slane %v716_v3, 5  ;;  %v734_v36 = vshrl.u32 %v481_v30, 16 }
  0x50   : > { %3940 = vmatmul.mubr.bf16.gmra.mrb[16].mxu0 %v6798_v13  ;;  %v656_v13 = vrot.slane %v655_v4, 4  ;;  %v690_v53 = vrot.slane %v689_v42, 4  ;;  %v1122_v1 = vsel %vm7073_vm4, %v1120_v56, %v1121_v45  ;;  %v995_v45 = vld [vmem:[%s7059_s11 + $0x6c] sm:$0xe]  ;;  %v484_v56 = vld [vmem:[%s7059_s11 + $0x7c] sm:$0xf] }
  0x51   : > { %4101 = vmatmul.mubr.bf16.gmra.mrb[16].mxu1 %v5490_v17  ;;  %3947 = vmatprep.mubr.bf16.mxu0 %v5459_v62  ;;  %v6810_v17 = vld [vmem:[%s8699_s1 + $0x198] sm:$0xff]   ;;  %v710_v62 = vshrl.u32 %v478_v49, 16  ;;  %v5493_v5 = vcombine.low %v1119_v55, %v1122_v1  ;;  %v736_v42 = vrot.slane %v734_v36, 4  ;;  %v5479_v50 = vrot.slane %v995_v45, 9  ;;  %v487_v36 = vld [vmem:[%s7059_s11 + $0x88] sm:$0xf] }
  0x52   : > { %4108 = vmatprep.mubr.bf16.mxu1 %v6803_v26  ;;  %v661_v18 = vsel %vm7082_vm5, %v656_v13, %v660_v0  ;;  %6475 = vmatpush3.bf16.msra.mxu1 %v6810_v17  ;;  %v673_v26 = vshrl.u32 %v474_v21, 16  ;;  %v695_v0 = vsel %vm7082_vm5, %v690_v53, %v694_v37  ;;  %v5478_v13 = vrot.slane %v992_v8, 9 }
  0x53   : > { %v5460_v28 = vcombine.low %v661_v18, %v671_v22  ;;  %v712_v7 = vrot.slane %v710_v62, 4  ;;  %v1128_v17 = vrot.slane %v994_v12, 5  ;;  %v6817_v18 = vld [vmem:[%s8699_s1 + $0x1e0] sm:$0xff]   ;;  %v1127_v21 = vrot.slane %v1125_v14, 4 }
  0x54   : > { %v675_v33 = vrot.slane %v673_v26, 4  ;;  %v1126_v20 = vsel %vm7073_vm4, %v5478_v13, %v1125_v14  ;;  %6476 = vmatprep.subr.bf16.mxu1 %v6817_v18  ;;  %v740_v37 = vshll.u32 %v482_v31, 16  ;;  %v754_v3 = vshll.u32 %v484_v56, 16  ;;  %v998_v14 = vld [vmem:[%s7059_s11 + $0x78] sm:$0xe] }
  0x55   : > { %v713_v16 = vor.u32 %v712_v7, %v708_v6  ;;  %v1129_v26 = vsel %vm7073_vm4, %v1127_v21, %v1128_v17  ;;  %v1000_v18 = vld [vmem:[%s7059_s11 + $0x80] sm:$0x1]  ;;  %v6824_v21 = vld [vmem:[%s8699_s1 + $0x128] sm:$0xff]   ;;  %v6822_v31 = vld [vmem:[%s7059_s11 + $0x78] sm:$0xff]  }
  0x56   : > { %v679_v38 = vor.u32 %v678_v34, %v675_v33  ;;  %v5494_v29 = vcombine.low %v1126_v20, %v1129_v26  ;;  %v724_v33 = vshll.u32 %v480_v27, 16  ;;  %v742_v43 = vrot.slane %v740_v37, 5  ;;  %v488_v37 = vld [vmem:[%s7059_s11 + $0x8c] sm:$0x1] }
  0x57   : > { %v714_v22 = vrot.slane %v713_v16, 4  ;;  %v756_v12 = vrot.slane %v754_v3, 5 }
  0x58   : > { %3948 = vmatmul.mubr.bf16.gmra.mrb[20].mxu0 %v6804_v47  ;;  %v477_v47 = vld [vmem:[%s7059_s11 + $0x60] sm:$0xf]  ;;  %v680_v48 = vrot.slane %v679_v38, 4  ;;  %v6819_v38 = vld [vmem:[%s7059_s11 + $0x78] sm:$0xff]   ;;  %v726_v40 = vrot.slane %v724_v33, 5 }
  0x59   : > { %4109 = vmatmul.mubr.bf16.gmra.mrb[20].mxu1 %v5491_v63  ;;  %3955 = vmatprep.mubr.bf16.mxu0 %v5460_v28  ;;  %v700_v57 = vshll.u32 %v477_v47, 16  ;;  %v6815_v63 = vld [vmem:[%s8699_s1 + $0x160] sm:$0xff]   ;;  %v719_v28 = vsel %vm7082_vm5, %v714_v22, %v718_v11 }
  0x5a   : > { %4116 = vmatprep.mubr.bf16.mxu1 %v6805_v52  ;;  %v697_v52 = vshrl.u32 %v477_v47, 16  ;;  %v685_v59 = vsel %vm7082_vm5, %v680_v48, %v684_v35  ;;  %6364 = vmatprep.subr.bf16.mxu0 %v6815_v63  ;;  %v730_v35 = vshll.u32 %v481_v30, 16  ;;  %v996_v47 = vld [vmem:[%s7059_s11 + $0x70] sm:$0xf]  ;;  %v997_v48 = vld [vmem:[%s7059_s11 + $0x74] sm:$0x1] }
  0x5b   : > { %v702_v2 = vrot.slane %v700_v57, 5  ;;  %v5461_v4 = vcombine.low %v685_v59, %v695_v0  ;;  %6365 = vmatpush3.bf16.msra.mxu0 %v6816_v15  ;;  %v1135_v53 = vrot.slane %v997_v48, 5  ;;  %v485_v57 = vld [vmem:[%s7059_s11 + $0x80] sm:$0x1]  ;;  %v6821_v0 = vld [vmem:[%s7059_s11 + $0x84] sm:$0xff]  }
  0x5c   : > { %v699_v60 = vrot.slane %v697_v52, 4  ;;  %v732_v41 = vrot.slane %v730_v35, 5  ;;  %v1132_v52 = vrot.slane %v996_v47, 5  ;;  %v764_v9 = vshll.u32 %v485_v57, 16  ;;  %v999_v15 = vld [vmem:[%s7059_s11 + $0x7c] sm:$0xf] }
  0x5d   : > { %v1139_v20 = vrot.slane %v999_v15, 5  ;;  %v486_v33 = vld [vmem:[%s7059_s11 + $0x84] sm:$0xf] }
  0x5e   : > { %v703_v10 = vor.u32 %v702_v2, %v699_v60  ;;  %v737_v49 = vor.u32 %v736_v42, %v732_v41  ;;  %v6820_v60 = vld [vmem:[%s7059_s11 + $0x6c] sm:$0xff]   ;;  %v1133_v61 = vsel %vm7073_vm4, %v5479_v50, %v1132_v52  ;;  %v1134_v62 = vrot.slane %v1132_v52, 4 }
  0x5f   : > { %v766_v17 = vrot.slane %v764_v9, 5  ;;  %v782_v42 = vshrl.u32 %v487_v36, 16 }
  0x60   : > { %3956 = vmatmul.mubr.bf16.gmra.mrb[24].mxu0 %v6806_v19  ;;  %v704_v19 = vrot.slane %v703_v10, 4  ;;  %v738_v59 = vrot.slane %v737_v49, 4  ;;  %v1136_v7 = vsel %vm7073_vm4, %v1134_v62, %v1135_v53  ;;  %v1001_v53 = vld [vmem:[%s7059_s11 + $0x84] sm:$0xe]  ;;  %v490_v62 = vld [vmem:[%s7059_s11 + $0x94] sm:$0xf] }
  0x61   : > { %4117 = vmatmul.mubr.bf16.gmra.mrb[24].mxu1 %v5492_v23  ;;  %3963 = vmatprep.mubr.bf16.mxu0 %v5461_v4  ;;  %v6818_v23 = vld [vmem:[%s8699_s1 + $0x1a0] sm:$0xff]   ;;  %v758_v4 = vshrl.u32 %v484_v56, 16  ;;  %v5495_v11 = vcombine.low %v1133_v61, %v1136_v7  ;;  %v784_v49 = vrot.slane %v782_v42, 4  ;;  %v5481_v57 = vrot.slane %v1001_v53, 9 }
  0x62   : > { %4124 = vmatprep.mubr.bf16.mxu1 %v6811_v32  ;;  %v709_v24 = vsel %vm7082_vm5, %v704_v19, %v708_v6  ;;  %6477 = vmatpush3.bf16.msra.mxu1 %v6818_v23  ;;  %v721_v32 = vshrl.u32 %v480_v27, 16  ;;  %v743_v6 = vsel %vm7082_vm5, %v738_v59, %v742_v43  ;;  %v5480_v19 = vrot.slane %v998_v14, 9  ;;  %v493_v42 = vld [vmem:[%s7059_s11 + $0xa0] sm:$0xf] }
  0x63   : > { %v5462_v34 = vcombine.low %v709_v24, %v719_v28  ;;  %v760_v13 = vrot.slane %v758_v4, 4  ;;  %v1142_v23 = vrot.slane %v1000_v18, 5  ;;  %v6825_v24 = vld [vmem:[%s8699_s1 + $0x1e8] sm:$0xff]   ;;  %v1141_v27 = vrot.slane %v1139_v20, 4 }
  0x64   : > { %v723_v39 = vrot.slane %v721_v32, 4  ;;  %v1140_v26 = vsel %vm7073_vm4, %v5480_v19, %v1139_v20  ;;  %6478 = vmatprep.subr.bf16.mxu1 %v6825_v24  ;;  %v788_v43 = vshll.u32 %v488_v37, 16  ;;  %v802_v9 = vshll.u32 %v490_v62, 16  ;;  %v1004_v20 = vld [vmem:[%s7059_s11 + $0x90] sm:$0xe] }
  0x65   : > { %v761_v22 = vor.u32 %v760_v13, %v756_v12  ;;  %v1143_v32 = vsel %vm7073_vm4, %v1141_v27, %v1142_v23  ;;  %v1006_v24 = vld [vmem:[%s7059_s11 + $0x98] sm:$0x1]  ;;  %v6832_v27 = vld [vmem:[%s8699_s1 + $0x130] sm:$0xff]  }
  0x66   : > { %v727_v44 = vor.u32 %v726_v40, %v723_v39  ;;  %v5496_v35 = vcombine.low %v1140_v26, %v1143_v32  ;;  %v772_v39 = vshll.u32 %v486_v33, 16  ;;  %v790_v50 = vrot.slane %v788_v43, 5  ;;  %v6830_v37 = vld [vmem:[%s7059_s11 + $0x90] sm:$0xff]   ;;  %v494_v43 = vld [vmem:[%s7059_s11 + $0xa4] sm:$0x1] }
  0x67   : > { %v762_v28 = vrot.slane %v761_v22, 4  ;;  %v804_v18 = vrot.slane %v802_v9, 5 }
  0x68   : > { %3964 = vmatmul.mubr.bf16.gmra.mrb[28].mxu0 %v6812_v54  ;;  %v483_v54 = vld [vmem:[%s7059_s11 + $0x78] sm:$0xf]  ;;  %v728_v55 = vrot.slane %v727_v44, 4  ;;  %v6827_v44 = vld [vmem:[%s7059_s11 + $0x90] sm:$0xff]   ;;  %v774_v47 = vrot.slane %v772_v39, 5 }
  0x69   : > { %4125 = vmatmul.mubr.bf16.gmra.mrb[28].mxu1 %v5493_v5  ;;  %3971 = vmatprep.mubr.bf16.mxu0 %v5462_v34  ;;  %v748_v63 = vshll.u32 %v483_v54, 16  ;;  %v6823_v5 = vld [vmem:[%s8699_s1 + $0x168] sm:$0xff]   ;;  %v767_v34 = vsel %vm7082_vm5, %v762_v28, %v766_v17  ;;  %v492_v39 = vld [vmem:[%s7059_s11 + $0x9c] sm:$0xf] }
  0x6a   : > { %4132 = vmatprep.mubr.bf16.mxu1 %v6813_v58  ;;  %v745_v58 = vshrl.u32 %v483_v54, 16  ;;  %v733_v1 = vsel %vm7082_vm5, %v728_v55, %v732_v41  ;;  %6366 = vmatprep.subr.bf16.mxu0 %v6823_v5  ;;  %v778_v41 = vshll.u32 %v487_v36, 16  ;;  %v1002_v54 = vld [vmem:[%s7059_s11 + $0x88] sm:$0xf]  ;;  %v1003_v55 = vld [vmem:[%s7059_s11 + $0x8c] sm:$0x1] }
  0x6b   : > { %v750_v8 = vrot.slane %v748_v63, 5  ;;  %v5463_v10 = vcombine.low %v733_v1, %v743_v6  ;;  %6367 = vmatpush3.bf16.msra.mxu0 %v6824_v21  ;;  %v1149_v59 = vrot.slane %v1003_v55, 5  ;;  %v491_v63 = vld [vmem:[%s7059_s11 + $0x98] sm:$0x1]  ;;  %v6829_v6 = vld [vmem:[%s7059_s11 + $0x9c] sm:$0xff]  }
  0x6c   : > { %v747_v2 = vrot.slane %v745_v58, 4  ;;  %v780_v48 = vrot.slane %v778_v41, 5  ;;  %v1146_v58 = vrot.slane %v1002_v54, 5  ;;  %v812_v15 = vshll.u32 %v491_v63, 16  ;;  %v1005_v21 = vld [vmem:[%s7059_s11 + $0x94] sm:$0xf] }
  0x6d   : > { %v1153_v26 = vrot.slane %v1005_v21, 5 }
  0x6e   : > { %v751_v16 = vor.u32 %v750_v8, %v747_v2  ;;  %v785_v56 = vor.u32 %v784_v49, %v780_v48  ;;  %v6828_v2 = vld [vmem:[%s7059_s11 + $0x84] sm:$0xff]   ;;  %v1147_v3 = vsel %vm7073_vm4, %v5481_v57, %v1146_v58  ;;  %v1148_v4 = vrot.slane %v1146_v58, 4 }
  0x6f   : > { %v814_v23 = vrot.slane %v812_v15, 5  ;;  %v830_v49 = vshrl.u32 %v493_v42, 16 }
  0x70   : > { %3972 = vmatmul.mubr.bf16.gmra.mrb[32].mxu0 %v6814_v25  ;;  %v752_v25 = vrot.slane %v751_v16, 4  ;;  %v786_v1 = vrot.slane %v785_v56, 4  ;;  %v1150_v13 = vsel %vm7073_vm4, %v1148_v4, %v1149_v59  ;;  %v1007_v59 = vld [vmem:[%s7059_s11 + $0x9c] sm:$0xe]  ;;  %v496_v4 = vld [vmem:[%s7059_s11 + $0xac] sm:$0xf] }
  0x71   : > { %4133 = vmatmul.mubr.bf16.gmra.mrb[32].mxu1 %v5494_v29  ;;  %3979 = vmatprep.mubr.bf16.mxu0 %v5463_v10  ;;  %v6826_v29 = vld [vmem:[%s8699_s1 + $0x1a8] sm:$0xff]   ;;  %v806_v10 = vshrl.u32 %v490_v62, 16  ;;  %v5497_v17 = vcombine.low %v1147_v3, %v1150_v13  ;;  %v832_v56 = vrot.slane %v830_v49, 4  ;;  %v5483_v63 = vrot.slane %v1007_v59, 9  ;;  %v499_v49 = vld [vmem:[%s7059_s11 + $0xb8] sm:$0xf] }
  0x72   : > { %4140 = vmatprep.mubr.bf16.mxu1 %v6819_v38  ;;  %v757_v30 = vsel %vm7082_vm5, %v752_v25, %v756_v12  ;;  %6479 = vmatpush3.bf16.msra.mxu1 %v6826_v29  ;;  %v769_v38 = vshrl.u32 %v486_v33, 16  ;;  %v791_v12 = vsel %vm7082_vm5, %v786_v1, %v790_v50  ;;  %v5482_v25 = vrot.slane %v1004_v20, 9 }
  0x73   : > { %v5464_v40 = vcombine.low %v757_v30, %v767_v34  ;;  %v808_v19 = vrot.slane %v806_v10, 4  ;;  %v1156_v29 = vrot.slane %v1006_v24, 5  ;;  %v6833_v30 = vld [vmem:[%s8699_s1 + $0x1f0] sm:$0xff]   ;;  %v1155_v33 = vrot.slane %v1153_v26, 4 }
  0x74   : > { %v771_v45 = vrot.slane %v769_v38, 4  ;;  %v1154_v32 = vsel %vm7073_vm4, %v5482_v25, %v1153_v26  ;;  %6480 = vmatprep.subr.bf16.mxu1 %v6833_v30  ;;  %v836_v50 = vshll.u32 %v494_v43, 16  ;;  %v850_v15 = vshll.u32 %v496_v4, 16  ;;  %v1010_v26 = vld [vmem:[%s7059_s11 + $0xa8] sm:$0xe] }
  0x75   : > { %v809_v28 = vor.u32 %v808_v19, %v804_v18  ;;  %v1157_v38 = vsel %vm7073_vm4, %v1155_v33, %v1156_v29  ;;  %v1012_v30 = vld [vmem:[%s7059_s11 + $0xb0] sm:$0x1]  ;;  %v6840_v33 = vld [vmem:[%s8699_s1 + $0x138] sm:$0xff]   ;;  %v6838_v43 = vld [vmem:[%s7059_s11 + $0xa8] sm:$0xff]  }
  0x76   : > { %v775_v52 = vor.u32 %v774_v47, %v771_v45  ;;  %v5498_v41 = vcombine.low %v1154_v32, %v1157_v38  ;;  %v820_v45 = vshll.u32 %v492_v39, 16  ;;  %v838_v57 = vrot.slane %v836_v50, 5  ;;  %v500_v50 = vld [vmem:[%s7059_s11 + $0xbc] sm:$0x1] }
  0x77   : > { %v810_v34 = vrot.slane %v809_v28, 4  ;;  %v852_v24 = vrot.slane %v850_v15, 5  ;;  %v6844_v15 = vld [vmem:[%s7059_s11 + $0xb4] sm:$0xff]  }
  0x78   : > { %3980 = vmatmul.mubr.bf16.gmra.mrb[36].mxu0 %v6820_v60  ;;  %v489_v60 = vld [vmem:[%s7059_s11 + $0x90] sm:$0xf]  ;;  %v776_v61 = vrot.slane %v775_v52, 4  ;;  %v6835_v52 = vld [vmem:[%s7059_s11 + $0xa8] sm:$0xff]   ;;  %v822_v54 = vrot.slane %v820_v45, 5 }
  0x79   : > { %4141 = vmatmul.mubr.bf16.gmra.mrb[36].mxu1 %v5495_v11  ;;  %3987 = vmatprep.mubr.bf16.mxu0 %v5464_v40  ;;  %v796_v5 = vshll.u32 %v489_v60, 16  ;;  %v6831_v11 = vld [vmem:[%s8699_s1 + $0x170] sm:$0xff]   ;;  %v815_v40 = vsel %vm7082_vm5, %v810_v34, %v814_v23 }
  0x7a   : > { %4148 = vmatprep.mubr.bf16.mxu1 %v6821_v0  ;;  %v793_v0 = vshrl.u32 %v489_v60, 16  ;;  %v781_v7 = vsel %vm7082_vm5, %v776_v61, %v780_v48  ;;  %6368 = vmatprep.subr.bf16.mxu0 %v6831_v11  ;;  %v826_v48 = vshll.u32 %v493_v42, 16  ;;  %v1008_v60 = vld [vmem:[%s7059_s11 + $0xa0] sm:$0xf]  ;;  %v1009_v61 = vld [vmem:[%s7059_s11 + $0xa4] sm:$0x1] }
  0x7b   : > { %v798_v14 = vrot.slane %v796_v5, 5  ;;  %v5465_v16 = vcombine.low %v781_v7, %v791_v12  ;;  %6369 = vmatpush3.bf16.msra.mxu0 %v6832_v27  ;;  %v1163_v1 = vrot.slane %v1009_v61, 5  ;;  %v497_v5 = vld [vmem:[%s7059_s11 + $0xb0] sm:$0x1]  ;;  %v6837_v12 = vld [vmem:[%s7059_s11 + $0xb4] sm:$0xff]  }
  0x7c   : > { %v795_v8 = vrot.slane %v793_v0, 4  ;;  %v828_v55 = vrot.slane %v826_v48, 5  ;;  %v1160_v0 = vrot.slane %v1008_v60, 5  ;;  %v860_v21 = vshll.u32 %v497_v5, 16  ;;  %v1011_v27 = vld [vmem:[%s7059_s11 + $0xac] sm:$0xf] }
  0x7d   : > { %v1167_v32 = vrot.slane %v1011_v27, 5  ;;  %v498_v45 = vld [vmem:[%s7059_s11 + $0xb4] sm:$0xf] }
  0x7e   : > { %v799_v22 = vor.u32 %v798_v14, %v795_v8  ;;  %v833_v62 = vor.u32 %v832_v56, %v828_v55  ;;  %v6836_v8 = vld [vmem:[%s7059_s11 + $0x9c] sm:$0xff]   ;;  %v1161_v9 = vsel %vm7073_vm4, %v5483_v63, %v1160_v0  ;;  %v1162_v10 = vrot.slane %v1160_v0, 4 }
  0x7f   : > { %v862_v29 = vrot.slane %v860_v21, 5  ;;  %v878_v56 = vshrl.u32 %v499_v49, 16 }
  0x80   : > { %3988 = vmatmul.mubr.bf16.gmra.mrb[40].mxu0 %v6822_v31  ;;  %v800_v31 = vrot.slane %v799_v22, 4  ;;  %v834_v7 = vrot.slane %v833_v62, 4  ;;  %v1164_v19 = vsel %vm7073_vm4, %v1162_v10, %v1163_v1  ;;  %v1013_v1 = vld [vmem:[%s7059_s11 + $0xb4] sm:$0xe] }
  0x81   : > { %4149 = vmatmul.mubr.bf16.gmra.mrb[40].mxu1 %v5496_v35  ;;  %3995 = vmatprep.mubr.bf16.mxu0 %v5465_v16  ;;  %v6834_v35 = vld [vmem:[%s8699_s1 + $0x1b0] sm:$0xff]   ;;  %v854_v16 = vshrl.u32 %v496_v4, 16  ;;  %v5499_v23 = vcombine.low %v1161_v9, %v1164_v19  ;;  %v880_v62 = vrot.slane %v878_v56, 4  ;;  %v5485_v5 = vrot.slane %v1013_v1, 9  ;;  %v7426_v9 = vld [vmem:[%s8699_s1 + $0x200] sm:$0xff]  }
  0x82   : > { %4156 = vmatprep.mubr.bf16.mxu1 %v6827_v44  ;;  %v805_v36 = vsel %vm7082_vm5, %v800_v31, %v804_v18  ;;  %6481 = vmatpush3.bf16.msra.mxu1 %v6834_v35  ;;  %v817_v44 = vshrl.u32 %v492_v39, 16  ;;  %v839_v18 = vsel %vm7082_vm5, %v834_v7, %v838_v57  ;;  %v5484_v31 = vrot.slane %v1010_v26, 9  ;;  %v5550_v19 = vld [vmem:[%s7059_s11 + $0xc] sm:$0xf] }
  0x83   : > { %v5466_v47 = vcombine.low %v805_v36, %v815_v40  ;;  %v856_v25 = vrot.slane %v854_v16, 4  ;;  %v1170_v35 = vrot.slane %v1012_v30, 5  ;;  %v6841_v36 = vld [vmem:[%s8699_s1 + $0x1f8] sm:$0xff]   ;;  %v1169_v39 = vrot.slane %v1167_v32, 4 }
  0x84   : > { %v819_v53 = vrot.slane %v817_v44, 4  ;;  %v1168_v38 = vsel %vm7073_vm4, %v5484_v31, %v1167_v32  ;;  %6482 = vmatprep.subr.bf16.mxu1 %v6841_v36  ;;  %v884_v57 = vshll.u32 %v500_v50, 16 }
  0x85   : > { %v857_v34 = vor.u32 %v856_v25, %v852_v24  ;;  %v1171_v44 = vsel %vm7073_vm4, %v1169_v39, %v1170_v35  ;;  %v5743_v35 = vld [vmem:[%s7059_s11 + $0x1c] sm:$0xf] }
  0x86   : > { %v823_v58 = vor.u32 %v822_v54, %v819_v53  ;;  %v5500_v48 = vcombine.low %v1168_v38, %v1171_v44  ;;  %v868_v53 = vshll.u32 %v498_v45, 16  ;;  %v886_v63 = vrot.slane %v884_v57, 5 }
  0x87   : > { %v858_v40 = vrot.slane %v857_v34, 4  ;;  %v5742_v34 = vld [vmem:[%s7059_s11 + $0x18] sm:$0xf] }
  0x88   : > { %3996 = vmatmul.mubr.bf16.gmra.mrb[44].mxu0 %v6828_v2  ;;  %v495_v2 = vld [vmem:[%s7059_s11 + $0xa8] sm:$0xf]  ;;  %v824_v3 = vrot.slane %v823_v58, 4  ;;  %v6843_v58 = vld [vmem:[%s7059_s11 + $0xc0] sm:$0xff]   ;;  %v870_v60 = vrot.slane %v868_v53, 5  ;;  %v2407_v44 = vshll.u32 %v5742_v34, 16 }
  0x89   : > { %4157 = vmatmul.mubr.bf16.gmra.mrb[44].mxu1 %v5497_v17  ;;  %4003 = vmatprep.mubr.bf16.mxu0 %v5466_v47  ;;  %v844_v11 = vshll.u32 %v495_v2, 16  ;;  %v6839_v17 = vld [vmem:[%s8699_s1 + $0x178] sm:$0xff]   ;;  %v863_v47 = vsel %vm7082_vm5, %v858_v40, %v862_v29  ;;  %v7448_v29 = vld [vmem:[%s8702_s4] sm:$0xff]  }
  0x8a   : > { %4164 = vmatprep.mubr.bf16.mxu1 %v6829_v6  ;;  %v841_v6 = vshrl.u32 %v495_v2, 16  ;;  %v829_v13 = vsel %vm7082_vm5, %v824_v3, %v828_v55  ;;  %6370 = vmatprep.subr.bf16.mxu0 %v6839_v17  ;;  %v874_v55 = vshll.u32 %v499_v49, 16  ;;  %v1014_v2 = vld [vmem:[%s7059_s11 + $0xb8] sm:$0xf]  ;;  %v1015_v3 = vld [vmem:[%s7059_s11 + $0xbc] sm:$0x1] }
  0x8b   : > { %v846_v20 = vrot.slane %v844_v11, 5  ;;  %v5467_v22 = vcombine.low %v829_v13, %v839_v18  ;;  %6371 = vmatpush3.bf16.msra.mxu0 %v6840_v33  ;;  %v1177_v7 = vrot.slane %v1015_v3, 5  ;;  %v5615_v11 = vld [vmem:[%s7059_s11 + $0x10] sm:$0xf]  ;;  %v1459_v33 = vshll.u32 %v5550_v19, 16 }
  0x8c   : > { %v843_v14 = vrot.slane %v841_v6, 4  ;;  %v876_v61 = vrot.slane %v874_v55, 5  ;;  %v1174_v6 = vrot.slane %v1014_v2, 5  ;;  %v2017_v18 = vrot.slane %v5615_v11, 5  ;;  %6628 = vmatprep.subr.bf16.mxu0 %v7426_v9  ;;  %v5744_v40 = vld [vmem:[%s7059_s11 + $0x20] sm:$0x1] }
  0x8d   : > { %v2413_v49 = vshll.u32 %v5743_v35, 16  ;;  %v2409_v53 = vrot.slane %v2407_v44, 5  ;;  %v2423_v57 = vshll.u32 %v5744_v40, 16  ;;  %v6849_v11 = vld [vmem:[%s8699_s1 + $0x208] sm:$0xff]  }
  0x8e   : > { %v847_v28 = vor.u32 %v846_v20, %v843_v14  ;;  %v881_v4 = vor.u32 %v880_v62, %v876_v61  ;;  %v1175_v16 = vsel %vm7073_vm4, %v5485_v5, %v1174_v6  ;;  %v1176_v17 = vrot.slane %v1174_v6, 4  ;;  %v5618_v62 = vld [vmem:[%s7059_s11 + $0x1c] sm:$0xf]  ;;  %v6851_v40 = vld [vmem:[%s8702_s4 + $0x8] sm:$0xff]  }
  0x8f   : > { %v2415_v56 = vrot.slane %v2413_v49, 5  ;;  %v2425_v1 = vrot.slane %v2423_v57, 5  ;;  %v2024_v3 = vrot.slane %v5618_v62, 5 }
  0x90   : > { %4004 = vmatmul.mubr.bf16.gmra.mrb[48].mxu0 %v6830_v37  ;;  %v848_v37 = vrot.slane %v847_v28, 4  ;;  %v882_v14 = vrot.slane %v881_v4, 4  ;;  %v1178_v26 = vsel %vm7073_vm4, %v1176_v17, %v1177_v7  ;;  %v2019_v28 = vrot.slane %v2017_v18, 4  ;;  %v5553_v4 = vld [vmem:[%s7059_s11 + $0x18] sm:$0xf] }
  0x91   : > { %4165 = vmatmul.mubr.bf16.gmra.mrb[48].mxu1 %v5498_v41  ;;  %4011 = vmatprep.mubr.bf16.mxu0 %v5467_v22  ;;  %v6842_v41 = vld [vmem:[%s8699_s1 + $0x1b8] sm:$0xff]   ;;  %v5551_v22 = vld [vmem:[%s7059_s11 + $0x10] sm:$0xf]  ;;  %v5501_v31 = vcombine.low %v1175_v16, %v1178_v26  ;;  %v1480_v16 = vshrl.u32 %v5553_v4, 16  ;;  %v5745_v17 = vld [vmem:[%s7059_s11 + $0x24] sm:$0xf] }
  0x92   : > { %4172 = vmatprep.mubr.bf16.mxu1 %v6835_v52  ;;  %v853_v42 = vsel %vm7082_vm5, %v848_v37, %v852_v24  ;;  %6483 = vmatpush3.bf16.msra.mxu1 %v6842_v41  ;;  %v865_v52 = vshrl.u32 %v498_v45, 16  ;;  %v1456_v24 = vshrl.u32 %v5550_v19, 16  ;;  %v887_v25 = vsel %vm7082_vm5, %v882_v14, %v886_v63  ;;  %v5619_v63 = vld [vmem:[%s7059_s11 + $0x20] sm:$0x1] }
  0x93   : > { %v5468_v54 = vcombine.low %v853_v42, %v863_v47  ;;  %v1465_v37 = vshll.u32 %v5551_v22, 16  ;;  %v1469_v38 = vshrl.u32 %v5551_v22, 16  ;;  %6676 = vmatprep.subr.bf16.mxu1 %v7448_v29  ;;  %v1461_v42 = vrot.slane %v1459_v33, 5  ;;  %v5746_v22 = vld [vmem:[%s7059_s11 + $0x28] sm:$0xf] }
  0x94   : > { %v867_v59 = vrot.slane %v865_v52, 4  ;;  %v1458_v32 = vrot.slane %v1456_v24, 4  ;;  %v2026_v14 = vrot.slane %v2024_v3, 4  ;;  %v5747_v33 = vld [vmem:[%s7059_s11 + $0x2c] sm:$0x1]  ;;  %v2437_v44 = vshll.u32 %v5746_v22, 16 }
  0x95   : > { %v1467_v45 = vrot.slane %v1465_v37, 5  ;;  %v1471_v47 = vrot.slane %v1469_v38, 4  ;;  %v2428_v38 = vshrl.u32 %v5745_v17, 16  ;;  %v2441_v49 = vshrl.u32 %v5746_v22, 16 }
  0x96   : > { %v871_v0 = vor.u32 %v870_v60, %v867_v59  ;;  %v1462_v50 = vor.u32 %v1461_v42, %v1458_v32 }
  0x97   : > { %v1472_v55 = vor.u32 %v1471_v47, %v1467_v45 }
  0x98   : > { %4012 = vmatmul.mubr.bf16.gmra.mrb[52].mxu0 %v6836_v8  ;;  %v5614_v8 = vld [vmem:[%s7059_s11 + $0xc] sm:$0xe]  ;;  %v872_v10 = vrot.slane %v871_v0, 4  ;;  %v1463_v59 = vrot.slane %v1462_v50, 4  ;;  %v2447_v50 = vshll.u32 %v5747_v33, 16 }
  0x99   : > { %4173 = vmatmul.mubr.bf16.gmra.mrb[52].mxu1 %v5499_v23  ;;  %4019 = vmatprep.mubr.bf16.mxu0 %v5468_v54  ;;  %v5662_v13 = vrot.slane %v5614_v8, 9  ;;  %v5552_v23 = vld [vmem:[%s7059_s11 + $0x14] sm:$0x1]  ;;  %v2417_v54 = vshrl.u32 %v5743_v35, 16  ;;  %v1473_v0 = vrot.slane %v1472_v55, 4  ;;  %v2027_v8 = vrot.slane %v5619_v63, 5 }
  0x9a   : > { %4180 = vmatprep.mubr.bf16.mxu1 %v6837_v12  ;;  %v5616_v12 = vld [vmem:[%s7059_s11 + $0x14] sm:$0x1]  ;;  %v877_v20 = vsel %vm7082_vm5, %v872_v10, %v876_v61  ;;  %v1475_v39 = vshll.u32 %v5552_v23, 16  ;;  %v1468_v5 = vsel %vm7082_vm5, %v1463_v59, %v1467_v45  ;;  %v5554_v10 = vld [vmem:[%s7059_s11 + $0x1c] sm:$0xf]  ;;  %v2439_v55 = vrot.slane %v2437_v44, 5 }
  0x9b   : > { %v2020_v21 = vrot.slane %v5616_v12, 5  ;;  %v2018_v27 = vsel %vm7073_vm4, %v5662_v13, %v2017_v18  ;;  %v5469_v30 = vcombine.low %v877_v20, %v887_v25  ;;  %v2419_v61 = vrot.slane %v2417_v54, 4  ;;  %v6846_v23 = vld [vmem:[%s7059_s11 + $0x18] sm:$0xff]   ;;  %v5622_v45 = vld [vmem:[%s7059_s11 + $0x2c] sm:$0x1] }
  0x9c   : > { %v2028_v24 = vsel %vm7073_vm4, %v2026_v14, %v2027_v8  ;;  %v1482_v25 = vrot.slane %v1480_v16, 4  ;;  %v1489_v26 = vshll.u32 %v5554_v10, 16  ;;  %v2449_v59 = vrot.slane %v2447_v50, 5 }
  0x9d   : > { %v2021_v36 = vsel %vm7073_vm4, %v2019_v28, %v2020_v21  ;;  %v2420_v7 = vor.u32 %v2419_v61, %v2415_v56  ;;  %v1483_v21 = vshll.u32 %v5553_v4, 16  ;;  %v2034_v63 = vrot.slane %v5622_v45, 5 }
  0x9e   : > { %v5678_v41 = vcombine.low %v2018_v27, %v2021_v36  ;;  %v1493_v27 = vshrl.u32 %v5554_v10, 16  ;;  %v1491_v36 = vrot.slane %v1489_v26, 5  ;;  %v6848_v26 = vld [vmem:[%s7059_s11 + $0x24] sm:$0xff]  }
  0x9f   : > { %v2421_v20 = vrot.slane %v2420_v7, 4  ;;  %v6855_v7 = vld [vmem:[%s8702_s4 + $0x10] sm:$0xff]  }
  0xa0   : > { %4020 = vmatmul.mubr.bf16.gmra.mrb[56].mxu0 %v6838_v43  ;;  %v2404_v43 = vshrl.u32 %v5742_v34, 16  ;;  %v5620_v34 = vld [vmem:[%s7059_s11 + $0x24] sm:$0xe]  ;;  %v1495_v37 = vrot.slane %v1493_v27, 4 }
  0xa1   : > { %4181 = vmatmul.mubr.bf16.gmra.mrb[56].mxu1 %v5500_v48  ;;  %4027 = vmatprep.mubr.bf16.mxu0 %v5469_v30  ;;  %v1477_v48 = vrot.slane %v1475_v39, 5  ;;  %v2426_v28 = vsel %vm7082_vm5, %v2421_v20, %v2425_v1  ;;  %v5621_v39 = vld [vmem:[%s7059_s11 + $0x28] sm:$0xf]  ;;  %v6857_v20 = vld [vmem:[%s8699_s1 + $0x218] sm:$0xff]  }
  0xa2   : > { %4188 = vmatprep.mubr.bf16.mxu1 %v6843_v58  ;;  %v2406_v52 = vrot.slane %v2404_v43, 4  ;;  %v5617_v58 = vld [vmem:[%s7059_s11 + $0x18] sm:$0xe]  ;;  %v2431_v43 = vshll.u32 %v5745_v17, 16  ;;  %v1496_v47 = vor.u32 %v1495_v37, %v1491_v36 }
  0xa3   : > { %v5663_v2 = vrot.slane %v5617_v58, 9  ;;  %v1478_v12 = vsel %vm7082_vm5, %v1473_v0, %v1477_v48  ;;  %v2430_v48 = vrot.slane %v2428_v38, 4  ;;  %v2443_v58 = vrot.slane %v2441_v49, 4  ;;  %v5557_v0 = vld [vmem:[%s7059_s11 + $0x28] sm:$0xf] }
  0xa4   : > { %v2410_v60 = vor.u32 %v2409_v53, %v2406_v52  ;;  %v7472_v18 = vcombine.low %v1468_v5, %v1478_v12  ;;  %v5556_v52 = vld [vmem:[%s7059_s11 + $0x24] sm:$0xf]  ;;  %v2433_v54 = vrot.slane %v2431_v43, 5  ;;  %v1497_v57 = vrot.slane %v1496_v47, 4  ;;  %v5558_v5 = vld [vmem:[%s7059_s11 + $0x2c] sm:$0x1] }
  0xa5   : > { %v2025_v13 = vsel %vm7073_vm4, %v5663_v2, %v2024_v3  ;;  %v1504_v1 = vshrl.u32 %v5556_v52, 16  ;;  %v2444_v2 = vor.u32 %v2443_v58, %v2439_v55  ;;  %v1507_v12 = vshll.u32 %v5556_v52, 16  ;;  %v5559_v52 = vld [vmem:[%s7059_s11 + $0x30] sm:$0xf]  ;;  %v5561_v58 = vld [vmem:[%s7059_s11 + $0x38] sm:$0x1] }
  0xa6   : > { %v2411_v6 = vrot.slane %v2410_v60, 4  ;;  %v5679_v30 = vcombine.low %v2025_v13, %v2028_v24  ;;  %v2031_v60 = vrot.slane %v5621_v39, 5  ;;  %v2434_v62 = vor.u32 %v2433_v54, %v2430_v48  ;;  %v5749_v13 = vld [vmem:[%s7059_s11 + $0x34] sm:$0xf] }
  0xa7   : > { %v2445_v14 = vrot.slane %v2444_v2, 4  ;;  %v1513_v16 = vshll.u32 %v5557_v0, 16  ;;  %v1517_v17 = vshrl.u32 %v5557_v0, 16  ;;  %v1523_v24 = vshll.u32 %v5558_v5, 16  ;;  %v6850_v5 = vld [vmem:[%s7059_s11 + $0x30] sm:$0xff]  }
  0xa8   : > { %4028 = vmatmul.mubr.bf16.gmra.mrb[60].mxu0 %v6844_v15  ;;  %v5555_v15 = vld [vmem:[%s7059_s11 + $0x20] sm:$0x1]  ;;  %v2416_v19 = vsel %vm7082_vm5, %v2411_v6, %v2415_v56  ;;  %v5664_v56 = vrot.slane %v5620_v34, 9  ;;  %v2033_v4 = vrot.slane %v2031_v60, 4  ;;  %v5748_v6 = vld [vmem:[%s7059_s11 + $0x30] sm:$0xf] }
  0xa9   : > { %4189 = vmatmul.mubr.bf16.gmra.mrb[60].mxu1 %v5501_v31  ;;  %4229 = vmatprep.mubr.bf16.mxu0 %v5678_v41  ;;  %v1485_v31 = vrot.slane %v1483_v21, 5  ;;  %v1499_v32 = vshll.u32 %v5555_v15, 16  ;;  %v5790_v35 = vcombine.low %v2416_v19, %v2426_v28  ;;  %v2435_v10 = vrot.slane %v2434_v62, 4  ;;  %v5750_v19 = vld [vmem:[%s7059_s11 + $0x38] sm:$0x1] }
  0xaa   : > { %v2032_v3 = vsel %vm7073_vm4, %v5664_v56, %v2031_v60  ;;  %v2035_v15 = vsel %vm7073_vm4, %v2033_v4, %v2034_v63  ;;  %v1515_v27 = vrot.slane %v1513_v16, 5  ;;  %v1519_v28 = vrot.slane %v1517_v17, 4  ;;  %v5751_v63 = vld [vmem:[%s7059_s11 + $0x3c] sm:$0xf]  ;;  %v5753_v16 = vld [vmem:[%s7059_s11 + $0x44] sm:$0x1] }
  0xab   : > { %v1486_v41 = vor.u32 %v1485_v31, %v1482_v25  ;;  %v1501_v42 = vrot.slane %v1499_v32, 5  ;;  %4390 = vmatprep.mubr.bf16.mxu1 %v5790_v35  ;;  %v2440_v21 = vsel %vm7082_vm5, %v2435_v10, %v2439_v55  ;;  %v5680_v22 = vcombine.low %v2032_v3, %v2035_v15  ;;  %v5623_v31 = vld [vmem:[%s7059_s11 + $0x30] sm:$0xe]  ;;  %v6861_v3 = vld [vmem:[%s8699_s1 + $0x220] sm:$0xff]   ;;  %v5626_v17 = vld [vmem:[%s7059_s11 + $0x3c] sm:$0xe] }
  0xac   : > { %v2450_v25 = vsel %vm7082_vm5, %v2445_v14, %v2449_v59  ;;  %v1525_v34 = vrot.slane %v1523_v24, 5  ;;  %v2455_v35 = vshll.u32 %v5748_v6, 16  ;;  %v1520_v37 = vor.u32 %v1519_v28, %v1515_v27  ;;  %v6863_v24 = vld [vmem:[%s8702_s4 + $0x20] sm:$0xff]  }
  0xad   : > { %v1487_v53 = vrot.slane %v1486_v41, 4  ;;  %v5791_v32 = vcombine.low %v2440_v21, %v2450_v25  ;;  %v2461_v39 = vshll.u32 %v5749_v13, 16  ;;  %v5625_v41 = vld [vmem:[%s7059_s11 + $0x38] sm:$0x1]  ;;  %v2471_v45 = vshll.u32 %v5750_v19, 16 }
  0xae   : > { %v2457_v44 = vrot.slane %v2455_v35, 5  ;;  %v1521_v47 = vrot.slane %v1520_v37, 4  ;;  %v2041_v56 = vrot.slane %v5625_v41, 5  ;;  %v1531_v2 = vshll.u32 %v5559_v52, 16 }
  0xaf   : > { %v1492_v61 = vsel %vm7082_vm5, %v1487_v53, %v1491_v36  ;;  %v5624_v36 = vld [vmem:[%s7059_s11 + $0x34] sm:$0xf]  ;;  %v2463_v48 = vrot.slane %v2461_v39, 5  ;;  %v2473_v55 = vrot.slane %v2471_v45, 5  ;;  %v2479_v28 = vshll.u32 %v5751_v63, 16 }
  0xb0   : > { %4230 = vmatmul.mubr.bf16.vlgmr.msra.gmra.mrb[64].mxu0 %v7472_v18  ;;  %v2038_v50 = vrot.slane %v5624_v36, 5  ;;  %v1526_v59 = vsel %vm7082_vm5, %v1521_v47, %v1525_v34  ;;  %v1533_v15 = vrot.slane %v1531_v2, 5  ;;  %v2495_v39 = vshll.u32 %v5753_v16, 16 }
  0xb1   : > { %6629 = vmatpush3.bf16.msra.mxu0 %v7426_v9  ;;  %4237 = vmatprep.mubr.bf16.mxu0 %v5679_v30  ;;  %v6853_v9 = vld [vmem:[%s8699_s1 + $0x210] sm:$0xff]   ;;  %v2452_v30 = vshrl.u32 %v5748_v6, 16 }
  0xb2   : > { %6630 = vmatprep.subr.bf16.mxu0 %v6849_v11  ;;  %4391 = vmatmul.mubr.bf16.vlgmr.msra.gmra.mrb[64].mxu1 %v6846_v23  ;;  %v1509_v23 = vrot.slane %v1507_v12, 5  ;;  %v2040_v62 = vrot.slane %v2038_v50, 4 }
  0xb3   : > { %6677 = vmatpush3.bf16.msra.mxu1 %v7448_v29  ;;  %v1502_v29 = vsel %vm7082_vm5, %v1497_v57, %v1501_v42  ;;  %v2454_v38 = vrot.slane %v2452_v30, 4  ;;  %v6859_v42 = vld [vmem:[%s8702_s4 + $0x18] sm:$0xff]   ;;  %4398 = vmatprep.mubr.bf16.mxu1 %v5791_v32  ;;  %v5560_v57 = vld [vmem:[%s7059_s11 + $0x34] sm:$0xf]  ;;  %v5628_v30 = vld [vmem:[%s7059_s11 + $0x44] sm:$0x1] }
  0xb4   : > { %6678 = vmatprep.subr.bf16.mxu1 %v6851_v40  ;;  %v7508_v8 = vcombine.low %v1492_v61, %v1502_v29  ;;  %v1528_v29 = vshrl.u32 %v5559_v52, 16  ;;  %v2042_v6 = vsel %vm7073_vm4, %v2040_v62, %v2041_v56  ;;  %v1541_v10 = vshrl.u32 %v5560_v57, 16 }
  0xb5   : > { %6631 = vmatpush3.bf16.msra.mxu0 %v6849_v11  ;;  %v1506_v11 = vrot.slane %v1504_v1, 4  ;;  %v2458_v54 = vor.u32 %v2457_v44, %v2454_v38  ;;  %v2481_v38 = vrot.slane %v2479_v28, 5 }
  0xb6   : > { %6632 = vmatprep.subr.bf16.mxu0 %v6853_v9  ;;  %v1530_v14 = vrot.slane %v1528_v29, 4  ;;  %v1543_v21 = vrot.slane %v1541_v10, 4  ;;  %v6852_v29 = vld [vmem:[%s7059_s11 + $0x3c] sm:$0xff]  }
  0xb7   : > { %6679 = vmatpush3.bf16.msra.mxu1 %v6851_v40  ;;  %v1510_v33 = vor.u32 %v1509_v23, %v1506_v11  ;;  %v2465_v40 = vshrl.u32 %v5749_v13, 16  ;;  %v2459_v1 = vrot.slane %v2458_v54, 4  ;;  %v5752_v11 = vld [vmem:[%s7059_s11 + $0x40] sm:$0xf] }
  0xb8   : > { %4238 = vmatmul.mubr.bf16.gmra.mrb[68].mxu0 %v7508_v8  ;;  %6680 = vmatprep.subr.bf16.mxu1 %v6855_v7  ;;  %v5627_v23 = vld [vmem:[%s7059_s11 + $0x40] sm:$0xf]  ;;  %v2485_v34 = vshll.u32 %v5752_v11, 16  ;;  %v2489_v35 = vshrl.u32 %v5752_v11, 16 }
  0xb9   : > { %6633 = vmatpush3.bf16.msra.mxu0 %v6853_v9  ;;  %4245 = vmatprep.mubr.bf16.mxu0 %v5680_v22  ;;  %v1511_v43 = vrot.slane %v1510_v33, 4  ;;  %v5665_v9 = vrot.slane %v5623_v31, 9  ;;  %v2467_v49 = vrot.slane %v2465_v40, 4  ;;  %v2464_v12 = vsel %vm7082_vm5, %v2459_v1, %v2463_v48  ;;  %v5562_v31 = vld [vmem:[%s7059_s11 + $0x3c] sm:$0xf] }
  0xba   : > { %6634 = vmatprep.subr.bf16.mxu0 %v6857_v20  ;;  %4399 = vmatmul.mubr.bf16.gmra.mrb[68].mxu1 %v6848_v26  ;;  %v1547_v22 = vshll.u32 %v5561_v58, 16  ;;  %v1534_v26 = vor.u32 %v1533_v15, %v1530_v14  ;;  %v2487_v41 = vrot.slane %v2485_v34, 5  ;;  %v2045_v47 = vrot.slane %v5627_v23, 5 }
  0xbb   : > { %6681 = vmatpush3.bf16.msra.mxu1 %v6855_v7  ;;  %v1516_v53 = vsel %vm7082_vm5, %v1511_v43, %v1515_v27  ;;  %v2468_v60 = vor.u32 %v2467_v49, %v2463_v48  ;;  %v2039_v61 = vsel %vm7073_vm4, %v5665_v9, %v2038_v50  ;;  %v1537_v7 = vshll.u32 %v5560_v57, 16  ;;  %v5563_v48 = vld [vmem:[%s7059_s11 + $0x40] sm:$0xf]  ;;  %v5564_v49 = vld [vmem:[%s7059_s11 + $0x44] sm:$0x1] }
  0xbc   : > { %6682 = vmatprep.subr.bf16.mxu1 %v6859_v42  ;;  %v7539_v0 = vcombine.low %v1516_v53, %v1526_v59  ;;  %v5681_v13 = vcombine.low %v2039_v61, %v2042_v6  ;;  %v2476_v27 = vshrl.u32 %v5751_v63, 16  ;;  %v1549_v33 = vrot.slane %v1547_v22, 5  ;;  %v5754_v63 = vld [vmem:[%s7059_s11 + $0x48] sm:$0xf] }
  0xbd   : > { %6635 = vmatpush3.bf16.msra.mxu0 %v6857_v20  ;;  %v2469_v4 = vrot.slane %v2468_v60, 4  ;;  %v1539_v20 = vrot.slane %v1537_v7, 5  ;;  %v1535_v36 = vrot.slane %v1534_v26, 4  ;;  %v5666_v43 = vrot.slane %v5626_v17, 9 }
  0xbe   : > { %6636 = vmatprep.subr.bf16.mxu0 %v6861_v3  ;;  %v2478_v37 = vrot.slane %v2476_v27, 4  ;;  %v2497_v9 = vrot.slane %v2495_v39, 5  ;;  %v2048_v53 = vrot.slane %v5628_v30, 5  ;;  %v1552_v54 = vshrl.u32 %v5562_v31, 16 }
  0xbf   : > { %6683 = vmatpush3.bf16.msra.mxu1 %v6859_v42  ;;  %v2474_v19 = vsel %vm7082_vm5, %v2469_v4, %v2473_v55  ;;  %v1544_v32 = vor.u32 %v1543_v21, %v1539_v20  ;;  %v2491_v42 = vrot.slane %v2489_v35, 4  ;;  %v1540_v44 = vsel %vm7082_vm5, %v1535_v36, %v1539_v20  ;;  %v6865_v20 = vld [vmem:[%s8699_s1 + $0x228] sm:$0xff]  }
  0xc0   : > { %4246 = vmatmul.mubr.bf16.gmra.mrb[72].mxu0 %v7539_v0  ;;  %v5792_v25 = vcombine.low %v2464_v12, %v2474_v19  ;;  %6684 = vmatprep.subr.bf16.mxu1 %v6863_v24  ;;  %v2482_v45 = vor.u32 %v2481_v38, %v2478_v37  ;;  %v2046_v57 = vsel %vm7073_vm4, %v5666_v43, %v2045_v47  ;;  %v2047_v58 = vrot.slane %v2045_v47, 4  ;;  %v5756_v12 = vld [vmem:[%s7059_s11 + $0x50] sm:$0x1]  ;;  %v5630_v19 = vld [vmem:[%s7059_s11 + $0x4c] sm:$0xf] }
  0xc1   : > { %6637 = vmatpush3.bf16.msra.mxu0 %v6861_v3  ;;  %4253 = vmatprep.mubr.bf16.mxu0 %v5681_v13  ;;  %v1545_v40 = vrot.slane %v1544_v32, 4  ;;  %v2492_v52 = vor.u32 %v2491_v42, %v2487_v41  ;;  %v1554_v60 = vrot.slane %v1552_v54, 4  ;;  %v1555_v61 = vshll.u32 %v5562_v31, 16  ;;  %v5629_v13 = vld [vmem:[%s7059_s11 + $0x48] sm:$0xe] }
  0xc2   : > { %4406 = vmatprep.mubr.bf16.mxu1 %v5792_v25  ;;  %v2483_v56 = vrot.slane %v2482_v45, 4  ;;  %v1561_v62 = vshll.u32 %v5563_v48, 16  ;;  %v2049_v2 = vsel %vm7073_vm4, %v2047_v58, %v2048_v53  ;;  %v1565_v3 = vshrl.u32 %v5563_v48, 16  ;;  %v5631_v25 = vld [vmem:[%s7059_s11 + $0x50] sm:$0x1]  ;;  %6638 = vmatprep.subr.bf16.mxu0 %v6865_v20  ;;  %v6867_v32 = vld [vmem:[%s8702_s4 + $0x28] sm:$0xff]  }
  0xc3   : > { %6685 = vmatpush3.bf16.msra.mxu1 %v6863_v24  ;;  %v1550_v50 = vsel %vm7082_vm5, %v1545_v40, %v1549_v33  ;;  %v2493_v59 = vrot.slane %v2492_v52, 4  ;;  %v1571_v4 = vshll.u32 %v5564_v49, 16  ;;  %v5682_v7 = vcombine.low %v2046_v57, %v2049_v2  ;;  %v5565_v31 = vld [vmem:[%s7059_s11 + $0x48] sm:$0xf]  ;;  %v5567_v49 = vld [vmem:[%s7059_s11 + $0x50] sm:$0x1] }
  0xc4   : > { %4407 = vmatmul.mubr.bf16.gmra.mrb[72].mxu1 %v6850_v5  ;;  %v7567_v55 = vcombine.low %v1540_v44, %v1550_v50  ;;  %v2488_v1 = vsel %vm7082_vm5, %v2483_v56, %v2487_v41  ;;  %v5755_v5 = vld [vmem:[%s7059_s11 + $0x4c] sm:$0xf]  ;;  %v1557_v10 = vrot.slane %v1555_v61, 5  ;;  %v1563_v11 = vrot.slane %v1561_v62, 5  ;;  %6686 = vmatprep.subr.bf16.mxu1 %v6867_v32  ;;  %v5757_v52 = vld [vmem:[%s7059_s11 + $0x54] sm:$0xf] }
  0xc5   : > { %v2498_v6 = vsel %vm7082_vm5, %v2493_v59, %v2497_v9  ;;  %v1567_v15 = vrot.slane %v1565_v3, 4  ;;  %v1573_v16 = vrot.slane %v1571_v4, 5  ;;  %v2500_v17 = vshrl.u32 %v5754_v63, 16  ;;  %6639 = vmatpush3.bf16.msra.mxu0 %v6865_v20  ;;  %v5566_v44 = vld [vmem:[%s7059_s11 + $0x4c] sm:$0xf]  ;;  %v6869_v59 = vld [vmem:[%s8699_s1 + $0x230] sm:$0xff]  }
  0xc6   : > { %v5793_v14 = vcombine.low %v2488_v1, %v2498_v6  ;;  %v1558_v21 = vor.u32 %v1557_v10, %v1554_v60  ;;  %v2503_v22 = vshll.u32 %v5754_v63, 16  ;;  %v2509_v23 = vshll.u32 %v5755_v5, 16  ;;  %v5758_v58 = vld [vmem:[%s7059_s11 + $0x58] sm:$0xf]  ;;  %v6854_v60 = vld [vmem:[%s7059_s11 + $0x48] sm:$0xff]   ;;  %6640 = vmatprep.subr.bf16.mxu0 %v6869_v59 }
  0xc7   : > { %v2513_v24 = vshrl.u32 %v5755_v5, 16  ;;  %v1568_v26 = vor.u32 %v1567_v15, %v1563_v11  ;;  %v2502_v27 = vrot.slane %v2500_v17, 4  ;;  %v2519_v28 = vshll.u32 %v5756_v12, 16  ;;  %6687 = vmatpush3.bf16.msra.mxu1 %v6867_v32  ;;  %v5632_v6 = vld [vmem:[%s7059_s11 + $0x54] sm:$0xe] }
  0xc8   : > { %4254 = vmatmul.mubr.bf16.gmra.mrb[76].mxu0 %v7567_v55  ;;  %4414 = vmatprep.mubr.bf16.mxu1 %v5793_v14  ;;  %v5667_v30 = vrot.slane %v5629_v13, 9  ;;  %v1559_v33 = vrot.slane %v1558_v21, 4  ;;  %v2505_v34 = vrot.slane %v2503_v22, 5  ;;  %v2511_v35 = vrot.slane %v2509_v23, 5  ;;  %v5633_v14 = vld [vmem:[%s7059_s11 + $0x58] sm:$0xf] }
  0xc9   : > { %4261 = vmatprep.mubr.bf16.mxu0 %v5682_v7  ;;  %v2515_v36 = vrot.slane %v2513_v24, 4  ;;  %v1569_v37 = vrot.slane %v1568_v26, 4  ;;  %v2521_v38 = vrot.slane %v2519_v28, 5  ;;  %v2052_v39 = vrot.slane %v5630_v19, 5  ;;  %v6871_v7 = vld [vmem:[%s8702_s4 + $0x30] sm:$0xff]   ;;  %6641 = vmatpush3.bf16.msra.mxu0 %v6869_v59 }
  0xca   : > { %v2055_v40 = vrot.slane %v5631_v25, 5  ;;  %v1564_v41 = vsel %vm7082_vm5, %v1559_v33, %v1563_v11  ;;  %v2506_v42 = vor.u32 %v2505_v34, %v2502_v27  ;;  %v1576_v45 = vshrl.u32 %v5565_v31, 16  ;;  %v5634_v15 = vld [vmem:[%s7059_s11 + $0x5c] sm:$0x1]  ;;  %v5568_v21 = vld [vmem:[%s7059_s11 + $0x54] sm:$0xf]  ;;  %6688 = vmatprep.subr.bf16.mxu1 %v6871_v7 }
  0xcb   : > { %v2516_v43 = vor.u32 %v2515_v36, %v2511_v35  ;;  %v1574_v9 = vsel %vm7082_vm5, %v1569_v37, %v1573_v16  ;;  %v2053_v47 = vsel %vm7073_vm4, %v5667_v30, %v2052_v39  ;;  %v2054_v48 = vrot.slane %v2052_v39, 4  ;;  %v5569_v26 = vld [vmem:[%s7059_s11 + $0x58] sm:$0xf]  ;;  %6689 = vmatpush3.bf16.msra.mxu1 %v6871_v7  ;;  %v5761_v59 = vld [vmem:[%s7059_s11 + $0x64] sm:$0xf] }
  0xcc   : > { %4415 = vmatmul.mubr.bf16.gmra.mrb[76].mxu1 %v6852_v29  ;;  %v1579_v50 = vshll.u32 %v5565_v31, 16  ;;  %v7601_v53 = vcombine.low %v1564_v41, %v1574_v9  ;;  %v2507_v54 = vrot.slane %v2506_v42, 4  ;;  %v1578_v57 = vrot.slane %v1576_v45, 4  ;;  %v5759_v29 = vld [vmem:[%s7059_s11 + $0x5c] sm:$0x1] }
  0xcd   : > { %v2517_v56 = vrot.slane %v2516_v43, 4  ;;  %v2056_v61 = vsel %vm7073_vm4, %v2054_v48, %v2055_v40  ;;  %v1585_v63 = vshll.u32 %v5566_v44, 16  ;;  %v1589_v1 = vshrl.u32 %v5566_v44, 16  ;;  %v6873_v36 = vld [vmem:[%s8699_s1 + $0x238] sm:$0xff]   ;;  %v5637_v7 = vld [vmem:[%s7059_s11 + $0x68] sm:$0x1] }
  0xce   : > { %v1581_v62 = vrot.slane %v1579_v50, 5  ;;  %v2512_v2 = vsel %vm7082_vm5, %v2507_v54, %v2511_v35  ;;  %v5683_v4 = vcombine.low %v2053_v47, %v2056_v61  ;;  %v1595_v5 = vshll.u32 %v5567_v49, 16  ;;  %v5570_v43 = vld [vmem:[%s7059_s11 + $0x5c] sm:$0x1]  ;;  %6642 = vmatprep.subr.bf16.mxu0 %v6873_v36  ;;  %v5760_v50 = vld [vmem:[%s7059_s11 + $0x60] sm:$0xf] }
  0xcf   : > { %v2522_v3 = vsel %vm7082_vm5, %v2517_v56, %v2521_v38  ;;  %v1587_v12 = vrot.slane %v1585_v63, 5  ;;  %v1591_v13 = vrot.slane %v1589_v1, 4  ;;  %v2524_v17 = vshrl.u32 %v5757_v52, 16  ;;  %6643 = vmatpush3.bf16.msra.mxu0 %v6873_v36  ;;  %v6856_v54 = vld [vmem:[%s7059_s11 + $0x54] sm:$0xff]   ;;  %v5762_v1 = vld [vmem:[%s7059_s11 + $0x68] sm:$0x1] }
  0xd0   : > { %4262 = vmatmul.mubr.bf16.gmra.mrb[80].mxu0 %v7601_v53  ;;  %v5794_v10 = vcombine.low %v2512_v2, %v2522_v3  ;;  %v1582_v11 = vor.u32 %v1581_v62, %v1578_v57  ;;  %v1597_v16 = vrot.slane %v1595_v5, 5  ;;  %v2527_v19 = vshll.u32 %v5757_v52, 16 }
  0xd1   : > { %4269 = vmatprep.mubr.bf16.mxu0 %v5683_v4  ;;  %v2533_v20 = vshll.u32 %v5758_v58, 16  ;;  %v1592_v23 = vor.u32 %v1591_v13, %v1587_v12  ;;  %v2537_v24 = vshrl.u32 %v5758_v58, 16  ;;  %v2543_v25 = vshll.u32 %v5759_v29, 16  ;;  %v5635_v29 = vld [vmem:[%s7059_s11 + $0x60] sm:$0xe] }
  0xd2   : > { %4422 = vmatprep.mubr.bf16.mxu1 %v5794_v10  ;;  %v1583_v22 = vrot.slane %v1582_v11, 4  ;;  %v2526_v27 = vrot.slane %v2524_v17, 4  ;;  %v2529_v28 = vrot.slane %v2527_v19, 5  ;;  %v5668_v31 = vrot.slane %v5632_v6, 9  ;;  %v5636_v6 = vld [vmem:[%s7059_s11 + $0x64] sm:$0xf] }
  0xd3   : > { %v2535_v30 = vrot.slane %v2533_v20, 5  ;;  %v1593_v33 = vrot.slane %v1592_v23, 4  ;;  %v2539_v34 = vrot.slane %v2537_v24, 4  ;;  %v2545_v35 = vrot.slane %v2543_v25, 5  ;;  %v6875_v10 = vld [vmem:[%s8702_s4 + $0x38] sm:$0xff]  }
  0xd4   : > { %4423 = vmatmul.mubr.bf16.gmra.mrb[80].mxu1 %v6854_v60  ;;  %v1588_v32 = vsel %vm7082_vm5, %v1583_v22, %v1587_v12  ;;  %v2530_v37 = vor.u32 %v2529_v28, %v2526_v27  ;;  %v2059_v38 = vrot.slane %v5633_v14, 5  ;;  %v2062_v39 = vrot.slane %v5634_v15, 5  ;;  %v5571_v15 = vld [vmem:[%s7059_s11 + $0x60] sm:$0xf]  ;;  %6690 = vmatprep.subr.bf16.mxu1 %v6875_v10 }
  0xd5   : > { %v1600_v40 = vshrl.u32 %v5568_v21, 16  ;;  %v1598_v41 = vsel %vm7082_vm5, %v1593_v33, %v1597_v16  ;;  %v2540_v42 = vor.u32 %v2539_v34, %v2535_v30  ;;  %v1603_v44 = vshll.u32 %v5568_v21, 16  ;;  %6691 = vmatpush3.bf16.msra.mxu1 %v6875_v10 }
  0xd6   : > { %v1609_v45 = vshll.u32 %v5569_v26, 16  ;;  %v7632_v9 = vcombine.low %v1588_v32, %v1598_v41  ;;  %v2531_v47 = vrot.slane %v2530_v37, 4  ;;  %v2060_v48 = vsel %vm7073_vm4, %v5668_v31, %v2059_v38 }
  0xd7   : > { %v2061_v49 = vrot.slane %v2059_v38, 4  ;;  %v2541_v52 = vrot.slane %v2540_v42, 4  ;;  %v1602_v56 = vrot.slane %v1600_v40, 4  ;;  %v1605_v57 = vrot.slane %v1603_v44, 5  ;;  %v5573_v38 = vld [vmem:[%s7059_s11 + $0x68] sm:$0x1] }
  0xd8   : > { %v1611_v58 = vrot.slane %v1609_v45, 5  ;;  %4270 = vmatmul.mubr.bf16.gmra.mrb[84].mxu0 %v7632_v9  ;;  %v2536_v60 = vsel %vm7082_vm5, %v2531_v47, %v2535_v30  ;;  %v1613_v62 = vshrl.u32 %v5569_v26, 16  ;;  %v1619_v63 = vshll.u32 %v5570_v43, 16  ;;  %v5572_v30 = vld [vmem:[%s7059_s11 + $0x64] sm:$0xf] }
  0xd9   : > { %v2063_v61 = vsel %vm7073_vm4, %v2061_v49, %v2062_v39  ;;  %v2546_v2 = vsel %vm7082_vm5, %v2541_v52, %v2545_v35  ;;  %v1606_v4 = vor.u32 %v1605_v57, %v1602_v56  ;;  %v2548_v5 = vshrl.u32 %v5760_v50, 16  ;;  %v5763_v40 = vld [vmem:[%s7059_s11 + $0x6c] sm:$0xf]  ;;  %v5764_v45 = vld [vmem:[%s7059_s11 + $0x70] sm:$0xf] }
  0xda   : > { %v5684_v3 = vcombine.low %v2060_v48, %v2063_v61  ;;  %v5795_v11 = vcombine.low %v2536_v60, %v2546_v2  ;;  %v1615_v12 = vrot.slane %v1613_v62, 4  ;;  %v1621_v13 = vrot.slane %v1619_v63, 5  ;;  %v5765_v52 = vld [vmem:[%s7059_s11 + $0x74] sm:$0x1]  ;;  %v6858_v61 = vld [vmem:[%s7059_s11 + $0x60] sm:$0xff]  }
  0xdb   : > { %v2551_v14 = vshll.u32 %v5760_v50, 16  ;;  %v1607_v16 = vrot.slane %v1606_v4, 4  ;;  %v2550_v17 = vrot.slane %v2548_v5, 4  ;;  %v2557_v19 = vshll.u32 %v5761_v59, 16 }
  0xdc   : > { %4277 = vmatprep.mubr.bf16.mxu0 %v5684_v3  ;;  %v2561_v20 = vshrl.u32 %v5761_v59, 16  ;;  %4430 = vmatprep.mubr.bf16.mxu1 %v5795_v11  ;;  %v1616_v21 = vor.u32 %v1615_v12, %v1611_v58  ;;  %v2567_v23 = vshll.u32 %v5762_v1, 16  ;;  %v5669_v24 = vrot.slane %v5635_v29, 9  ;;  %v5638_v59 = vld [vmem:[%s7059_s11 + $0x6c] sm:$0xe] }
  0xdd   : > { %v2553_v22 = vrot.slane %v2551_v14, 5  ;;  %4431 = vmatmul.mubr.bf16.gmra.mrb[84].mxu1 %v6856_v54  ;;  %v1612_v25 = vsel %vm7082_vm5, %v1607_v16, %v1611_v58  ;;  %v2559_v26 = vrot.slane %v2557_v19, 5  ;;  %v2066_v28 = vrot.slane %v5636_v6, 5  ;;  %v5639_v29 = vld [vmem:[%s7059_s11 + $0x70] sm:$0xf] }
  0xde   : > { %v2563_v27 = vrot.slane %v2561_v20, 4  ;;  %v1617_v31 = vrot.slane %v1616_v21, 4  ;;  %v2569_v33 = vrot.slane %v2567_v23, 5  ;;  %v2069_v34 = vrot.slane %v5637_v7, 5  ;;  %v5640_v6 = vld [vmem:[%s7059_s11 + $0x74] sm:$0x1] }
  0xdf   : > { %v2554_v32 = vor.u32 %v2553_v22, %v2550_v17  ;;  %v2067_v36 = vsel %vm7073_vm4, %v5669_v24, %v2066_v28  ;;  %v2068_v37 = vrot.slane %v2066_v28, 4  ;;  %v1624_v39 = vshrl.u32 %v5571_v15, 16  ;;  %v5575_v14 = vld [vmem:[%s7059_s11 + $0x70] sm:$0xf] }
  0xe0   : > { %v2564_v35 = vor.u32 %v2563_v27, %v2559_v26  ;;  %v1622_v41 = vsel %vm7082_vm5, %v1617_v31, %v1621_v13  ;;  %v1627_v43 = vshll.u32 %v5571_v15, 16  ;;  %v1633_v44 = vshll.u32 %v5572_v30, 16  ;;  %v5574_v13 = vld [vmem:[%s7059_s11 + $0x6c] sm:$0xf] }
  0xe1   : > { %v2555_v42 = vrot.slane %v2554_v32, 4  ;;  %v7664_v47 = vcombine.low %v1612_v25, %v1622_v41  ;;  %v2070_v49 = vsel %vm7073_vm4, %v2068_v37, %v2069_v34  ;;  %v1626_v50 = vrot.slane %v1624_v39, 4 }
  0xe2   : > { %v2565_v48 = vrot.slane %v2564_v35, 4  ;;  %v5685_v56 = vcombine.low %v2067_v36, %v2070_v49  ;;  %v1629_v57 = vrot.slane %v1627_v43, 5  ;;  %v1635_v58 = vrot.slane %v1633_v44, 5  ;;  %v5767_v49 = vld [vmem:[%s7059_s11 + $0x7c] sm:$0xf] }
  0xe3   : > { %8719 = vst [vmem:[#allocation3_spill] sm:$0xff] %v7664_v47  ;;  %v2560_v54 = vsel %vm7082_vm5, %v2555_v42, %v2559_v26  ;;  %4278 = vmatmul.mubr.bf16.gmra.mrb[88].mxu0 %v7664_v47  ;;  %v1637_v62 = vshrl.u32 %v5572_v30, 16  ;;  %v1643_v63 = vshll.u32 %v5573_v38, 16  ;;  %v2572_v1 = vshrl.u32 %v5763_v40, 16  ;;  %v5766_v42 = vld [vmem:[%s7059_s11 + $0x78] sm:$0xf] }
  0xe4   : > { %v2570_v60 = vsel %vm7082_vm5, %v2565_v48, %v2569_v33  ;;  %4285 = vmatprep.mubr.bf16.mxu0 %v5685_v56  ;;  %v1630_v3 = vor.u32 %v1629_v57, %v1626_v50  ;;  %v2575_v4 = vshll.u32 %v5763_v40, 16  ;;  %v2581_v5 = vshll.u32 %v5764_v45, 16  ;;  %v5576_v40 = vld [vmem:[%s7059_s11 + $0x74] sm:$0x1]  ;;  %v5768_v50 = vld [vmem:[%s7059_s11 + $0x80] sm:$0x1] }
  0xe5   : > { %v5796_v2 = vcombine.low %v2560_v54, %v2570_v60  ;;  %v1639_v7 = vrot.slane %v1637_v62, 4  ;;  %v1645_v10 = vrot.slane %v1643_v63, 5  ;;  %v2574_v11 = vrot.slane %v2572_v1, 4  ;;  %v6860_v54 = vld [vmem:[%s7059_s11 + $0x6c] sm:$0xff]  }
  0xe6   : > { %v2585_v12 = vshrl.u32 %v5764_v45, 16  ;;  %v1631_v15 = vrot.slane %v1630_v3, 4  ;;  %v2577_v16 = vrot.slane %v2575_v4, 5  ;;  %v2583_v17 = vrot.slane %v2581_v5, 5  ;;  %v5641_v3 = vld [vmem:[%s7059_s11 + $0x78] sm:$0xe] }
  0xe7   : > { %4438 = vmatprep.mubr.bf16.mxu1 %v5796_v2  ;;  %v2591_v19 = vshll.u32 %v5765_v52, 16  ;;  %v1640_v20 = vor.u32 %v1639_v7, %v1635_v58  ;;  %v5670_v22 = vrot.slane %v5638_v59, 9  ;;  %v2073_v23 = vrot.slane %v5639_v29, 5  ;;  %v5642_v4 = vld [vmem:[%s7059_s11 + $0x7c] sm:$0xf] }
  0xe8   : > { %4439 = vmatmul.mubr.bf16.gmra.mrb[88].mxu1 %v6858_v61  ;;  %v2587_v21 = vrot.slane %v2585_v12, 4  ;;  %v1636_v24 = vsel %vm7082_vm5, %v1631_v15, %v1635_v58  ;;  %v2578_v25 = vor.u32 %v2577_v16, %v2574_v11  ;;  %v2076_v27 = vrot.slane %v5640_v6, 5  ;;  %v5643_v11 = vld [vmem:[%s7059_s11 + $0x80] sm:$0x1]  ;;  %v5577_v16 = vld [vmem:[%s7059_s11 + $0x78] sm:$0xf] }
  0xe9   : > { %v2593_v26 = vrot.slane %v2591_v19, 5  ;;  %v1641_v28 = vrot.slane %v1640_v20, 4  ;;  %v2074_v31 = vsel %vm7073_vm4, %v5670_v22, %v2073_v23  ;;  %v2075_v32 = vrot.slane %v2073_v23, 4  ;;  %v5578_v22 = vld [vmem:[%s7059_s11 + $0x7c] sm:$0xf] }
  0xea   : > { %v2588_v30 = vor.u32 %v2587_v21, %v2583_v17  ;;  %v2579_v33 = vrot.slane %v2578_v25, 4  ;;  %v1648_v34 = vshrl.u32 %v5574_v13, 16  ;;  %v1651_v35 = vshll.u32 %v5574_v13, 16 }
  0xeb   : > { %v1657_v36 = vshll.u32 %v5575_v14, 16  ;;  %v1646_v37 = vsel %vm7082_vm5, %v1641_v28, %v1645_v10  ;;  %v2077_v39 = vsel %vm7073_vm4, %v2075_v32, %v2076_v27  ;;  %v1661_v41 = vshrl.u32 %v5575_v14, 16  ;;  %v5579_v27 = vld [vmem:[%s7059_s11 + $0x80] sm:$0x1] }
  0xec   : > { %v2589_v38 = vrot.slane %v2588_v30, 4  ;;  %v7690_v43 = vcombine.low %v1636_v24, %v1646_v37  ;;  %v2584_v44 = vsel %vm7082_vm5, %v2579_v33, %v2583_v17  ;;  %v5686_v45 = vcombine.low %v2074_v31, %v2077_v39  ;;  %v5769_v33 = vld [vmem:[%s7059_s11 + $0x84] sm:$0xf] }
  0xed   : > { %v1650_v48 = vrot.slane %v1648_v34, 4  ;;  %v1653_v56 = vrot.slane %v1651_v35, 5  ;;  %v1659_v57 = vrot.slane %v1657_v36, 5  ;;  %v1663_v58 = vrot.slane %v1661_v41, 4  ;;  %v5770_v34 = vld [vmem:[%s7059_s11 + $0x88] sm:$0xf] }
  0xee   : > { %8720 = vst [vmem:[#allocation4_spill] sm:$0xff] %v7690_v43  ;;  %v2594_v52 = vsel %vm7082_vm5, %v2589_v38, %v2593_v26  ;;  %4286 = vmatmul.mubr.bf16.gmra.mrb[92].mxu0 %v7690_v43  ;;  %v1667_v60 = vshll.u32 %v5576_v40, 16  ;;  %v2596_v61 = vshrl.u32 %v5766_v42, 16  ;;  %v2599_v62 = vshll.u32 %v5766_v42, 16  ;;  %v6862_v36 = vld [vmem:[%s7059_s11 + $0x78] sm:$0xff]  }
  0xef   : > { %v5797_v59 = vcombine.low %v2584_v44, %v2594_v52  ;;  %4293 = vmatprep.mubr.bf16.mxu0 %v5686_v45  ;;  %v1654_v63 = vor.u32 %v1653_v56, %v1650_v48  ;;  %v1664_v1 = vor.u32 %v1663_v58, %v1659_v57  ;;  %v2605_v29 = vshll.u32 %v5767_v49, 16  ;;  %v5771_v40 = vld [vmem:[%s7059_s11 + $0x8c] sm:$0x1]  ;;  %v5644_v48 = vld [vmem:[%s7059_s11 + $0x84] sm:$0xe] }
  0xf0   : > { %v2609_v2 = vshrl.u32 %v5767_v49, 16  ;;  %v1669_v5 = vrot.slane %v1667_v60, 5  ;;  %v2598_v6 = vrot.slane %v2596_v61, 4  ;;  %v2601_v7 = vrot.slane %v2599_v62, 5  ;;  %v5645_v56 = vld [vmem:[%s7059_s11 + $0x88] sm:$0xf] }
  0xf1   : > { %4446 = vmatprep.mubr.bf16.mxu1 %v5797_v59  ;;  %v2615_v10 = vshll.u32 %v5768_v50, 16  ;;  %v1655_v12 = vrot.slane %v1654_v63, 4  ;;  %v1665_v13 = vrot.slane %v1664_v1, 4  ;;  %v2607_v14 = vrot.slane %v2605_v29, 5  ;;  %v5646_v63 = vld [vmem:[%s7059_s11 + $0x8c] sm:$0x1] }
  0xf2   : > { %4447 = vmatmul.mubr.bf16.gmra.mrb[92].mxu1 %v6860_v54  ;;  %v2611_v15 = vrot.slane %v2609_v2, 4  ;;  %v2602_v17 = vor.u32 %v2601_v7, %v2598_v6  ;;  %v5671_v20 = vrot.slane %v5641_v3, 9  ;;  %v2080_v21 = vrot.slane %v5642_v4, 5  ;;  %v5580_v1 = vld [vmem:[%s7059_s11 + $0x84] sm:$0xf] }
  0xf3   : > { %v2617_v19 = vrot.slane %v2615_v10, 5  ;;  %v1660_v23 = vsel %vm7082_vm5, %v1655_v12, %v1659_v57  ;;  %v1670_v24 = vsel %vm7082_vm5, %v1665_v13, %v1669_v5  ;;  %v2083_v26 = vrot.slane %v5643_v11, 5 }
  0xf4   : > { %v2612_v25 = vor.u32 %v2611_v15, %v2607_v14  ;;  %v7710_v28 = vcombine.low %v1660_v23, %v1670_v24  ;;  %v2603_v30 = vrot.slane %v2602_v17, 4  ;;  %v2081_v31 = vsel %vm7073_vm4, %v5671_v20, %v2080_v21 }
  0xf5   : > { %v2082_v32 = vrot.slane %v2080_v21, 4  ;;  %v1672_v37 = vshrl.u32 %v5577_v16, 16  ;;  %v1675_v38 = vshll.u32 %v5577_v16, 16  ;;  %v1681_v39 = vshll.u32 %v5578_v22, 16 }
  0xf6   : > { %8721 = vst [vmem:[#allocation5_spill] sm:$0xff] %v7710_v28  ;;  %v2613_v35 = vrot.slane %v2612_v25, 4  ;;  %4294 = vmatmul.mubr.bf16.gmra.mrb[96].mxu0 %v7710_v28  ;;  %v2608_v41 = vsel %vm7082_vm5, %v2603_v30, %v2607_v14  ;;  %v1685_v44 = vshrl.u32 %v5578_v22, 16  ;;  %v1691_v45 = vshll.u32 %v5579_v27, 16 }
  0xf7   : > { %v2084_v42 = vsel %vm7073_vm4, %v2082_v32, %v2083_v26  ;;  %v1674_v52 = vrot.slane %v1672_v37, 4  ;;  %v1677_v54 = vrot.slane %v1675_v38, 5  ;;  %v1683_v60 = vrot.slane %v1681_v39, 5  ;;  %v5582_v37 = vld [vmem:[%s7059_s11 + $0x8c] sm:$0x1] }
  0xf8   : > { %v2618_v49 = vsel %vm7082_vm5, %v2613_v35, %v2617_v19  ;;  %v5687_v50 = vcombine.low %v2081_v31, %v2084_v42  ;;  %v1687_v61 = vrot.slane %v1685_v44, 4  ;;  %v1693_v62 = vrot.slane %v1691_v45, 5  ;;  %v5581_v31 = vld [vmem:[%s7059_s11 + $0x88] sm:$0xf]  ;;  %v5772_v44 = vld [vmem:[%s7059_s11 + $0x90] sm:$0xf] }
  0xf9   : > { %v5798_v59 = vcombine.low %v2608_v41, %v2618_v49  ;;  %v1678_v3 = vor.u32 %v1677_v54, %v1674_v52  ;;  %v2620_v4 = vshrl.u32 %v5769_v33, 16  ;;  %v2623_v5 = vshll.u32 %v5769_v33, 16  ;;  %v6864_v49 = vld [vmem:[%s7059_s11 + $0x84] sm:$0xff]  }
  0xfa   : > { %4301 = vmatprep.mubr.bf16.mxu0 %v5687_v50  ;;  %v2629_v6 = vshll.u32 %v5770_v34, 16  ;;  %v1688_v10 = vor.u32 %v1687_v61, %v1683_v60  ;;  %v2633_v11 = vshrl.u32 %v5770_v34, 16  ;;  %v2639_v12 = vshll.u32 %v5771_v40, 16 }
  0xfb   : > { %4454 = vmatprep.mubr.bf16.mxu1 %v5798_v59  ;;  %v5672_v13 = vrot.slane %v5644_v48, 9  ;;  %v1679_v15 = vrot.slane %v1678_v3, 4  ;;  %v2622_v16 = vrot.slane %v2620_v4, 4  ;;  %v2625_v17 = vrot.slane %v2623_v5, 5 }
  0xfc   : > { %4455 = vmatmul.mubr.bf16.gmra.mrb[96].mxu1 %v6862_v36  ;;  %v2631_v19 = vrot.slane %v2629_v6, 5  ;;  %v1689_v22 = vrot.slane %v1688_v10, 4  ;;  %v2635_v23 = vrot.slane %v2633_v11, 4  ;;  %v2641_v24 = vrot.slane %v2639_v12, 5 }
  0xfd   : > { %v2087_v25 = vrot.slane %v5645_v56, 5  ;;  %v1684_v26 = vsel %vm7082_vm5, %v1679_v15, %v1683_v60  ;;  %v2626_v27 = vor.u32 %v2625_v17, %v2622_v16  ;;  %v2090_v30 = vrot.slane %v5646_v63, 5  ;;  %v5773_v63 = vld [vmem:[%s7059_s11 + $0x94] sm:$0xf] }
  0xfe   : > { %v1696_v32 = vshrl.u32 %v5580_v1, 16  ;;  %v1694_v33 = vsel %vm7082_vm5, %v1689_v22, %v1693_v62  ;;  %v2636_v34 = vor.u32 %v2635_v23, %v2631_v19  ;;  %v1699_v42 = vshll.u32 %v5580_v1, 16  ;;  %v5774_v1 = vld [vmem:[%s7059_s11 + $0x98] sm:$0x1] }
  0xff   : > { %v2088_v35 = vsel %vm7073_vm4, %v5672_v13, %v2087_v25  ;;  %v2089_v36 = vrot.slane %v2087_v25, 4  ;;  %v7755_v39 = vcombine.low %v1684_v26, %v1694_v33  ;;  %v2627_v40 = vrot.slane %v2626_v27, 4  ;;  %v5647_v33 = vld [vmem:[%s7059_s11 + $0x90] sm:$0xe] }
 0x100   : > { %v1698_v41 = vrot.slane %v1696_v32, 4  ;;  %v2637_v48 = vrot.slane %v2636_v34, 4  ;;  %v1705_v52 = vshll.u32 %v5581_v31, 16  ;;  %v1709_v54 = vshrl.u32 %v5581_v31, 16 }
 0x101   : > { %8722 = vst [vmem:[#allocation6_spill] sm:$0xff] %v7755_v39  ;;  %v2091_v50 = vsel %vm7073_vm4, %v2089_v36, %v2090_v30  ;;  %4302 = vmatmul.mubr.bf16.gmra.mrb[100].mxu0 %v7755_v39  ;;  %v2632_v59 = vsel %vm7082_vm5, %v2627_v40, %v2631_v19  ;;  %v1701_v61 = vrot.slane %v1699_v42, 5  ;;  %v1715_v62 = vshll.u32 %v5582_v37, 16  ;;  %v5648_v40 = vld [vmem:[%s7059_s11 + $0x94] sm:$0xf] }
 0x102   : > { %v5688_v60 = vcombine.low %v2088_v35, %v2091_v50  ;;  %v2642_v3 = vsel %vm7082_vm5, %v2637_v48, %v2641_v24  ;;  %v1707_v4 = vrot.slane %v1705_v52, 5  ;;  %v1711_v5 = vrot.slane %v1709_v54, 4 }
 0x103   : > { %v7727_v57 = vpop.f32.mrb[0].mxu0  ;;  %v2644_v6 = vshrl.u32 %v5772_v44, 16  ;;  %v5799_v11 = vcombine.low %v2632_v59, %v2642_v3  ;;  %v1702_v12 = vor.u32 %v1701_v61, %v1698_v41  ;;  %v1717_v13 = vrot.slane %v1715_v62, 5  ;;  %v5584_v59 = vld [vmem:[%s7059_s11 + $0x94] sm:$0xf] }
 0x104   : > { %v7729_v58 = vpop.f32.mrb[0].mxu1  ;;  %v7733_v29 = vpop.f32.mrb[1].mxu0  ;;  %4309 = vmatprep.mubr.bf16.mxu0 %v5688_v60  ;;  %v2647_v15 = vshll.u32 %v5772_v44, 16  ;;  %v1712_v19 = vor.u32 %v1711_v5, %v1707_v4  ;;  %v2653_v23 = vshll.u32 %v5773_v63, 16  ;;  %v2657_v24 = vshrl.u32 %v5773_v63, 16  ;;  %v6866_v3 = vld [vmem:[%s7059_s11 + $0x90] sm:$0xff]  }
 0x105   : > { %v7735_v2 = vpop.f32.mrb[1].mxu1  ;;  %v7737_v7 = vpop.f32.mrb[2].mxu0  ;;  %v2646_v22 = vrot.slane %v2644_v6, 4  ;;  %4462 = vmatprep.mubr.bf16.mxu1 %v5799_v11  ;;  %v1703_v27 = vrot.slane %v1702_v12, 4  ;;  %v2663_v31 = vshll.u32 %v5774_v1, 16  ;;  %v6150_v32 = vadd.f32 %v7733_v29, %v7727_v57 }
 0x106   : > { %v7739_v14 = vpop.f32.mrb[2].mxu1  ;;  %v7741_v20 = vpop.f32.mrb[3].mxu0  ;;  %v2649_v30 = vrot.slane %v2647_v15, 5  ;;  %4463 = vmatmul.mubr.bf16.gmra.mrb[100].mxu1 %v6864_v49  ;;  %v1713_v34 = vrot.slane %v1712_v19, 4  ;;  %v2655_v35 = vrot.slane %v2653_v23, 5  ;;  %v2659_v36 = vrot.slane %v2657_v24, 4 }
 0x107   : > { %v7743_v21 = vpop.f32.mrb[3].mxu1  ;;  %v6262_v37 = vadd.f32 %v7735_v2, %v7729_v58  ;;  %v1708_v42 = vsel %vm7082_vm5, %v1703_v27, %v1707_v4  ;;  %v2665_v48 = vrot.slane %v2663_v31, 5  ;;  %v6153_v57 = vadd.f32 %v7741_v20, %v7737_v7  ;;  %v5649_v29 = vld [vmem:[%s7059_s11 + $0x98] sm:$0x1]  ;;  %v5583_v49 = vld [vmem:[%s7059_s11 + $0x90] sm:$0xf] }
 0x108   : > { %v2650_v44 = vor.u32 %v2649_v30, %v2646_v22  ;;  %v1718_v52 = vsel %vm7082_vm5, %v1713_v34, %v1717_v13  ;;  %v2660_v58 = vor.u32 %v2659_v36, %v2655_v35  ;;  %v6265_v54 = vadd.f32 %v7743_v21, %v7739_v14  ;;  %v5585_v60 = vld [vmem:[%s7059_s11 + $0x98] sm:$0x1]  ;;  %v5775_v11 = vld [vmem:[%s7059_s11 + $0x9c] sm:$0xf]  ;;  %v5776_v19 = vld [vmem:[%s7059_s11 + $0xa0] sm:$0xf] }
 0x109   : > { %v7800_v2 = vadd.f32 %v6262_v37, %v6150_v32  ;;  %v7806_v61 = vcombine.low %v1708_v42, %v1718_v52  ;;  %v5673_v20 = vrot.slane %v5647_v33, 9  ;;  %v2094_v62 = vrot.slane %v5648_v40, 5  ;;  %v5777_v22 = vld [vmem:[%s7059_s11 + $0xa4] sm:$0x1] }
 0x10a   : > { %v2651_v7 = vrot.slane %v2650_v44, 4  ;;  %v2661_v1 = vrot.slane %v2660_v58, 4  ;;  %v7811_v4 = vadd.f32 %v6265_v54, %v6153_v57  ;;  %v2097_v5 = vrot.slane %v5649_v29, 5 }
 0x10b   : > { %v7758_v45 = vpop.f32.mrb[4].mxu0  ;;  %8723 = vst [vmem:[#allocation7_spill] sm:$0xff] %v7800_v2  ;;  %8724 = vst [vmem:[#allocation8_spill] sm:$0xff] %v7806_v61  ;;  %v1720_v6 = vshrl.u32 %v5583_v49, 16  ;;  %4310 = vmatmul.mubr.bf16.gmra.mrb[104].mxu0 %v7806_v61  ;;  %v2095_v21 = vsel %vm7073_vm4, %v5673_v20, %v2094_v62  ;;  %v2096_v13 = vrot.slane %v2094_v62, 4  ;;  %v1723_v15 = vshll.u32 %v5583_v49, 16 }
 0x10c   : > { %v7753_v38 = vpop.f32.mrb[4].mxu1  ;;  %v7763_v56 = vpop.f32.mrb[5].mxu0  ;;  %8725 = vst [vmem:[#allocation9_spill] sm:$0xff] %v7811_v4  ;;  %v2656_v14 = vsel %vm7082_vm5, %v2651_v7, %v2655_v35  ;;  %v2666_v23 = vsel %vm7082_vm5, %v2661_v1, %v2665_v48  ;;  %v1729_v27 = vshll.u32 %v5584_v59, 16  ;;  %v1733_v30 = vshrl.u32 %v5584_v59, 16 }
 0x10d   : > { %v7772_v10 = vpop.f32.mrb[5].mxu1  ;;  %v7774_v16 = vpop.f32.mrb[6].mxu0  ;;  %v1722_v24 = vrot.slane %v1720_v6, 4  ;;  %v5800_v32 = vcombine.low %v2656_v14, %v2666_v23  ;;  %v2098_v33 = vsel %vm7073_vm4, %v2096_v13, %v2097_v5  ;;  %v1725_v34 = vrot.slane %v1723_v15, 5 }
 0x10e   : > { %v7776_v17 = vpop.f32.mrb[6].mxu1  ;;  %v7778_v25 = vpop.f32.mrb[7].mxu0  ;;  %v1739_v35 = vshll.u32 %v5585_v60, 16  ;;  %v5689_v36 = vcombine.low %v2095_v21, %v2098_v33  ;;  %v1731_v37 = vrot.slane %v1729_v27, 5  ;;  %v1735_v40 = vrot.slane %v1733_v30, 4 }
 0x10f   : > { %v7780_v26 = vpop.f32.mrb[7].mxu1  ;;  %v2668_v42 = vshrl.u32 %v5775_v11, 16  ;;  %4470 = vmatprep.mubr.bf16.mxu1 %v5800_v32  ;;  %v1726_v57 = vor.u32 %v1725_v34, %v1722_v24  ;;  %v2671_v29 = vshll.u32 %v5775_v11, 16  ;;  %v2677_v49 = vshll.u32 %v5776_v19, 16  ;;  %v5650_v11 = vld [vmem:[%s7059_s11 + $0x9c] sm:$0xe] }
 0x110   : > { %v1741_v48 = vrot.slane %v1739_v35, 5  ;;  %4471 = vmatmul.mubr.bf16.gmra.mrb[104].mxu1 %v6866_v3  ;;  %4317 = vmatprep.mubr.bf16.mxu0 %v5689_v36  ;;  %v1736_v54 = vor.u32 %v1735_v40, %v1731_v37  ;;  %v2681_v60 = vshrl.u32 %v5776_v19, 16  ;;  %v2687_v7 = vshll.u32 %v5777_v22, 16  ;;  %v5651_v19 = vld [vmem:[%s7059_s11 + $0xa0] sm:$0xf] }
 0x111   : > { %v2670_v59 = vrot.slane %v2668_v42, 4  ;;  %v1727_v62 = vrot.slane %v1726_v57, 4  ;;  %v2673_v1 = vrot.slane %v2671_v29, 5  ;;  %v2679_v5 = vrot.slane %v2677_v49, 5  ;;  %v5652_v27 = vld [vmem:[%s7059_s11 + $0xa4] sm:$0x1] }
 0x112   : > { %v6156_v6 = vadd.f32 %v7763_v56, %v7758_v45  ;;  %v1737_v3 = vrot.slane %v1736_v54, 4  ;;  %v2683_v21 = vrot.slane %v2681_v60, 4  ;;  %v2689_v13 = vrot.slane %v2687_v7, 5  ;;  %v5586_v30 = vld [vmem:[%s7059_s11 + $0x9c] sm:$0xf] }
 0x113   : > { %v7796_v50 = vpop.f32.mrb[8].mxu0  ;;  %v6268_v15 = vadd.f32 %v7772_v10, %v7753_v38  ;;  %v1732_v23 = vsel %vm7082_vm5, %v1727_v62, %v1731_v37  ;;  %v2674_v24 = vor.u32 %v2673_v1, %v2670_v59  ;;  %v6159_v45 = vadd.f32 %v7778_v25, %v7774_v16  ;;  %v5587_v34 = vld [vmem:[%s7059_s11 + $0xa0] sm:$0xf]  ;;  %v5588_v35 = vld [vmem:[%s7059_s11 + $0xa4] sm:$0x1] }
 0x114   : > { %v7788_v41 = vpop.f32.mrb[8].mxu1  ;;  %v7808_v63 = vpop.f32.mrb[9].mxu0  ;;  %v6271_v56 = vadd.f32 %v7780_v26, %v7776_v17  ;;  %v1742_v32 = vsel %vm7082_vm5, %v1737_v3, %v1741_v48  ;;  %v2684_v38 = vor.u32 %v2683_v21, %v2679_v5  ;;  %v5674_v33 = vrot.slane %v5650_v11, 9  ;;  %v5778_v26 = vld [vmem:[%s7059_s11 + $0xa8] sm:$0xf] }
 0x115   : > { %v7814_v12 = vpop.f32.mrb[9].mxu1  ;;  %v7825_v31 = vpop.f32.mrb[10].mxu0  ;;  %v7857_v10 = vadd.f32 %v6268_v15, %v6156_v6  ;;  %v7863_v37 = vcombine.low %v1732_v23, %v1742_v32  ;;  %v2675_v16 = vrot.slane %v2674_v24, 4  ;;  %v2101_v17 = vrot.slane %v5651_v19, 5  ;;  %v5779_v60 = vld [vmem:[%s7059_s11 + $0xac] sm:$0xf] }
 0x116   : > { %v7829_v44 = vpop.f32.mrb[10].mxu1  ;;  %v7831_v52 = vpop.f32.mrb[11].mxu0  ;;  %v7865_v25 = vadd.f32 %v6271_v56, %v6159_v45  ;;  %v2685_v40 = vrot.slane %v2684_v38, 4  ;;  %v2104_v42 = vrot.slane %v5652_v27, 5  ;;  %v1744_v57 = vshrl.u32 %v5586_v30, 16  ;;  %v6868_v6 = vld [vmem:[%s7059_s11 + $0x9c] sm:$0xff]  }
 0x117   : > { %v7833_v58 = vpop.f32.mrb[11].mxu1  ;;  %8726 = vst [vmem:[#allocation10_spill] sm:$0xff] %v7857_v10  ;;  %8727 = vst [vmem:[#allocation11_spill] sm:$0xff] %v7863_v37  ;;  %v1747_v48 = vshll.u32 %v5586_v30, 16  ;;  %4318 = vmatmul.mubr.bf16.gmra.mrb[108].mxu0 %v7863_v37  ;;  %v2680_v29 = vsel %vm7082_vm5, %v2675_v16, %v2679_v5  ;;  %v2102_v49 = vsel %vm7073_vm4, %v5674_v33, %v2101_v17  ;;  %v2103_v54 = vrot.slane %v2101_v17, 4 }
 0x118   : > { %8728 = vst [vmem:[#allocation12_spill] sm:$0xff] %v7865_v25  ;;  %v1753_v59 = vshll.u32 %v5587_v34, 16  ;;  %v2690_v1 = vsel %vm7082_vm5, %v2685_v40, %v2689_v13  ;;  %v1746_v11 = vrot.slane %v1744_v57, 4  ;;  %v1757_v21 = vshrl.u32 %v5587_v34, 16  ;;  %v5780_v56 = vld [vmem:[%s7059_s11 + $0xb0] sm:$0x1] }
 0x119   : > { %v1749_v3 = vrot.slane %v1747_v48, 5  ;;  %v5801_v19 = vcombine.low %v2680_v29, %v2690_v1  ;;  %v2105_v23 = vsel %vm7073_vm4, %v2103_v54, %v2104_v42  ;;  %v1763_v45 = vshll.u32 %v5588_v35, 16  ;;  %v5653_v17 = vld [vmem:[%s7059_s11 + $0xa8] sm:$0xe]  ;;  %v5654_v40 = vld [vmem:[%s7059_s11 + $0xac] sm:$0xf] }
 0x11a   : > { %v1755_v24 = vrot.slane %v1753_v59, 5  ;;  %v5690_v27 = vcombine.low %v2102_v49, %v2105_v23  ;;  %v1759_v13 = vrot.slane %v1757_v21, 4  ;;  %v2692_v32 = vshrl.u32 %v5778_v26, 16  ;;  %v5655_v21 = vld [vmem:[%s7059_s11 + $0xb0] sm:$0x1] }
 0x11b   : > { %v7835_v20 = vpop.f32.mrb[12].mxu0  ;;  %v1750_v30 = vor.u32 %v1749_v3, %v1746_v11  ;;  %4478 = vmatprep.mubr.bf16.mxu1 %v5801_v19  ;;  %v1765_v38 = vrot.slane %v1763_v45, 5  ;;  %v2695_v33 = vshll.u32 %v5778_v26, 16  ;;  %v2701_v34 = vshll.u32 %v5779_v60, 16  ;;  %v5589_v19 = vld [vmem:[%s7059_s11 + $0xa8] sm:$0xf] }
 0x11c   : > { %v7840_v14 = vpop.f32.mrb[12].mxu1  ;;  %v7845_v22 = vpop.f32.mrb[13].mxu0  ;;  %v2705_v16 = vshrl.u32 %v5779_v60, 16  ;;  %4479 = vmatmul.mubr.bf16.gmra.mrb[108].mxu1 %v6868_v6  ;;  %4325 = vmatprep.mubr.bf16.mxu0 %v5690_v27  ;;  %v1760_v42 = vor.u32 %v1759_v13, %v1755_v24  ;;  %v2694_v48 = vrot.slane %v2692_v32, 4  ;;  %v2711_v35 = vshll.u32 %v5780_v56, 16 }
 0x11d   : > { %v7861_v36 = vpop.f32.mrb[13].mxu1  ;;  %v7874_v7 = vpop.f32.mrb[14].mxu0  ;;  %v1751_v57 = vrot.slane %v1750_v30, 4  ;;  %v2697_v49 = vrot.slane %v2695_v33, 5  ;;  %v2703_v54 = vrot.slane %v2701_v34, 5  ;;  %v6162_v26 = vadd.f32 %v7808_v63, %v7796_v50 }
 0x11e   : > { %v7876_v62 = vpop.f32.mrb[14].mxu1  ;;  %v7881_v15 = vpop.f32.mrb[15].mxu0  ;;  %v2707_v59 = vrot.slane %v2705_v16, 4  ;;  %v1761_v6 = vrot.slane %v1760_v42, 4  ;;  %v2713_v11 = vrot.slane %v2711_v35, 5  ;;  %v6274_v3 = vadd.f32 %v7814_v12, %v7788_v41 }
 0x11f   : > { %v7883_v5 = vpop.f32.mrb[15].mxu1  ;;  %v1756_v1 = vsel %vm7082_vm5, %v1751_v57, %v1755_v24  ;;  %v2698_v23 = vor.u32 %v2697_v49, %v2694_v48  ;;  %v6165_v56 = vadd.f32 %v7831_v52, %v7825_v31  ;;  %v6277_v50 = vadd.f32 %v7833_v58, %v7829_v44  ;;  %v5590_v63 = vld [vmem:[%s7059_s11 + $0xac] sm:$0xf]  ;;  %v5591_v41 = vld [vmem:[%s7059_s11 + $0xb0] sm:$0x1] }
 0x120   : > { %v2708_v45 = vor.u32 %v2707_v59, %v2703_v54  ;;  %v1766_v24 = vsel %vm7082_vm5, %v1761_v6, %v1765_v38  ;;  %v7909_v27 = vadd.f32 %v6274_v3, %v6162_v26  ;;  %v5675_v30 = vrot.slane %v5653_v17, 9  ;;  %v6870_v38 = vld [vmem:[%s7059_s11 + $0xa8] sm:$0xff]   ;;  %v5782_v6 = vld [vmem:[%s7059_s11 + $0xb8] sm:$0xf]  ;;  %v5659_v10 = vld [vmem:[%s7059_s11 + $0xc0] sm:$0xe] }
 0x121   : > { %v2108_v13 = vrot.slane %v5654_v40, 5  ;;  %v7916_v33 = vcombine.low %v1756_v1, %v1766_v24  ;;  %v2699_v31 = vrot.slane %v2698_v23, 4  ;;  %v7918_v34 = vadd.f32 %v6277_v50, %v6165_v56  ;;  %v5781_v1 = vld [vmem:[%s7059_s11 + $0xb4] sm:$0xf]  ;;  %v5783_v56 = vld [vmem:[%s7059_s11 + $0xbc] sm:$0x1] }
 0x122   : > { %8729 = vst [vmem:[#allocation13_spill] sm:$0xff] %v7909_v27  ;;  %v2709_v52 = vrot.slane %v2708_v45, 4  ;;  %v2111_v40 = vrot.slane %v5655_v21, 5  ;;  %v1768_v57 = vshrl.u32 %v5589_v19, 16  ;;  %v1771_v59 = vshll.u32 %v5589_v19, 16 }
 0x123   : > { %v7890_v29 = vpop.f32.mrb[16].mxu0  ;;  %8730 = vst [vmem:[#allocation14_spill] sm:$0xff] %v7916_v33  ;;  %8731 = vst [vmem:[#allocation15_spill] sm:$0xff] %v7918_v34  ;;  %v2109_v16 = vsel %vm7073_vm4, %v5675_v30, %v2108_v13  ;;  %v2110_v17 = vrot.slane %v2108_v13, 4  ;;  %4326 = vmatmul.mubr.bf16.gmra.mrb[112].mxu0 %v7916_v33  ;;  %v2704_v35 = vsel %vm7082_vm5, %v2699_v31, %v2703_v54  ;;  %v1777_v26 = vshll.u32 %v5590_v63, 16 }
 0x124   : > { %v7894_v60 = vpop.f32.mrb[16].mxu1  ;;  %v7912_v12 = vpop.f32.mrb[17].mxu0  ;;  %v2714_v49 = vsel %vm7082_vm5, %v2709_v52, %v2713_v11  ;;  %v1770_v23 = vrot.slane %v1768_v57, 4  ;;  %v1781_v45 = vshrl.u32 %v5590_v63, 16  ;;  %v1773_v24 = vrot.slane %v1771_v59, 5 }
 0x125   : > { %v7914_v32 = vpop.f32.mrb[17].mxu1  ;;  %v7920_v44 = vpop.f32.mrb[18].mxu0  ;;  %v5802_v3 = vcombine.low %v2704_v35, %v2714_v49  ;;  %v2112_v21 = vsel %vm7073_vm4, %v2110_v17, %v2111_v40  ;;  %v1779_v30 = vrot.slane %v1777_v26, 5  ;;  %v1787_v13 = vshll.u32 %v5591_v41, 16  ;;  %v5787_v33 = vld [vmem:[%s7059_s11 + $0xcc] sm:$0xf] }
 0x126   : > { %v7922_v58 = vpop.f32.mrb[18].mxu1  ;;  %v7927_v42 = vpop.f32.mrb[19].mxu0  ;;  %v5691_v50 = vcombine.low %v2109_v16, %v2112_v21  ;;  %v1783_v11 = vrot.slane %v1781_v45, 4  ;;  %v2716_v19 = vshrl.u32 %v5781_v1, 16  ;;  %v2719_v31 = vshll.u32 %v5781_v1, 16 }
 0x127   : > { %v7929_v48 = vpop.f32.mrb[19].mxu1  ;;  %4486 = vmatprep.mubr.bf16.mxu1 %v5802_v3  ;;  %v2725_v52 = vshll.u32 %v5782_v6, 16  ;;  %v1774_v35 = vor.u32 %v1773_v24, %v1770_v23  ;;  %v1789_v17 = vrot.slane %v1787_v13, 5  ;;  %v2729_v63 = vshrl.u32 %v5782_v6, 16  ;;  %v5656_v16 = vld [vmem:[%s7059_s11 + $0xb4] sm:$0xe] }
 0x128   : > { %4487 = vmatmul.mubr.bf16.gmra.mrb[112].mxu1 %v6870_v38  ;;  %4333 = vmatprep.mubr.bf16.mxu0 %v5691_v50  ;;  %v2735_v40 = vshll.u32 %v5783_v56, 16  ;;  %v1784_v49 = vor.u32 %v1783_v11, %v1779_v30  ;;  %v2718_v41 = vrot.slane %v2716_v19, 4  ;;  %v2721_v59 = vrot.slane %v2719_v31, 5  ;;  %v5657_v3 = vld [vmem:[%s7059_s11 + $0xb8] sm:$0xf] }
 0x129   : > { %v2727_v26 = vrot.slane %v2725_v52, 5  ;;  %v1775_v1 = vrot.slane %v1774_v35, 4  ;;  %v2731_v45 = vrot.slane %v2729_v63, 4  ;;  %v6168_v23 = vadd.f32 %v7845_v22, %v7835_v20  ;;  %v5658_v50 = vld [vmem:[%s7059_s11 + $0xbc] sm:$0x1] }
 0x12a   : > { %v2737_v38 = vrot.slane %v2735_v40, 5  ;;  %v1785_v56 = vrot.slane %v1784_v49, 4  ;;  %v2722_v24 = vor.u32 %v2721_v59, %v2718_v41  ;;  %v6280_v13 = vadd.f32 %v7861_v36, %v7840_v14  ;;  %v5592_v35 = vld [vmem:[%s7059_s11 + $0xb4] sm:$0xf] }
 0x12b   : > { %v7941_v54 = vpop.f32.mrb[20].mxu0  ;;  %v6171_v11 = vadd.f32 %v7881_v15, %v7874_v7  ;;  %v1780_v31 = vsel %vm7082_vm5, %v1775_v1, %v1779_v30  ;;  %v2732_v52 = vor.u32 %v2731_v45, %v2727_v26  ;;  %v6283_v20 = vadd.f32 %v7883_v5, %v7876_v62  ;;  %v5593_v30 = vld [vmem:[%s7059_s11 + $0xb8] sm:$0xf]  ;;  %v5594_v1 = vld [vmem:[%s7059_s11 + $0xbc] sm:$0x1] }
 0x12c   : > { %v7944_v57 = vpop.f32.mrb[20].mxu1  ;;  %v7947_v21 = vpop.f32.mrb[21].mxu0  ;;  %v5676_v22 = vrot.slane %v5656_v16, 9  ;;  %v1790_v14 = vsel %vm7082_vm5, %v1785_v56, %v1789_v17  ;;  %v2723_v36 = vrot.slane %v2722_v24, 4  ;;  %v7971_v7 = vadd.f32 %v6280_v13, %v6168_v23  ;;  %v5784_v56 = vld [vmem:[%s7059_s11 + $0xc0] sm:$0xf] }
 0x12d   : > { %v7952_v6 = vpop.f32.mrb[21].mxu1  ;;  %v7958_v19 = vpop.f32.mrb[22].mxu0  ;;  %v2115_v15 = vrot.slane %v5657_v3, 5  ;;  %v7978_v5 = vcombine.low %v1780_v31, %v1790_v14  ;;  %v2733_v16 = vrot.slane %v2732_v52, 4  ;;  %v7980_v41 = vadd.f32 %v6283_v20, %v6171_v11  ;;  %v5785_v24 = vld [vmem:[%s7059_s11 + $0xc4] sm:$0xf] }
 0x12e   : > { %v7965_v63 = vpop.f32.mrb[22].mxu1  ;;  %v7967_v40 = vpop.f32.mrb[23].mxu0  ;;  %8732 = vst [vmem:[#allocation16_spill] sm:$0xff] %v7971_v7  ;;  %v2118_v59 = vrot.slane %v5658_v50, 5  ;;  %v2728_v17 = vsel %vm7082_vm5, %v2723_v36, %v2727_v26  ;;  %v1792_v23 = vshrl.u32 %v5592_v35, 16  ;;  %v6872_v11 = vld [vmem:[%s7059_s11 + $0xb4] sm:$0xff]  }
 0x12f   : > { %v7974_v49 = vpop.f32.mrb[23].mxu1  ;;  %8733 = vst [vmem:[#allocation17_spill] sm:$0xff] %v7978_v5  ;;  %8734 = vst [vmem:[#allocation18_spill] sm:$0xff] %v7980_v41  ;;  %v2116_v45 = vsel %vm7073_vm4, %v5676_v22, %v2115_v15  ;;  %v2117_v3 = vrot.slane %v2115_v15, 4  ;;  %4334 = vmatmul.mubr.bf16.gmra.mrb[116].mxu0 %v7978_v5  ;;  %v2738_v13 = vsel %vm7082_vm5, %v2733_v16, %v2737_v38  ;;  %v1795_v31 = vshll.u32 %v5592_v35, 16 }
 0x130   : > { %v1801_v50 = vshll.u32 %v5593_v30, 16  ;;  %v1805_v52 = vshrl.u32 %v5593_v30, 16  ;;  %v5803_v14 = vcombine.low %v2728_v17, %v2738_v13  ;;  %v1794_v36 = vrot.slane %v1792_v23, 4  ;;  %v5786_v41 = vld [vmem:[%s7059_s11 + $0xc8] sm:$0x1] }
 0x131   : > { %v2119_v22 = vsel %vm7073_vm4, %v2117_v3, %v2118_v59  ;;  %v1811_v15 = vshll.u32 %v5594_v1, 16  ;;  %v1797_v16 = vrot.slane %v1795_v31, 5  ;;  %v2740_v13 = vshrl.u32 %v5784_v56, 16 }
 0x132   : > { %v5692_v38 = vcombine.low %v2116_v45, %v2119_v22  ;;  %v1803_v35 = vrot.slane %v1801_v50, 5  ;;  %v1807_v27 = vrot.slane %v1805_v52, 4  ;;  %4494 = vmatprep.mubr.bf16.mxu1 %v5803_v14  ;;  %v2743_v59 = vshll.u32 %v5784_v56, 16 }
 0x133   : > { %v7976_v62 = vpop.f32.mrb[24].mxu0  ;;  %v1813_v17 = vrot.slane %v1811_v15, 5  ;;  %v2749_v3 = vshll.u32 %v5785_v24, 16  ;;  %4495 = vmatmul.mubr.bf16.gmra.mrb[116].mxu1 %v6872_v11  ;;  %v1798_v45 = vor.u32 %v1797_v16, %v1794_v36  ;;  %v2753_v50 = vshrl.u32 %v5785_v24, 16  ;;  %v5660_v36 = vld [vmem:[%s7059_s11 + $0xc4] sm:$0xf] }
 0x134   : > { %v7993_v20 = vpop.f32.mrb[24].mxu1  ;;  %v7995_v26 = vpop.f32.mrb[25].mxu0  ;;  %4341 = vmatprep.mubr.bf16.mxu0 %v5692_v38  ;;  %v1808_v31 = vor.u32 %v1807_v27, %v1803_v35  ;;  %v2759_v52 = vshll.u32 %v5786_v41, 16  ;;  %v2742_v22 = vrot.slane %v2740_v13, 4  ;;  %v2745_v14 = vrot.slane %v2743_v59, 5 }
 0x135   : > { %v8000_v7 = vpop.f32.mrb[25].mxu1  ;;  %v8002_v34 = vpop.f32.mrb[26].mxu0  ;;  %v2751_v15 = vrot.slane %v2749_v3, 5  ;;  %v6174_v56 = vadd.f32 %v7912_v12, %v7890_v29  ;;  %v1799_v4 = vrot.slane %v1798_v45, 4  ;;  %v2755_v11 = vrot.slane %v2753_v50, 4 }
 0x136   : > { %v8004_v30 = vpop.f32.mrb[26].mxu1  ;;  %v8006_v25 = vpop.f32.mrb[27].mxu0  ;;  %v1809_v2 = vrot.slane %v1808_v31, 4  ;;  %v2761_v38 = vrot.slane %v2759_v52, 5  ;;  %v2746_v27 = vor.u32 %v2745_v14, %v2742_v22  ;;  %v6286_v41 = vadd.f32 %v7914_v32, %v7894_v60  ;;  %v5661_v29 = vld [vmem:[%s7059_s11 + $0xc8] sm:$0x1] }
 0x137   : > { %v8008_v1 = vpop.f32.mrb[27].mxu1  ;;  %v6177_v24 = vadd.f32 %v7927_v42, %v7920_v44  ;;  %v6289_v16 = vadd.f32 %v7929_v48, %v7922_v58  ;;  %v5595_v12 = vld [vmem:[%s7059_s11 + $0xc0] sm:$0xf]  ;;  %v1804_v3 = vsel %vm7082_vm5, %v1799_v4, %v1803_v35  ;;  %v2756_v32 = vor.u32 %v2755_v11, %v2751_v15  ;;  %v5596_v44 = vld [vmem:[%s7059_s11 + $0xc4] sm:$0xf] }
 0x138   : > { %v1814_v60 = vsel %vm7082_vm5, %v1809_v2, %v1813_v17  ;;  %v5677_v45 = vrot.slane %v5659_v10, 9  ;;  %v2747_v31 = vrot.slane %v2746_v27, 4  ;;  %v8041_v50 = vadd.f32 %v6286_v41, %v6174_v56  ;;  %v5597_v4 = vld [vmem:[%s7059_s11 + $0xc8] sm:$0x1]  ;;  %v6874_v17 = vld [vmem:[%s7059_s11 + $0xc0] sm:$0xff]  }
 0x139   : > { %v8039_v48 = vcombine.low %v1804_v3, %v1814_v60  ;;  %v8043_v52 = vadd.f32 %v6289_v16, %v6177_v24  ;;  %v2757_v10 = vrot.slane %v2756_v32, 4  ;;  %v2122_v22 = vrot.slane %v5660_v36, 5  ;;  %v5788_v16 = vld [vmem:[%s7059_s11 + $0xd0] sm:$0xf] }
 0x13a   : > { %8736 = vst [vmem:[#allocation20_spill] sm:$0xff] %v8041_v50  ;;  %v2125_v14 = vrot.slane %v5661_v29, 5  ;;  %v1816_v11 = vshrl.u32 %v5595_v12, 16  ;;  %v2752_v56 = vsel %vm7082_vm5, %v2747_v31, %v2751_v15  ;;  %v1819_v27 = vshll.u32 %v5595_v12, 16 }
 0x13b   : > { %v8010_v23 = vpop.f32.mrb[28].mxu0  ;;  %8735 = vst [vmem:[#allocation19_spill] sm:$0xff] %v8039_v48  ;;  %8737 = vst [vmem:[#allocation21_spill] sm:$0xff] %v8043_v52  ;;  %4342 = vmatmul.mubr.bf16.gmra.mrb[120].mxu0 %v8039_v48  ;;  %v1825_v41 = vshll.u32 %v5596_v44, 16  ;;  %v1829_v24 = vshrl.u32 %v5596_v44, 16  ;;  %v2762_v60 = vsel %vm7082_vm5, %v2757_v10, %v2761_v38  ;;  %v2123_v36 = vsel %vm7073_vm4, %v5677_v45, %v2122_v22 }
 0x13c   : > { %v8015_v5 = vpop.f32.mrb[28].mxu1  ;;  %v8026_v13 = vpop.f32.mrb[29].mxu0  ;;  %v2124_v29 = vrot.slane %v2122_v22, 4  ;;  %v1818_v32 = vrot.slane %v1816_v11, 4  ;;  %v5789_v52 = vld [vmem:[%s7059_s11 + $0xd4] sm:$0x1]  ;;  %v5804_v15 = vcombine.low %v2752_v56, %v2762_v60  ;;  %v6298_v51 = vadd.f32 %v8000_v7, %v7993_v20 }
 0x13d   : > { %v8028_v59 = vpop.f32.mrb[29].mxu1  ;;  %v8035_v42 = vpop.f32.mrb[30].mxu0  ;;  %v1821_v12 = vrot.slane %v1819_v27, 5  ;;  %v1827_v31 = vrot.slane %v1825_v41, 5  ;;  %v1831_v44 = vrot.slane %v1829_v24, 4  ;;  %v1835_v10 = vshll.u32 %v5597_v4, 16 }
 0x13e   : > { %v8037_v58 = vpop.f32.mrb[30].mxu1  ;;  %v8046_v35 = vpop.f32.mrb[31].mxu0  ;;  %v2126_v38 = vsel %vm7073_vm4, %v2124_v29, %v2125_v14  ;;  %v2764_v45 = vshrl.u32 %v5787_v33, 16  ;;  %v2767_v22 = vshll.u32 %v5787_v33, 16  ;;  %4502 = vmatprep.mubr.bf16.mxu1 %v5804_v15  ;;  %v2773_v24 = vshll.u32 %v5788_v16, 16 }
 0x13f   : > { %v8048_v2 = vpop.f32.mrb[31].mxu1  ;;  %v5693_v56 = vcombine.low %v2123_v36, %v2126_v38  ;;  %v1822_v27 = vor.u32 %v1821_v12, %v1818_v32  ;;  %v1832_v41 = vor.u32 %v1831_v44, %v1827_v31  ;;  %4503 = vmatmul.mubr.bf16.gmra.mrb[120].mxu1 %v6874_v17  ;;  %v1837_v28 = vrot.slane %v1835_v10, 5  ;;  %v5806_v33 = vld [vmem:[%s7059_s11 + $0x18] sm:$0xe]  ;;  %v5807_v38 = vld [vmem:[%s7059_s11 + $0x1c] sm:$0xf] }
 0x140   : > { %v2766_v4 = vrot.slane %v2764_v45, 4  ;;  %v2769_v14 = vrot.slane %v2767_v22, 5  ;;  %v2777_v29 = vshrl.u32 %v5788_v16, 16  ;;  %v2775_v15 = vrot.slane %v2773_v24, 5  ;;  %v5808_v10 = vld [vmem:[%s7059_s11 + $0x20] sm:$0x1] }
 0x141   : > { %4349 = vmatprep.mubr.bf16.mxu0 %v5693_v56  ;;  %v1823_v43 = vrot.slane %v1822_v27, 4  ;;  %v1833_v47 = vrot.slane %v1832_v41, 4  ;;  %v2783_v36 = vshll.u32 %v5789_v52, 16  ;;  %v6180_v44 = vadd.f32 %v7947_v21, %v7941_v54  ;;  %v5809_v45 = vld [vmem:[%s7059_s11 + $0x24] sm:$0xe] }
 0x142   : > { %v2770_v32 = vor.u32 %v2769_v14, %v2766_v4  ;;  %v2779_v12 = vrot.slane %v2777_v29, 4  ;;  %v6292_v17 = vadd.f32 %v7952_v6, %v7944_v57  ;;  %v6183_v27 = vadd.f32 %v7967_v40, %v7958_v19  ;;  %v5810_v41 = vld [vmem:[%s7059_s11 + $0x28] sm:$0xf] }
 0x143   : > { %v8056_v3 = vpop.f32.mrb[32].mxu0  ;;  %v1828_v22 = vsel %vm7082_vm5, %v1823_v43, %v1827_v31  ;;  %v1838_v52 = vsel %vm7082_vm5, %v1833_v47, %v1837_v28  ;;  %v2785_v56 = vrot.slane %v2783_v36, 5  ;;  %v5811_v43 = vld [vmem:[%s7059_s11 + $0x2c] sm:$0x1]  ;;  %v6295_v28 = vadd.f32 %v7974_v49, %v7965_v63  ;;  %v5812_v63 = vld [vmem:[%s7059_s11 + $0x30] sm:$0xe] }
 0x144   : > { %v8063_v50 = vpop.f32.mrb[32].mxu1  ;;  %v8065_v48 = vpop.f32.mrb[33].mxu0  ;;  %v8100_v57 = vcombine.low %v1828_v22, %v1838_v52  ;;  %v2771_v6 = vrot.slane %v2770_v32, 4  ;;  %v2780_v24 = vor.u32 %v2779_v12, %v2775_v15  ;;  %v8102_v4 = vadd.f32 %v6292_v17, %v6180_v44  ;;  %v5813_v52 = vld [vmem:[%s7059_s11 + $0x34] sm:$0xf] }
 0x145   : > { %v8067_v37 = vpop.f32.mrb[33].mxu1  ;;  %v8069_v61 = vpop.f32.mrb[34].mxu0  ;;  %v5854_v19 = vrot.slane %v5806_v33, 9  ;;  %v2965_v40 = vrot.slane %v5807_v38, 5  ;;  %v2968_v14 = vrot.slane %v5808_v10, 5  ;;  %v5855_v44 = vrot.slane %v5809_v45, 9 }
 0x146   : > { %v8073_v11 = vpop.f32.mrb[34].mxu1  ;;  %v8075_v39 = vpop.f32.mrb[35].mxu0  ;;  %8738 = vst [vmem:[#allocation22_spill] sm:$0xff] %v8102_v4  ;;  %4350 = vmatmul.mubr.bf16.gmra.mrb[124].mxu0 %v8100_v57  ;;  %v2776_v32 = vsel %vm7082_vm5, %v2771_v6, %v2775_v15  ;;  %v2781_v12 = vrot.slane %v2780_v24, 4  ;;  %v2972_v17 = vrot.slane %v5810_v41, 5  ;;  %v8121_v33 = vadd.f32 %v6295_v28, %v6183_v27  ;;  %v6876_v6 = vld [vmem:[%s7059_s11 + $0xcc] sm:$0xff]  }
 0x147   : > { %v8077_v60 = vpop.f32.mrb[35].mxu1  ;;  %v2966_v38 = vsel %vm7073_vm4, %v5854_v19, %v2965_v40  ;;  %v2967_v10 = vrot.slane %v2965_v40, 4  ;;  %v2975_v22 = vrot.slane %v5811_v43, 5  ;;  %v5814_v4 = vld [vmem:[%s7059_s11 + $0x38] sm:$0x1]  ;;  %v6186_v27 = vadd.f32 %v7995_v26, %v7976_v62 }
 0x148   : > { %8739 = vst [vmem:[#allocation23_spill] sm:$0xff] %v8121_v33  ;;  %v2786_v15 = vsel %vm7082_vm5, %v2781_v12, %v2785_v56  ;;  %v2973_v45 = vsel %vm7073_vm4, %v5855_v44, %v2972_v17  ;;  %v2974_v41 = vrot.slane %v2972_v17, 4  ;;  %v5815_v24 = vld [vmem:[%s7059_s11 + $0x3c] sm:$0xe]  ;;  %v6189_v56 = vadd.f32 %v8006_v25, %v8002_v34  ;;  %v5816_v12 = vld [vmem:[%s7059_s11 + $0x40] sm:$0xf] }
 0x149   : > { %v5805_v43 = vcombine.low %v2776_v32, %v2786_v15  ;;  %v2969_v40 = vsel %vm7073_vm4, %v2967_v10, %v2968_v14  ;;  %v5817_v44 = vld [vmem:[%s7059_s11 + $0x44] sm:$0x1]  ;;  %v6301_v14 = vadd.f32 %v8008_v1, %v8004_v30  ;;  %v5856_v10 = vrot.slane %v5812_v63, 9 }
 0x14a   : > { %v5870_v26 = vcombine.low %v2966_v38, %v2969_v40  ;;  %v2976_v32 = vsel %vm7073_vm4, %v2974_v41, %v2975_v22  ;;  %v8159_v34 = vadd.f32 %v6298_v51, %v6186_v27  ;;  %v2979_v20 = vrot.slane %v5813_v52, 5  ;;  %v5818_v38 = vld [vmem:[%s7059_s11 + $0x48] sm:$0xe] }
 0x14b   : > { %v8087_v16 = vpop.f32.mrb[36].mxu0  ;;  %4510 = vmatprep.mubr.bf16.mxu1 %v5805_v43  ;;  %v5871_v25 = vcombine.low %v2973_v45, %v2976_v32  ;;  %v2982_v33 = vrot.slane %v5814_v4, 5  ;;  %v8166_v30 = vadd.f32 %v6301_v14, %v6189_v56  ;;  %v5857_v1 = vrot.slane %v5815_v24, 9  ;;  %v5819_v45 = vld [vmem:[%s7059_s11 + $0x4c] sm:$0xf] }
 0x14c   : > { %v8096_v54 = vpop.f32.mrb[36].mxu1  ;;  %v8098_v21 = vpop.f32.mrb[37].mxu0  ;;  %4511 = vmatmul.mubr.bf16.gmra.mrb[124].mxu1 %v6876_v6  ;;  %6644 = vmatprep.mubr.bf16.mxu0 %v5870_v26  ;;  %v2986_v63 = vrot.slane %v5816_v12, 5  ;;  %v2989_v41 = vrot.slane %v5817_v44, 5  ;;  %v2980_v4 = vsel %vm7073_vm4, %v5856_v10, %v2979_v20  ;;  %v2981_v52 = vrot.slane %v2979_v20, 4 }
 0x14d   : > { %v8105_v31 = vpop.f32.mrb[37].mxu1  ;;  %v8107_v47 = vpop.f32.mrb[38].mxu0  ;;  %6692 = vmatprep.mubr.bf16.mxu1 %v7472_v18  ;;  %v6192_v27 = vadd.f32 %v8026_v13, %v8010_v23  ;;  %v6304_v6 = vadd.f32 %v8028_v59, %v8015_v5  ;;  %v5820_v43 = vld [vmem:[%s7059_s11 + $0x50] sm:$0x1]  ;;  %v6195_v18 = vadd.f32 %v8046_v35, %v8035_v42  ;;  %v6307_v56 = vadd.f32 %v8048_v2, %v8037_v58  ;;  %v5821_v12 = vld [vmem:[%s7059_s11 + $0x54] sm:$0xe] }
 0x14e   : > { %v8111_v29 = vpop.f32.mrb[38].mxu1  ;;  %v8113_v36 = vpop.f32.mrb[39].mxu0  ;;  %6645 = vmatmul.mubr.bf16.vlgmr.msra.gmra.mrb[128].mxu0 %v5871_v25  ;;  %v2987_v24 = vsel %vm7073_vm4, %v5857_v1, %v2986_v63  ;;  %v2988_v51 = vrot.slane %v2986_v63, 4  ;;  %v5822_v44 = vld [vmem:[%s7059_s11 + $0x58] sm:$0xf]  ;;  %v2983_v23 = vsel %vm7073_vm4, %v2981_v52, %v2982_v33  ;;  %v5858_v13 = vrot.slane %v5818_v38, 9 }
 0x14f   : > { %v8119_v49 = vpop.f32.mrb[39].mxu1  ;;  %v8187_v5 = vadd.f32 %v6304_v6, %v6192_v27  ;;  %v2993_v59 = vrot.slane %v5819_v45, 5  ;;  %v5823_v26 = vld [vmem:[%s7059_s11 + $0x5c] sm:$0x1]  ;;  %v5872_v14 = vcombine.low %v2980_v4, %v2983_v23  ;;  %v8194_v35 = vadd.f32 %v6307_v56, %v6195_v18  ;;  %v5824_v2 = vld [vmem:[%s7059_s11 + $0x60] sm:$0xe] }
 0x150   : > { %v2990_v42 = vsel %vm7073_vm4, %v2988_v51, %v2989_v41  ;;  %v2996_v58 = vrot.slane %v5820_v43, 5  ;;  %v5825_v1 = vld [vmem:[%s7059_s11 + $0x64] sm:$0xf]  ;;  %v5859_v41 = vrot.slane %v5821_v12, 9  ;;  %v3000_v4 = vrot.slane %v5822_v44, 5 }
 0x151   : > { %v5873_v25 = vcombine.low %v2987_v24, %v2990_v42  ;;  %v2994_v20 = vsel %vm7073_vm4, %v5858_v13, %v2993_v59  ;;  %v2995_v38 = vrot.slane %v2993_v59, 4  ;;  %6648 = vmatprep.mubr.bf16.mxu0 %v5872_v14  ;;  %v6198_v52 = vadd.f32 %v8065_v48, %v8056_v3  ;;  %v5826_v6 = vld [vmem:[%s7059_s11 + $0x68] sm:$0x1]  ;;  %v5828_v23 = vld [vmem:[%s7059_s11 + $0x70] sm:$0xf] }
 0x152   : > { %v6310_v27 = vadd.f32 %v8067_v37, %v8063_v50  ;;  %v3003_v18 = vrot.slane %v5823_v26, 5  ;;  %v6201_v56 = vadd.f32 %v8075_v39, %v8069_v61  ;;  %v6313_v12 = vadd.f32 %v8077_v60, %v8073_v11  ;;  %v5831_v60 = vld [vmem:[%s7059_s11 + $0x7c] sm:$0xf]  ;;  %v5827_v26 = vld [vmem:[%s7059_s11 + $0x6c] sm:$0xe] }
 0x153   : > { %v8135_v28 = vpop.f32.mrb[40].mxu0  ;;  %v2997_v51 = vsel %vm7073_vm4, %v2995_v38, %v2996_v58  ;;  %v3002_v50 = vrot.slane %v3000_v4, 4  ;;  %v5860_v44 = vrot.slane %v5824_v2, 9  ;;  %v3007_v39 = vrot.slane %v5825_v1, 5 }
 0x154   : > { %v8137_v19 = vpop.f32.mrb[40].mxu1  ;;  %v8147_v17 = vpop.f32.mrb[41].mxu0  ;;  %6693 = vmatmul.mubr.bf16.vlgmr.msra.gmra.mrb[128].mxu1 %v7508_v8  ;;  %v5874_v37 = vcombine.low %v2994_v20, %v2997_v51  ;;  %v8226_v3 = vadd.f32 %v6310_v27, %v6198_v52  ;;  %v8230_v13 = vadd.f32 %v6313_v12, %v6201_v56  ;;  %v3010_v61 = vrot.slane %v5826_v6, 5  ;;  %v5830_v20 = vld [vmem:[%s7059_s11 + $0x78] sm:$0xe] }
 0x155   : > { %v8149_v62 = vpop.f32.mrb[41].mxu1  ;;  %v8155_v15 = vpop.f32.mrb[42].mxu0  ;;  %6696 = vmatprep.mubr.bf16.mxu1 %v7539_v0  ;;  %v3001_v11 = vsel %vm7073_vm4, %v5859_v41, %v3000_v4  ;;  %v6204_v8 = vadd.f32 %v8098_v21, %v8087_v16  ;;  %v3004_v59 = vsel %vm7073_vm4, %v3002_v50, %v3003_v18  ;;  %v3009_v0 = vrot.slane %v3007_v39, 4  ;;  %v5832_v41 = vld [vmem:[%s7059_s11 + $0x80] sm:$0x1] }
 0x156   : > { %v8157_v7 = vpop.f32.mrb[42].mxu1  ;;  %v8162_v40 = vpop.f32.mrb[43].mxu0  ;;  %6649 = vmatmul.mubr.bf16.gmra.mrb[132].mxu0 %v5873_v25  ;;  %v3014_v14 = vrot.slane %v5828_v23, 5  ;;  %v6316_v42 = vadd.f32 %v8105_v31, %v8096_v54  ;;  %v3008_v2 = vsel %vm7073_vm4, %v5860_v44, %v3007_v39  ;;  %v5829_v25 = vld [vmem:[%s7059_s11 + $0x74] sm:$0x1]  ;;  %v6207_v16 = vadd.f32 %v8113_v36, %v8107_v47 }
 0x157   : > { %v8164_v22 = vpop.f32.mrb[43].mxu1  ;;  %6652 = vmatprep.mubr.bf16.mxu0 %v5874_v37  ;;  %v6319_v21 = vadd.f32 %v8119_v49, %v8111_v29  ;;  %v3011_v54 = vsel %vm7073_vm4, %v3009_v0, %v3010_v61  ;;  %v3021_v4 = vrot.slane %v5831_v60, 5  ;;  %v5875_v47 = vcombine.low %v3001_v11, %v3004_v59  ;;  %v5834_v23 = vld [vmem:[%s7059_s11 + $0x88] sm:$0xf]  ;;  %v5837_v60 = vld [vmem:[%s7059_s11 + $0x94] sm:$0xf] }
 0x158   : > { %v8258_v31 = vadd.f32 %v6316_v42, %v6204_v8  ;;  %v5861_v36 = vrot.slane %v5827_v26, 9  ;;  %v5876_v51 = vcombine.low %v3008_v2, %v3011_v54  ;;  %v3016_v18 = vrot.slane %v3014_v14, 4  ;;  %v5836_v42 = vld [vmem:[%s7059_s11 + $0x90] sm:$0xe]  ;;  %v5838_v2 = vld [vmem:[%s7059_s11 + $0x98] sm:$0x1] }
 0x159   : > { %v8265_v29 = vadd.f32 %v6319_v21, %v6207_v16  ;;  %v3017_v56 = vrot.slane %v5829_v25, 5  ;;  %v5862_v12 = vrot.slane %v5830_v20, 9  ;;  %v3023_v50 = vrot.slane %v3021_v4, 4 }
 0x15a   : > { %v3024_v44 = vrot.slane %v5832_v41, 5  ;;  %v6210_v39 = vadd.f32 %v8147_v17, %v8135_v28  ;;  %v6322_v61 = vadd.f32 %v8149_v62, %v8137_v19  ;;  %v6213_v11 = vadd.f32 %v8162_v40, %v8155_v15 }
 0x15b   : > { %v8197_v10 = vpop.f32.mrb[44].mxu0  ;;  %v6325_v8 = vadd.f32 %v8164_v22, %v8157_v7  ;;  %v3015_v28 = vsel %vm7073_vm4, %v5861_v36, %v3014_v14  ;;  %v3018_v19 = vsel %vm7073_vm4, %v3016_v18, %v3017_v56  ;;  %v3028_v17 = vrot.slane %v5834_v23, 5  ;;  %v5835_v22 = vld [vmem:[%s7059_s11 + $0x8c] sm:$0x1] }
 0x15c   : > { %v8190_v32 = vpop.f32.mrb[44].mxu1  ;;  %v8204_v63 = vpop.f32.mrb[45].mxu0  ;;  %6697 = vmatmul.mubr.bf16.gmra.mrb[132].mxu1 %v7567_v55  ;;  %v8283_v55 = vadd.f32 %v6322_v61, %v6210_v39  ;;  %v3022_v7 = vsel %vm7073_vm4, %v5862_v12, %v3021_v4  ;;  %v3025_v40 = vsel %vm7073_vm4, %v3023_v50, %v3024_v44  ;;  %v3035_v59 = vrot.slane %v5837_v60, 5  ;;  %v8740_v50 = vld [vmem:[#allocation3_spill] sm:$0xff]  ;;  %v5839_v39 = vld [vmem:[%s7059_s11 + $0x9c] sm:$0xe] }
 0x15d   : > { %v8199_v33 = vpop.f32.mrb[45].mxu1  ;;  %v8213_v43 = vpop.f32.mrb[46].mxu0  ;;  %6700 = vmatprep.mubr.bf16.mxu1 %v7601_v53  ;;  %v5833_v53 = vld [vmem:[%s7059_s11 + $0x84] sm:$0xe]  ;;  %v8290_v62 = vadd.f32 %v6325_v8, %v6213_v11  ;;  %v6216_v0 = vadd.f32 %v8204_v63, %v8197_v10  ;;  %v5877_v20 = vcombine.low %v3015_v28, %v3018_v19  ;;  %v3030_v36 = vrot.slane %v3028_v17, 4 }
 0x15e   : > { %v8206_v45 = vpop.f32.mrb[46].mxu1  ;;  %v8223_v48 = vpop.f32.mrb[47].mxu0  ;;  %6653 = vmatmul.mubr.bf16.gmra.mrb[136].mxu0 %v5875_v47  ;;  %v6328_v25 = vadd.f32 %v8199_v33, %v8190_v32  ;;  %v5863_v54 = vrot.slane %v5833_v53, 9  ;;  %v5878_v47 = vcombine.low %v3022_v7, %v3025_v40  ;;  %v5864_v33 = vrot.slane %v5836_v42, 9  ;;  %v5841_v61 = vld [vmem:[%s7059_s11 + $0xa4] sm:$0x1] }
 0x15f   : > { %v8215_v24 = vpop.f32.mrb[47].mxu1  ;;  %6656 = vmatprep.mubr.bf16.mxu0 %v5876_v51  ;;  %v6219_v41 = vadd.f32 %v8223_v48, %v8213_v43  ;;  %v3031_v51 = vrot.slane %v5835_v22, 5  ;;  %v3037_v56 = vrot.slane %v3035_v59, 4  ;;  %v3038_v12 = vrot.slane %v5838_v2, 5  ;;  %v5840_v43 = vld [vmem:[%s7059_s11 + $0xa0] sm:$0xf] }
 0x160   : > { %v6331_v4 = vadd.f32 %v8215_v24, %v8206_v45  ;;  %v8309_v18 = vadd.f32 %v6328_v25, %v6216_v0  ;;  %v5843_v45 = vld [vmem:[%s7059_s11 + $0xac] sm:$0xf]  ;;  %v3029_v24 = vsel %vm7073_vm4, %v5863_v54, %v3028_v17  ;;  %v3042_v11 = vrot.slane %v5840_v43, 5  ;;  %v5844_v7 = vld [vmem:[%s7059_s11 + $0xb0] sm:$0x1] }
 0x161   : > { %v3032_v23 = vsel %vm7073_vm4, %v3030_v36, %v3031_v51  ;;  %v3045_v22 = vrot.slane %v5841_v61, 5  ;;  %v3052_v36 = vrot.slane %v5844_v7, 5  ;;  %v5846_v51 = vld [vmem:[%s7059_s11 + $0xb8] sm:$0xf]  ;;  %v5848_v61 = vld [vmem:[%s7059_s11 + $0xc0] sm:$0xe] }
 0x162   : > { %v8313_v48 = vadd.f32 %v6331_v4, %v6219_v41  ;;  %v3044_v25 = vrot.slane %v3042_v11, 4  ;;  %v8741_v4 = vld [vmem:[#allocation4_spill] sm:$0xff] }
 0x163   : > { %v8252_v38 = vpop.f32.mrb[48].mxu0 }
 0x164   : > { %v8242_v58 = vpop.f32.mrb[48].mxu1  ;;  %v8261_v52 = vpop.f32.mrb[49].mxu0  ;;  %6701 = vmatmul.mubr.bf16.gmra.mrb[136].mxu1 %v7632_v9 }
 0x165   : > { %v8254_v1 = vpop.f32.mrb[49].mxu1  ;;  %v8267_v49 = vpop.f32.mrb[50].mxu0  ;;  %6704 = vmatprep.mubr.bf16.mxu1 %v8740_v50  ;;  %v6222_v44 = vadd.f32 %v8261_v52, %v8252_v38  ;;  %v3036_v38 = vsel %vm7073_vm4, %v5864_v33, %v3035_v59  ;;  %v3049_v52 = vrot.slane %v5843_v45, 5 }
 0x166   : > { %v8263_v27 = vpop.f32.mrb[50].mxu1  ;;  %v6224_v37 = vpop.f32.mrb[51].mxu0  ;;  %6657 = vmatmul.mubr.bf16.gmra.mrb[140].mxu0 %v5877_v20  ;;  %v6334_v9 = vadd.f32 %v8254_v1, %v8242_v58  ;;  %v3039_v58 = vsel %vm7073_vm4, %v3037_v56, %v3038_v12  ;;  %v5842_v1 = vld [vmem:[%s7059_s11 + $0xa8] sm:$0xe]  ;;  %v8742_v12 = vld [vmem:[#allocation5_spill] sm:$0xff] }
 0x167   : > { %v8269_v6 = vpop.f32.mrb[51].mxu1  ;;  %6660 = vmatprep.mubr.bf16.mxu0 %v5878_v47  ;;  %v6225_v8 = vadd.f32 %v6224_v37, %v8267_v49  ;;  %v5880_v2 = vcombine.low %v3036_v38, %v3039_v58  ;;  %v5866_v20 = vrot.slane %v5842_v1, 9  ;;  %v3051_v47 = vrot.slane %v3049_v52, 4 }
 0x168   : > { %v6337_v60 = vadd.f32 %v8269_v6, %v8263_v27  ;;  %v8335_v19 = vadd.f32 %v6334_v9, %v6222_v44  ;;  %v5879_v27 = vcombine.low %v3029_v24, %v3032_v23  ;;  %v5865_v6 = vrot.slane %v5839_v39, 9 }
 0x169   : > { %v3050_v23 = vsel %vm7073_vm4, %v5866_v20, %v3049_v52  ;;  %v3053_v39 = vsel %vm7073_vm4, %v3051_v47, %v3052_v36  ;;  %v8744_v47 = vld [vmem:[#allocation8_spill] sm:$0xff] }
 0x16a   : > { %v8338_v40 = vadd.f32 %v6337_v60, %v6225_v8 }
 0x16b   : > { %v6226_v26 = vpop.f32.mrb[52].mxu0 }
 0x16c   : > { %v8292_v15 = vpop.f32.mrb[52].mxu1  ;;  %v6227_v16 = vpop.f32.mrb[53].mxu0  ;;  %6705 = vmatmul.mubr.bf16.gmra.mrb[140].mxu1 %v8741_v4 }
 0x16d   : > { %v6339_v14 = vpop.f32.mrb[53].mxu1  ;;  %v6229_v10 = vpop.f32.mrb[54].mxu0  ;;  %v6228_v59 = vadd.f32 %v6227_v16, %v6226_v26  ;;  %6708 = vmatprep.mubr.bf16.mxu1 %v8742_v12  ;;  %v5849_v26 = vld [vmem:[%s7059_s11 + $0xc4] sm:$0xf] }
 0x16e   : > { %v6341_v21 = vpop.f32.mrb[54].mxu1  ;;  %v6230_v32 = vpop.f32.mrb[55].mxu0  ;;  %v6340_v54 = vadd.f32 %v6339_v14, %v8292_v15  ;;  %6661 = vmatmul.mubr.bf16.gmra.mrb[144].mxu0 %v5879_v27  ;;  %v3043_v15 = vsel %vm7073_vm4, %v5865_v6, %v3042_v11  ;;  %v3063_v11 = vrot.slane %v5849_v26, 5  ;;  %v5882_v6 = vcombine.low %v3050_v23, %v3053_v39  ;;  %v8745_v39 = vld [vmem:[#allocation11_spill] sm:$0xff] }
 0x16f   : > { %v6342_v63 = vpop.f32.mrb[55].mxu1  ;;  %v6231_v33 = vadd.f32 %v6230_v32, %v6229_v10  ;;  %6664 = vmatprep.mubr.bf16.mxu0 %v5880_v2  ;;  %v5845_v10 = vld [vmem:[%s7059_s11 + $0xb4] sm:$0xe]  ;;  %v3056_v32 = vrot.slane %v5846_v51, 5  ;;  %v8743_v2 = vld [vmem:[#allocation6_spill] sm:$0xff] }
 0x170   : > { %v6343_v56 = vadd.f32 %v6342_v63, %v6341_v21  ;;  %v8345_v16 = vadd.f32 %v6340_v54, %v6228_v59  ;;  %v3046_v21 = vsel %vm7073_vm4, %v3044_v25, %v3045_v22  ;;  %v5847_v63 = vld [vmem:[%s7059_s11 + $0xbc] sm:$0x1]  ;;  %v5867_v7 = vrot.slane %v5845_v10, 9  ;;  %v5852_v54 = vld [vmem:[%s7059_s11 + $0xd0] sm:$0xf] }
 0x171   : > { %v3058_v22 = vrot.slane %v3056_v32, 4  ;;  %v5868_v59 = vrot.slane %v5848_v61, 9  ;;  %v3065_v25 = vrot.slane %v3063_v11, 4  ;;  %v3070_v12 = vrot.slane %v5852_v54, 5 }
 0x172   : > { %v8349_v14 = vadd.f32 %v6343_v56, %v6231_v33  ;;  %v3057_v51 = vsel %vm7073_vm4, %v5867_v7, %v3056_v32  ;;  %v5851_v56 = vld [vmem:[%s7059_s11 + $0xcc] sm:$0xe]  ;;  %v8748_v7 = vld [vmem:[#allocation9_spill] sm:$0xff] }
 0x173   : > { %v6232_v53 = vpop.f32.mrb[56].mxu0  ;;  %v3064_v26 = vsel %vm7073_vm4, %v5868_v59, %v3063_v11 }
 0x174   : > { %v6344_v28 = vpop.f32.mrb[56].mxu1  ;;  %v6233_v49 = vpop.f32.mrb[57].mxu0  ;;  %6709 = vmatmul.mubr.bf16.gmra.mrb[144].mxu1 %v8743_v2  ;;  %v8749_v2 = vld [vmem:[#allocation17_spill] sm:$0xff] }
 0x175   : > { %v6345_v17 = vpop.f32.mrb[57].mxu1  ;;  %v6235_v0 = vpop.f32.mrb[58].mxu0  ;;  %v6234_v43 = vadd.f32 %v6233_v49, %v6232_v53  ;;  %v3059_v49 = vrot.slane %v5847_v63, 5  ;;  %6712 = vmatprep.mubr.bf16.mxu1 %v8744_v47  ;;  %v8751_v47 = vld [vmem:[#allocation10_spill] sm:$0xff] }
 0x176   : > { %v6347_v37 = vpop.f32.mrb[58].mxu1  ;;  %v6236_v41 = vpop.f32.mrb[59].mxu0  ;;  %v6346_v50 = vadd.f32 %v6345_v17, %v6344_v28  ;;  %v5850_v28 = vld [vmem:[%s7059_s11 + $0xc8] sm:$0x1]  ;;  %v5881_v17 = vcombine.low %v3043_v15, %v3046_v21  ;;  %v5869_v21 = vrot.slane %v5851_v56, 9 }
 0x177   : > { %v6348_v42 = vpop.f32.mrb[59].mxu1  ;;  %v6237_v45 = vadd.f32 %v6236_v41, %v6235_v0  ;;  %v3066_v20 = vrot.slane %v5850_v28, 5  ;;  %v3060_v33 = vsel %vm7073_vm4, %v3058_v22, %v3059_v49 }
 0x178   : > { %v8355_v24 = vadd.f32 %v6346_v50, %v6234_v43  ;;  %v6349_v44 = vadd.f32 %v6348_v42, %v6347_v37  ;;  %6665 = vmatmul.mubr.bf16.gmra.mrb[148].mxu0 %v5881_v17  ;;  %v5853_v50 = vld [vmem:[%s7059_s11 + $0xd4] sm:$0x1] }
 0x179   : > { %6668 = vmatprep.mubr.bf16.mxu0 %v5882_v6  ;;  %v3067_v43 = vsel %vm7073_vm4, %v3065_v25, %v3066_v20  ;;  %v8750_v20 = vld [vmem:[#allocation19_spill] sm:$0xff] }
 0x17a   : > { %v8363_v38 = vadd.f32 %v6349_v44, %v6237_v45  ;;  %v5883_v45 = vcombine.low %v3057_v51, %v3060_v33  ;;  %v5884_v63 = vcombine.low %v3064_v26, %v3067_v43  ;;  %v3072_v44 = vrot.slane %v3070_v12, 4 }
 0x17b   : > { %v6238_v8 = vpop.f32.mrb[60].mxu0 }
 0x17c   : > { %v6350_v9 = vpop.f32.mrb[60].mxu1  ;;  %v6239_v58 = vpop.f32.mrb[61].mxu0  ;;  %6713 = vmatmul.mubr.bf16.gmra.mrb[148].mxu1 %v8745_v39 }
 0x17d   : > { %v6351_v60 = vpop.f32.mrb[61].mxu1  ;;  %v6240_v37 = vadd.f32 %v6239_v58, %v6238_v8  ;;  %v6241_v27 = vpop.f32.mrb[62].mxu0  ;;  %v8746_v8 = vld [vmem:[#allocation14_spill] sm:$0xff] }
 0x17e   : > { %v6352_v1 = vadd.f32 %v6351_v60, %v6350_v9  ;;  %v6353_v53 = vpop.f32.mrb[62].mxu1  ;;  %v6242_v0 = vpop.f32.mrb[63].mxu0  ;;  %v3073_v9 = vrot.slane %v5853_v50, 5  ;;  %6716 = vmatprep.mubr.bf16.mxu1 %v8746_v8  ;;  %v8747_v60 = vld [vmem:[#allocation7_spill] sm:$0xff] }
 0x17f   : > { %v6354_v52 = vpop.f32.mrb[63].mxu1  ;;  %v6243_v4 = vadd.f32 %v6242_v0, %v6241_v27 }
 0x180   : > { %v6355_v42 = vadd.f32 %v6354_v52, %v6353_v53  ;;  %v8367_v41 = vadd.f32 %v6352_v1, %v6240_v37  ;;  %6669 = vmatmul.mubr.bf16.gmra.mrb[152].mxu0 %v5883_v45  ;;  %v3071_v53 = vsel %vm7073_vm4, %v5869_v21, %v3070_v12  ;;  %v3074_v17 = vsel %vm7073_vm4, %v3072_v44, %v3073_v9  ;;  %v8752_v12 = vld [vmem:[#allocation12_spill] sm:$0xff] }
 0x181   : > { %6672 = vmatprep.mubr.bf16.mxu0 %v5884_v63  ;;  %v5885_v59 = vcombine.low %v3071_v53, %v3074_v17 }
 0x182   : > { %v8370_v36 = vadd.f32 %v6355_v42, %v6243_v4 }
 0x183   : > { %v6372_v15 = vpop.f32.mrb[64].mxu0 }
 0x184   : > { %v6373_v10 = vpop.f32.mrb[65].mxu0  ;;  %6717 = vmatmul.mubr.bf16.gmra.mrb[152].mxu1 %v8749_v2  ;;  %v8755_v2 = vld [vmem:[#allocation16_spill] sm:$0xff] }
 0x185   : > { %v6374_v32 = vadd.f32 %v6373_v10, %v6372_v15  ;;  %v6375_v23 = vpop.f32.mrb[66].mxu0  ;;  %v6484_v28 = vpop.f32.mrb[64].mxu1  ;;  %6720 = vmatprep.mubr.bf16.mxu1 %v8750_v20 }
 0x186   : > { %v6376_v61 = vpop.f32.mrb[67].mxu0  ;;  %v6485_v1 = vpop.f32.mrb[65].mxu1 }
 0x187   : > { %v4232_v11 = vadd.f32 %v6374_v32, %v8747_v60  ;;  %v6377_v58 = vadd.f32 %v6376_v61, %v6375_v23  ;;  %v6486_v37 = vadd.f32 %v6485_v1, %v6484_v28  ;;  %v6487_v27 = vpop.f32.mrb[66].mxu1  ;;  %v8753_v61 = vld [vmem:[#allocation13_spill] sm:$0xff]  ;;  %v8754_v28 = vld [vmem:[#allocation15_spill] sm:$0xff] }
 0x188   : > { %v6488_v52 = vpop.f32.mrb[67].mxu1  ;;  %6673 = vmatmul.mubr.bf16.gmra.mrb[156].mxu0 %v5885_v59 }
 0x189   : > { %v4235_v49 = vadd.f32 %v6377_v58, %v8748_v7  ;;  %v6489_v6 = vadd.f32 %v6488_v52, %v6487_v27  ;;  %v8390_v22 = vadd.f32 %v6486_v37, %v4232_v11 }
 0x18b   : > { %v6378_v0 = vpop.f32.mrb[68].mxu0  ;;  %v8392_v42 = vadd.f32 %v6489_v6, %v4235_v49 }
 0x18c   : > { %v6379_v25 = vpop.f32.mrb[69].mxu0  ;;  %6721 = vmatmul.mubr.bf16.gmra.mrb[156].mxu1 %v8100_v57 }
 0x18d   : > { %v6380_v54 = vadd.f32 %v6379_v25, %v6378_v0  ;;  %v6381_v46 = vpop.f32.mrb[70].mxu0  ;;  %v6490_v56 = vpop.f32.mrb[68].mxu1 }
 0x18e   : > { %v6382_v4 = vpop.f32.mrb[71].mxu0  ;;  %v6491_v43 = vpop.f32.mrb[69].mxu1 }
 0x18f   : > { %v4240_v51 = vadd.f32 %v6380_v54, %v8751_v47  ;;  %v6383_v33 = vadd.f32 %v6382_v4, %v6381_v46  ;;  %v6492_v50 = vadd.f32 %v6491_v43, %v6490_v56  ;;  %v6493_v15 = vpop.f32.mrb[70].mxu1  ;;  %v8756_v46 = vld [vmem:[#allocation18_spill] sm:$0xff] }
 0x190   : > { %v6494_v45 = vpop.f32.mrb[71].mxu1 }
 0x191   : > { %v4243_v26 = vadd.f32 %v6383_v33, %v8752_v12  ;;  %v6495_v21 = vadd.f32 %v6494_v45, %v6493_v15  ;;  %v8399_v10 = vadd.f32 %v6492_v50, %v4240_v51 }
 0x193   : > { %v6384_v63 = vpop.f32.mrb[72].mxu0  ;;  %v8401_v9 = vadd.f32 %v6495_v21, %v4243_v26 }
 0x194   : > { %v6385_v44 = vpop.f32.mrb[73].mxu0 }
 0x195   : > { %v6386_v32 = vadd.f32 %v6385_v44, %v6384_v63  ;;  %v6387_v23 = vpop.f32.mrb[74].mxu0  ;;  %v8757_v44 = vld [vmem:[#allocation20_spill] sm:$0xff] }
 0x196   : > { %v6388_v39 = vpop.f32.mrb[75].mxu0 }
 0x197   : > { %v4248_v8 = vadd.f32 %v6386_v32, %v8753_v61  ;;  %v6389_v60 = vadd.f32 %v6388_v39, %v6387_v23  ;;  %v6496_v11 = vpop.f32.mrb[72].mxu1 }
 0x198   : > { %v6497_v1 = vpop.f32.mrb[73].mxu1 }
 0x199   : > { %v4251_v58 = vadd.f32 %v6389_v60, %v8754_v28  ;;  %v6498_v53 = vadd.f32 %v6497_v1, %v6496_v11  ;;  %v6499_v17 = vpop.f32.mrb[74].mxu1 }
 0x19a   : > { %v6500_v57 = vpop.f32.mrb[75].mxu1 }
 0x19b   : > { %v6501_v7 = vadd.f32 %v6500_v57, %v6499_v17  ;;  %v8405_v49 = vadd.f32 %v6498_v53, %v4248_v8  ;;  %v6390_v37 = vpop.f32.mrb[76].mxu0  ;;  %v8758_v8 = vld [vmem:[#allocation21_spill] sm:$0xff] }
 0x19c   : > { %v6391_v27 = vpop.f32.mrb[77].mxu0 }
 0x19d   : > { %v8407_v52 = vadd.f32 %v6501_v7, %v4251_v58  ;;  %v6392_v6 = vadd.f32 %v6391_v27, %v6390_v37  ;;  %v6393_v59 = vpop.f32.mrb[78].mxu0 }
 0x19e   : > { %v6394_v0 = vpop.f32.mrb[79].mxu0 }
 0x19f   : > { %v4256_v25 = vadd.f32 %v6392_v6, %v8755_v2  ;;  %v6395_v20 = vadd.f32 %v6394_v0, %v6393_v59  ;;  %v6502_v54 = vpop.f32.mrb[76].mxu1  ;;  %v8759_v59 = vld [vmem:[#allocation22_spill] sm:$0xff] }
 0x1a0   : > { %v6503_v47 = vpop.f32.mrb[77].mxu1 }
 0x1a1   : > { %v4259_v4 = vadd.f32 %v6395_v20, %v8756_v46  ;;  %v6504_v51 = vadd.f32 %v6503_v47, %v6502_v54  ;;  %v6505_v33 = vpop.f32.mrb[78].mxu1  ;;  %v8760_v20 = vld [vmem:[#allocation23_spill] sm:$0xff] }
 0x1a2   : > { %v6506_v56 = vpop.f32.mrb[79].mxu1 }
 0x1a3   : > { %v6507_v12 = vadd.f32 %v6506_v56, %v6505_v33  ;;  %v8411_v26 = vadd.f32 %v6504_v51, %v4256_v25  ;;  %v6396_v43 = vpop.f32.mrb[80].mxu0 }
 0x1a4   : > { %v6397_v15 = vpop.f32.mrb[81].mxu0 }
 0x1a5   : > { %v8413_v50 = vadd.f32 %v6507_v12, %v4259_v4  ;;  %v6398_v45 = vadd.f32 %v6397_v15, %v6396_v43  ;;  %v6399_v21 = vpop.f32.mrb[82].mxu0 }
 0x1a6   : > { %v6400_v63 = vpop.f32.mrb[83].mxu0 }
 0x1a7   : > { %v4264_v32 = vadd.f32 %v6398_v45, %v8757_v44  ;;  %v6508_v23 = vpop.f32.mrb[80].mxu1  ;;  %v6401_v39 = vadd.f32 %v6400_v63, %v6399_v21 }
 0x1a8   : > { %v6509_v61 = vpop.f32.mrb[81].mxu1 }
 0x1a9   : > { %v4267_v60 = vadd.f32 %v6401_v39, %v8758_v8  ;;  %v6510_v11 = vadd.f32 %v6509_v61, %v6508_v23  ;;  %v6511_v28 = vpop.f32.mrb[82].mxu1 }
 0x1aa   : > { %v6512_v58 = vpop.f32.mrb[83].mxu1 }
 0x1ab   : > { %v6513_v1 = vadd.f32 %v6512_v58, %v6511_v28  ;;  %v8417_v53 = vadd.f32 %v6510_v11, %v4264_v32  ;;  %v6402_v17 = vpop.f32.mrb[84].mxu0 }
 0x1ac   : > { %v6403_v7 = vpop.f32.mrb[85].mxu0 }
 0x1ad   : > { %v8419_v57 = vadd.f32 %v6513_v1, %v4267_v60  ;;  %v6404_v37 = vadd.f32 %v6403_v7, %v6402_v17  ;;  %v6405_v27 = vpop.f32.mrb[86].mxu0 }
 0x1ae   : > { %v6406_v6 = vpop.f32.mrb[87].mxu0 }
 0x1af   : > { %v4272_v0 = vadd.f32 %v6404_v37, %v8759_v59  ;;  %v6407_v2 = vadd.f32 %v6406_v6, %v6405_v27 }
 0x1b0   : > { %v6514_v25 = vpop.f32.mrb[84].mxu1 }
 0x1b1   : > { %v4275_v54 = vadd.f32 %v6407_v2, %v8760_v20  ;;  %v6515_v46 = vpop.f32.mrb[85].mxu1 }
 0x1b2   : > { %v6516_v4 = vadd.f32 %v6515_v46, %v6514_v25  ;;  %v6517_v47 = vpop.f32.mrb[86].mxu1 }
 0x1b3   : > { %v6518_v51 = vpop.f32.mrb[87].mxu1 }
 0x1b4   : > { %v6519_v33 = vadd.f32 %v6518_v51, %v6517_v47  ;;  %v8423_v56 = vadd.f32 %v6516_v4, %v4272_v0 }
 0x1b6   : > { %v6408_v12 = vpop.f32.mrb[88].mxu0  ;;  %v8425_v43 = vadd.f32 %v6519_v33, %v4275_v54 }
 0x1b7   : > { %v6409_v15 = vpop.f32.mrb[89].mxu0 }
 0x1b8   : > { %v6410_v45 = vadd.f32 %v6409_v15, %v6408_v12  ;;  %v6411_v21 = vpop.f32.mrb[90].mxu0 }
 0x1b9   : > { %v6412_v63 = vpop.f32.mrb[91].mxu0 }
 0x1ba   : > { %v4280_v44 = vadd.f32 %v6410_v45, %v8159_v34  ;;  %v6413_v23 = vadd.f32 %v6412_v63, %v6411_v21 }
 0x1bb   : > { %v6520_v32 = vpop.f32.mrb[88].mxu1 }
 0x1bc   : > { %v6521_v39 = vpop.f32.mrb[89].mxu1  ;;  %v4283_v61 = vadd.f32 %v6413_v23, %v8166_v30 }
 0x1bd   : > { %v6522_v8 = vadd.f32 %v6521_v39, %v6520_v32  ;;  %v6523_v60 = vpop.f32.mrb[90].mxu1 }
 0x1be   : > { %v6524_v11 = vpop.f32.mrb[91].mxu1 }
 0x1bf   : > { %v6525_v28 = vadd.f32 %v6524_v11, %v6523_v60  ;;  %v8429_v58 = vadd.f32 %v6522_v8, %v4280_v44 }
 0x1c1   : > { %v8431_v1 = vadd.f32 %v6525_v28, %v4283_v61  ;;  %v6414_v17 = vpop.f32.mrb[92].mxu0 }
 0x1c2   : > { %v6415_v7 = vpop.f32.mrb[93].mxu0 }
 0x1c3   : > { %v6416_v37 = vadd.f32 %v6415_v7, %v6414_v17  ;;  %v6417_v27 = vpop.f32.mrb[94].mxu0 }
 0x1c4   : > { %v6418_v59 = vpop.f32.mrb[95].mxu0 }
 0x1c5   : > { %v6526_v6 = vpop.f32.mrb[92].mxu1  ;;  %v4288_v34 = vadd.f32 %v6416_v37, %v8187_v5  ;;  %v6419_v0 = vadd.f32 %v6418_v59, %v6417_v27 }
 0x1c6   : > { %v6527_v2 = vpop.f32.mrb[93].mxu1 }
 0x1c7   : > { %v6528_v25 = vadd.f32 %v6527_v2, %v6526_v6  ;;  %v6529_v30 = vpop.f32.mrb[94].mxu1  ;;  %v4291_v20 = vadd.f32 %v6419_v0, %v8194_v35 }
 0x1c8   : > { %v6530_v54 = vpop.f32.mrb[95].mxu1 }
 0x1c9   : > { %v6531_v46 = vadd.f32 %v6530_v54, %v6529_v30  ;;  %v8435_v4 = vadd.f32 %v6528_v25, %v4288_v34  ;;  %v6420_v47 = vpop.f32.mrb[96].mxu0 }
 0x1ca   : > { %v6421_v51 = vpop.f32.mrb[97].mxu0 }
 0x1cb   : > { %v8437_v33 = vadd.f32 %v6531_v46, %v4291_v20  ;;  %v6422_v12 = vadd.f32 %v6421_v51, %v6420_v47  ;;  %v6423_v15 = vpop.f32.mrb[98].mxu0 }
 0x1cc   : > { %v6424_v45 = vpop.f32.mrb[99].mxu0 }
 0x1cd   : > { %v4296_v21 = vadd.f32 %v6422_v12, %v8226_v3  ;;  %v6425_v5 = vadd.f32 %v6424_v45, %v6423_v15 }
 0x1cf   : > { %v6532_v63 = vpop.f32.mrb[96].mxu1  ;;  %v4299_v44 = vadd.f32 %v6425_v5, %v8230_v13 }
 0x1d0   : > { %v6533_v32 = vpop.f32.mrb[97].mxu1 }
 0x1d1   : > { %v6534_v23 = vadd.f32 %v6533_v32, %v6532_v63  ;;  %v6535_v35 = vpop.f32.mrb[98].mxu1 }
 0x1d2   : > { %v6536_v39 = vpop.f32.mrb[99].mxu1 }
 0x1d3   : > { %v6537_v61 = vadd.f32 %v6536_v39, %v6535_v35  ;;  %v8441_v8 = vadd.f32 %v6534_v23, %v4296_v21 }
 0x1d4   : > { %v6426_v60 = vpop.f32.mrb[100].mxu0 }
 0x1d5   : > { %v8443_v11 = vadd.f32 %v6537_v61, %v4299_v44  ;;  %v6427_v28 = vpop.f32.mrb[101].mxu0 }
 0x1d6   : > { %v6428_v17 = vadd.f32 %v6427_v28, %v6426_v60  ;;  %v6429_v7 = vpop.f32.mrb[102].mxu0 }
 0x1d7   : > { %v6430_v37 = vpop.f32.mrb[103].mxu0 }
 0x1d8   : > { %v4304_v3 = vadd.f32 %v6428_v17, %v8258_v31  ;;  %v6431_v27 = vadd.f32 %v6430_v37, %v6429_v7 }
 0x1d9   : > { %v6538_v6 = vpop.f32.mrb[100].mxu1 }
 0x1da   : > { %v4307_v13 = vadd.f32 %v6431_v27, %v8265_v29  ;;  %v6539_v59 = vpop.f32.mrb[101].mxu1 }
 0x1db   : > { %v6540_v34 = vadd.f32 %v6539_v59, %v6538_v6  ;;  %v6541_v0 = vpop.f32.mrb[102].mxu1 }
 0x1dc   : > { %v6542_v2 = vpop.f32.mrb[103].mxu1 }
 0x1dd   : > { %v6543_v25 = vadd.f32 %v6542_v2, %v6541_v0  ;;  %v8447_v30 = vadd.f32 %v6540_v34, %v4304_v3 }
 0x1de   : > { %v6432_v20 = vpop.f32.mrb[104].mxu0 }
 0x1df   : > { %v6433_v54 = vpop.f32.mrb[105].mxu0  ;;  %v8449_v46 = vadd.f32 %v6543_v25, %v4307_v13 }
 0x1e0   : > { %v6434_v47 = vadd.f32 %v6433_v54, %v6432_v20  ;;  %v6435_v51 = vpop.f32.mrb[106].mxu0 }
 0x1e1   : > { %v6436_v12 = vpop.f32.mrb[107].mxu0 }
 0x1e2   : > { %v4312_v31 = vadd.f32 %v6434_v47, %v8283_v55  ;;  %v6437_v15 = vadd.f32 %v6436_v12, %v6435_v51 }
 0x1e3   : > { %v6544_v45 = vpop.f32.mrb[104].mxu1 }
 0x1e4   : > { %v4315_v29 = vadd.f32 %v6437_v15, %v8290_v62  ;;  %v6545_v21 = vpop.f32.mrb[105].mxu1 }
 0x1e5   : > { %v6546_v5 = vadd.f32 %v6545_v21, %v6544_v45  ;;  %v6547_v63 = vpop.f32.mrb[106].mxu1 }
 0x1e6   : > { %v6548_v44 = vpop.f32.mrb[107].mxu1 }
 0x1e7   : > { %v6549_v32 = vadd.f32 %v6548_v44, %v6547_v63  ;;  %v8453_v23 = vadd.f32 %v6546_v5, %v4312_v31 }
 0x1e9   : > { %v8455_v35 = vadd.f32 %v6549_v32, %v4315_v29 }
 0x1ea   : > { %v6438_v39 = vpop.f32.mrb[108].mxu0 }
 0x1eb   : > { %v6439_v61 = vpop.f32.mrb[109].mxu0 }
 0x1ec   : > { %v6440_v60 = vadd.f32 %v6439_v61, %v6438_v39  ;;  %v6441_v28 = vpop.f32.mrb[110].mxu0 }
 0x1ed   : > { %v6442_v17 = vpop.f32.mrb[111].mxu0 }
 0x1ee   : > { %v4320_v55 = vadd.f32 %v6440_v60, %v8309_v18  ;;  %v6443_v7 = vadd.f32 %v6442_v17, %v6441_v28 }
 0x1ef   : > { %v6550_v37 = vpop.f32.mrb[108].mxu1 }
 0x1f0   : > { %v4323_v62 = vadd.f32 %v6443_v7, %v8313_v48  ;;  %v6551_v3 = vpop.f32.mrb[109].mxu1 }
 0x1f1   : > { %v6552_v27 = vadd.f32 %v6551_v3, %v6550_v37  ;;  %v6553_v6 = vpop.f32.mrb[110].mxu1 }
 0x1f2   : > { %v6554_v13 = vpop.f32.mrb[111].mxu1 }
 0x1f3   : > { %v6555_v59 = vadd.f32 %v6554_v13, %v6553_v6  ;;  %v8459_v34 = vadd.f32 %v6552_v27, %v4320_v55 }
 0x1f5   : > { %v8461_v0 = vadd.f32 %v6555_v59, %v4323_v62 }
 0x1f6   : > { %v6444_v2 = vpop.f32.mrb[112].mxu0 }
 0x1f7   : > { %v6445_v25 = vpop.f32.mrb[113].mxu0 }
 0x1f8   : > { %v6446_v20 = vadd.f32 %v6445_v25, %v6444_v2  ;;  %v6447_v54 = vpop.f32.mrb[114].mxu0 }
 0x1f9   : > { %v6448_v47 = vpop.f32.mrb[115].mxu0 }
 0x1fa   : > { %v4328_v18 = vadd.f32 %v6446_v20, %v8335_v19  ;;  %v6449_v12 = vadd.f32 %v6448_v47, %v6447_v54 }
 0x1fb   : > { %v6556_v51 = vpop.f32.mrb[112].mxu1 }
 0x1fc   : > { %v6557_v31 = vpop.f32.mrb[113].mxu1  ;;  %v4331_v48 = vadd.f32 %v6449_v12, %v8338_v40 }
 0x1fd   : > { %v6558_v15 = vadd.f32 %v6557_v31, %v6556_v51  ;;  %v6559_v45 = vpop.f32.mrb[114].mxu1 }
 0x1fe   : > { %v6560_v29 = vpop.f32.mrb[115].mxu1 }
 0x1ff   : > { %v6561_v21 = vadd.f32 %v6560_v29, %v6559_v45  ;;  %v8465_v5 = vadd.f32 %v6558_v15, %v4328_v18 }
 0x201   : > { %v8467_v63 = vadd.f32 %v6561_v21, %v4331_v48 }
 0x202   : > { %v6450_v44 = vpop.f32.mrb[116].mxu0 }
 0x203   : > { %v6451_v32 = vpop.f32.mrb[117].mxu0 }
 0x204   : > { %v6452_v39 = vadd.f32 %v6451_v32, %v6450_v44  ;;  %v6453_v61 = vpop.f32.mrb[118].mxu0 }
 0x205   : > { %v6454_v60 = vpop.f32.mrb[119].mxu0 }
 0x206   : > { %v4336_v19 = vadd.f32 %v6452_v39, %v8345_v16  ;;  %v6562_v28 = vpop.f32.mrb[116].mxu1  ;;  %v6455_v17 = vadd.f32 %v6454_v60, %v6453_v61 }
 0x207   : > { %v6563_v55 = vpop.f32.mrb[117].mxu1 }
 0x208   : > { %v4339_v40 = vadd.f32 %v6455_v17, %v8349_v14  ;;  %v6564_v7 = vadd.f32 %v6563_v55, %v6562_v28  ;;  %v6565_v37 = vpop.f32.mrb[118].mxu1 }
 0x209   : > { %v6566_v62 = vpop.f32.mrb[119].mxu1 }
 0x20a   : > { %v6567_v3 = vadd.f32 %v6566_v62, %v6565_v37  ;;  %v8471_v27 = vadd.f32 %v6564_v7, %v4336_v19 }
 0x20c   : > { %v8473_v6 = vadd.f32 %v6567_v3, %v4339_v40  ;;  %v8486_v40 = vld [vmem:[%s8700_s2] ss:$0 sm:$0xff] }
 0x20e   : > { %v6456_v13 = vpop.f32.mrb[120].mxu0 }
 0x20f   : > { %v6457_v59 = vpop.f32.mrb[121].mxu0 }
 0x210   : > { %v6458_v2 = vadd.f32 %v6457_v59, %v6456_v13  ;;  %v6459_v25 = vpop.f32.mrb[122].mxu0 }
 0x211   : > { %v6460_v20 = vpop.f32.mrb[123].mxu0 }
 0x212   : > { %v4344_v16 = vadd.f32 %v6458_v2, %v8355_v24  ;;  %v6461_v54 = vadd.f32 %v6460_v20, %v6459_v25  ;;  %v6568_v47 = vpop.f32.mrb[120].mxu1 }
 0x213   : > { %v6569_v14 = vpop.f32.mrb[121].mxu1 }
 0x214   : > { %v4347_v18 = vadd.f32 %v6461_v54, %v8363_v38  ;;  %v6570_v51 = vadd.f32 %v6569_v14, %v6568_v47  ;;  %v6571_v12 = vpop.f32.mrb[122].mxu1 }
 0x215   : > { %v6572_v31 = vpop.f32.mrb[123].mxu1 }
 0x216   : > { %v6573_v48 = vadd.f32 %v6572_v31, %v6571_v12  ;;  %v8477_v15 = vadd.f32 %v6570_v51, %v4344_v16 }
 0x218   : > { %v8479_v29 = vadd.f32 %v6573_v48, %v4347_v18 }
 0x219   : > { %v6462_v45 = vpop.f32.mrb[124].mxu0 }
 0x21a   : > { %v6463_v21 = vpop.f32.mrb[125].mxu0 }
 0x21b   : > { %v6464_v44 = vadd.f32 %v6463_v21, %v6462_v45  ;;  %v6465_v32 = vpop.f32.mrb[126].mxu0 }
 0x21c   : > { %v6466_v39 = vpop.f32.mrb[127].mxu0 }
 0x21d   : > { %v4352_v24 = vadd.f32 %v6464_v44, %v8367_v41  ;;  %v6467_v61 = vadd.f32 %v6466_v39, %v6465_v32  ;;  %v8492_v41 = vld [vmem:[%s8701_s3] ss:$0 sm:$0xff] }
 0x21f   : > { %v6574_v60 = vpop.f32.mrb[124].mxu1  ;;  %v4355_v38 = vadd.f32 %v6467_v61, %v8370_v36 }
 0x220   : > { %v6575_v19 = vpop.f32.mrb[125].mxu1 }
 0x221   : > { %v6576_v28 = vadd.f32 %v6575_v19, %v6574_v60  ;;  %v6577_v17 = vpop.f32.mrb[126].mxu1  ;;  %v6646_v55 = vpop.f32.mrb[128].mxu0 }
 0x222   : > { %v6578_v7 = vpop.f32.mrb[127].mxu1  ;;  %v4562_v37 = vadd.f32 %v6646_v55, %v8399_v10  ;;  %v4553_v62 = vpop.f32.mrb[129].mxu0  ;;  %v8503_v10 = vld [vmem:[%s8703_s5] ss:$0 sm:$0xff] }
 0x223   : > { %v6579_v3 = vadd.f32 %v6578_v7, %v6577_v17  ;;  %v4554_v36 = vadd.f32 %v4553_v62, %v8390_v22  ;;  %v6647_v13 = vpop.f32.mrb[130].mxu0  ;;  %v8495_v59 = vadd.f32 %v6576_v28, %v4352_v24 }
 0x224   : > { %v4689_v2 = vmul.f32 %v8486_v40, %v4562_v37  ;;  %v4565_v25 = vadd.f32 %v6647_v13, %v8401_v9  ;;  %v4556_v20 = vpop.f32.mrb[131].mxu0  ;;  %v8514_v9 = vld [vmem:[%s8704_s6] ss:$0 sm:$0xff] }
 0x225   : > { %v4687_v16 = vmul.f32 %v8486_v40, %v4554_v36  ;;  %v4557_v54 = vadd.f32 %v4556_v20, %v8392_v42  ;;  %v8506_v47 = vadd.f32 %v6579_v3, %v4355_v38 }
 0x226   : > { %v4728_v22 = vadd.f32 %v8492_v41, %v4689_v2  ;;  %v4690_v18 = vmul.f32 %v8486_v40, %v4565_v25 }
 0x227   : > { %v4726_v14 = vadd.f32 %v8492_v41, %v4687_v16  ;;  %v6694_v51 = vpop.f32.mrb[128].mxu1  ;;  %v4688_v12 = vmul.f32 %v8486_v40, %v4557_v54 }
 0x228   : > { %v4760_v31 = vmax.f32 %v4728_v22, 0.0  ;;  %v4729_v48 = vadd.f32 %v8492_v41, %v4690_v18  ;;  %v5040_v42 = vmul.f32 %v6694_v51, %v8503_v10  ;;  %v4904_v45 = vpop.f32.mrb[129].mxu1 }
 0x229   : > { %v4758_v21 = vmax.f32 %v4726_v14, 0.0  ;;  %v4727_v44 = vadd.f32 %v8492_v41, %v4688_v12  ;;  %v5038_v32 = vmul.f32 %v8503_v10, %v4904_v45  ;;  %v6695_v39 = vpop.f32.mrb[130].mxu1  ;;  %v6650_v24 = vpop.f32.mrb[132].mxu0 }
 0x22a   : > { %v4761_v61 = vmax.f32 %v4729_v48, 0.0  ;;  %v5079_v60 = vadd.f32 %v8514_v9, %v5040_v42  ;;  %v5041_v38 = vmul.f32 %v6695_v39, %v8503_v10  ;;  %v4907_v19 = vpop.f32.mrb[131].mxu1  ;;  %v4578_v28 = vadd.f32 %v6650_v24, %v8411_v26  ;;  %v4569_v17 = vpop.f32.mrb[133].mxu0 }
 0x22b   : > { %v4759_v55 = vmax.f32 %v4727_v44, 0.0  ;;  %v5077_v7 = vadd.f32 %v8514_v9, %v5038_v32  ;;  %v5039_v37 = vmul.f32 %v8503_v10, %v4907_v19  ;;  %v4570_v62 = vadd.f32 %v4569_v17, %v8405_v49  ;;  %v6651_v3 = vpop.f32.mrb[134].mxu0 }
 0x22c   : > { %v5111_v36 = vadd.f32 %v5079_v60, %v4760_v31  ;;  %v5080_v13 = vadd.f32 %v8514_v9, %v5041_v38  ;;  %v4693_v2 = vmul.f32 %v8486_v40, %v4578_v28  ;;  %v4581_v25 = vadd.f32 %v6651_v3, %v8413_v50  ;;  %v4572_v20 = vpop.f32.mrb[135].mxu0 }
 0x22d   : > { %v5109_v16 = vadd.f32 %v5077_v7, %v4758_v21  ;;  %v5078_v26 = vadd.f32 %v8514_v9, %v5039_v37  ;;  %v4691_v54 = vmul.f32 %v8486_v40, %v4570_v62  ;;  %v4573_v22 = vadd.f32 %v4572_v20, %v8407_v52 }
 0x22e   : > { %v5143_v18 = vmax.f32 %v5111_v36, 0.0  ;;  %v5112_v14 = vadd.f32 %v5080_v13, %v4761_v61  ;;  %v4732_v49 = vadd.f32 %v8492_v41, %v4693_v2  ;;  %v4694_v51 = vmul.f32 %v8486_v40, %v4581_v25 }
 0x22f   : > { %v5141_v12 = vmax.f32 %v5109_v16, 0.0  ;;  %v5110_v31 = vadd.f32 %v5078_v26, %v4759_v55  ;;  %v4730_v48 = vadd.f32 %v8492_v41, %v4691_v54  ;;  %v6698_v50 = vpop.f32.mrb[132].mxu1  ;;  %v4692_v42 = vmul.f32 %v8486_v40, %v4573_v22 }
 0x230   : > { %v5144_v45 = vmax.f32 %v5112_v14, 0.0  ;;  %v4764_v21 = vmax.f32 %v4732_v49, 0.0  ;;  %v4733_v44 = vadd.f32 %v8492_v41, %v4694_v51  ;;  %v5044_v52 = vmul.f32 %v6698_v50, %v8503_v10  ;;  %v4920_v32 = vpop.f32.mrb[133].mxu1 }
 0x231   : > { %v5142_v39 = vmax.f32 %v5110_v31, 0.0  ;;  %v4762_v24 = vmax.f32 %v4730_v48, 0.0  ;;  %v4731_v61 = vadd.f32 %v8492_v41, %v4692_v42  ;;  %v5042_v60 = vmul.f32 %v8503_v10, %v4920_v32  ;;  %v6699_v38 = vpop.f32.mrb[134].mxu1  ;;  %v6654_v19 = vpop.f32.mrb[136].mxu0 }
 0x232   : > { %v6045_v28 = vpack.c.bf16 %v5144_v45, %v5143_v18  ;;  %v4765_v17 = vmax.f32 %v4733_v44, 0.0  ;;  %v5083_v55 = vadd.f32 %v8514_v9, %v5044_v52  ;;  %v5045_v7 = vmul.f32 %v6699_v38, %v8503_v10  ;;  %v4923_v37 = vpop.f32.mrb[135].mxu1  ;;  %v4585_v62 = vpop.f32.mrb[137].mxu0 }
 0x233   : > { %v6040_v3 = vpack.c.bf16 %v5142_v39, %v5141_v12  ;;  %v4763_v36 = vmax.f32 %v4731_v61, 0.0  ;;  %v5081_v13 = vadd.f32 %v8514_v9, %v5042_v60  ;;  %v5043_v2 = vmul.f32 %v8503_v10, %v4923_v37  ;;  %v6655_v25 = vpop.f32.mrb[138].mxu0 }
 0x234   : > { %6117 = vst [vmem:[%s8543_s13 + $0x8] sm:$0xff] %v6045_v28   ;;  %v5115_v20 = vadd.f32 %v5083_v55, %v4764_v21  ;;  %v5084_v16 = vadd.f32 %v8514_v9, %v5045_v7  ;;  %v4594_v26 = vadd.f32 %v6654_v19, %v8423_v56  ;;  %v4586_v54 = vadd.f32 %v4585_v62, %v8417_v53  ;;  %v4588_v22 = vpop.f32.mrb[139].mxu0 }
 0x235   : > { %6041 = vst [vmem:[%s8543_s13] sm:$0xff] %v6040_v3   ;;  %v5113_v18 = vadd.f32 %v5081_v13, %v4762_v24  ;;  %v5082_v14 = vadd.f32 %v8514_v9, %v5043_v2  ;;  %v4597_v49 = vadd.f32 %v6655_v25, %v8425_v43  ;;  %v4589_v51 = vadd.f32 %v4588_v22, %v8419_v57 }
 0x236   : > { %v5147_v12 = vmax.f32 %v5115_v20, 0.0  ;;  %v5116_v31 = vadd.f32 %v5084_v16, %v4765_v17  ;;  %v4697_v48 = vmul.f32 %v8486_v40, %v4594_v26  ;;  %v4695_v50 = vmul.f32 %v8486_v40, %v4586_v54 }
 0x237   : > { %v5145_v42 = vmax.f32 %v5113_v18, 0.0  ;;  %v5114_v45 = vadd.f32 %v5082_v14, %v4763_v36  ;;  %v4698_v56 = vmul.f32 %v8486_v40, %v4597_v49  ;;  %v6702_v53 = vpop.f32.mrb[136].mxu1  ;;  %v4696_v21 = vmul.f32 %v8486_v40, %v4589_v51 }
 0x238   : > { %v5148_v44 = vmax.f32 %v5116_v31, 0.0  ;;  %v4736_v52 = vadd.f32 %v8492_v41, %v4697_v48  ;;  %v4734_v43 = vadd.f32 %v8492_v41, %v4695_v50  ;;  %v5048_v57 = vmul.f32 %v6702_v53, %v8503_v10  ;;  %v4936_v32 = vpop.f32.mrb[137].mxu1 }
 0x239   : > { %v5146_v39 = vmax.f32 %v5114_v45, 0.0  ;;  %v4737_v24 = vadd.f32 %v8492_v41, %v4698_v56  ;;  %v4735_v61 = vadd.f32 %v8492_v41, %v4696_v21  ;;  %v5046_v60 = vmul.f32 %v8503_v10, %v4936_v32  ;;  %v6703_v38 = vpop.f32.mrb[138].mxu1  ;;  %v6658_v19 = vpop.f32.mrb[140].mxu0 }
 0x23a   : > { %v6055_v28 = vpack.c.bf16 %v5148_v44, %v5147_v12  ;;  %v4768_v17 = vmax.f32 %v4736_v52, 0.0  ;;  %v4766_v55 = vmax.f32 %v4734_v43, 0.0  ;;  %v5087_v7 = vadd.f32 %v8514_v9, %v5048_v57  ;;  %v4939_v37 = vpop.f32.mrb[139].mxu1  ;;  %v4601_v62 = vpop.f32.mrb[141].mxu0 }
 0x23b   : > { %v6050_v3 = vpack.c.bf16 %v5146_v39, %v5145_v42  ;;  %v4769_v36 = vmax.f32 %v4737_v24, 0.0  ;;  %v4767_v13 = vmax.f32 %v4735_v61, 0.0  ;;  %v5085_v2 = vadd.f32 %v8514_v9, %v5046_v60  ;;  %v6659_v25 = vpop.f32.mrb[142].mxu0 }
 0x23c   : > { %6119 = vst [vmem:[%s8543_s13 + $0x18] sm:$0xff] %v6055_v28   ;;  %v5119_v20 = vadd.f32 %v5087_v7, %v4768_v17  ;;  %v5049_v16 = vmul.f32 %v6703_v38, %v8503_v10  ;;  %v5047_v26 = vmul.f32 %v8503_v10, %v4939_v37  ;;  %v4610_v54 = vadd.f32 %v6658_v19, %v8435_v4  ;;  %v4604_v22 = vpop.f32.mrb[143].mxu0 }
 0x23d   : > { %6118 = vst [vmem:[%s8543_s13 + $0x10] sm:$0xff] %v6050_v3   ;;  %v5117_v18 = vadd.f32 %v5085_v2, %v4766_v55  ;;  %v4602_v14 = vadd.f32 %v4601_v62, %v8429_v58  ;;  %v4613_v49 = vadd.f32 %v6659_v25, %v8437_v33  ;;  %v4605_v51 = vadd.f32 %v4604_v22, %v8431_v1 }
 0x23e   : > { %v5151_v12 = vmax.f32 %v5119_v20, 0.0  ;;  %v5088_v31 = vadd.f32 %v8514_v9, %v5049_v16  ;;  %v5086_v48 = vadd.f32 %v8514_v9, %v5047_v26  ;;  %v4701_v50 = vmul.f32 %v8486_v40, %v4610_v54 }
 0x23f   : > { %v5149_v42 = vmax.f32 %v5117_v18, 0.0  ;;  %v4699_v45 = vmul.f32 %v8486_v40, %v4602_v14  ;;  %v4702_v4 = vmul.f32 %v8486_v40, %v4613_v49  ;;  %v6706_v56 = vpop.f32.mrb[140].mxu1  ;;  %v4700_v53 = vmul.f32 %v8486_v40, %v4605_v51 }
 0x240   : > { %v5120_v58 = vadd.f32 %v5088_v31, %v4769_v36  ;;  %v5118_v21 = vadd.f32 %v5086_v48, %v4767_v13  ;;  %v4740_v33 = vadd.f32 %v8492_v41, %v4701_v50  ;;  %v5052_v1 = vmul.f32 %v6706_v56, %v8503_v10  ;;  %v4952_v44 = vpop.f32.mrb[141].mxu1 }
 0x241   : > { %v4738_v52 = vadd.f32 %v8492_v41, %v4699_v45  ;;  %v4741_v43 = vadd.f32 %v8492_v41, %v4702_v4  ;;  %v4739_v57 = vadd.f32 %v8492_v41, %v4700_v53  ;;  %v5050_v32 = vmul.f32 %v8503_v10, %v4952_v44  ;;  %v6707_v39 = vpop.f32.mrb[142].mxu1  ;;  %v6662_v24 = vpop.f32.mrb[144].mxu0 }
 0x242   : > { %v5152_v61 = vmax.f32 %v5120_v58, 0.0  ;;  %v5150_v60 = vmax.f32 %v5118_v21, 0.0  ;;  %v4772_v38 = vmax.f32 %v4740_v33, 0.0  ;;  %v5091_v19 = vadd.f32 %v8514_v9, %v5052_v1  ;;  %v4955_v28 = vpop.f32.mrb[143].mxu1  ;;  %v4617_v17 = vpop.f32.mrb[145].mxu0 }
 0x243   : > { %v4770_v55 = vmax.f32 %v4738_v52, 0.0  ;;  %v4773_v7 = vmax.f32 %v4741_v43, 0.0  ;;  %v4771_v37 = vmax.f32 %v4739_v57, 0.0  ;;  %v5089_v62 = vadd.f32 %v8514_v9, %v5050_v32  ;;  %v6663_v3 = vpop.f32.mrb[146].mxu0 }
 0x244   : > { %v6065_v36 = vpack.c.bf16 %v5152_v61, %v5151_v12  ;;  %v6060_v13 = vpack.c.bf16 %v5150_v60, %v5149_v42  ;;  %v5123_v2 = vadd.f32 %v5091_v19, %v4772_v38  ;;  %v5053_v25 = vmul.f32 %v6707_v39, %v8503_v10  ;;  %v4620_v20 = vpop.f32.mrb[147].mxu0 }
 0x245   : > { %v5121_v16 = vadd.f32 %v5089_v62, %v4770_v55  ;;  %v5051_v26 = vmul.f32 %v8503_v10, %v4955_v28  ;;  %v4626_v54 = vadd.f32 %v6662_v24, %v8447_v30  ;;  %v4618_v22 = vadd.f32 %v4617_v17, %v8441_v8 }
 0x246   : > { %6121 = vst [vmem:[%s8543_s13 + $0x28] sm:$0xff] %v6065_v36   ;;  %6120 = vst [vmem:[%s8543_s13 + $0x20] sm:$0xff] %v6060_v13   ;;  %v5155_v18 = vmax.f32 %v5123_v2, 0.0  ;;  %v5092_v14 = vadd.f32 %v8514_v9, %v5053_v25  ;;  %v4629_v49 = vadd.f32 %v6663_v3, %v8449_v46  ;;  %v4621_v51 = vadd.f32 %v4620_v20, %v8443_v11 }
 0x247   : > { %v5153_v12 = vmax.f32 %v5121_v16, 0.0  ;;  %v5090_v31 = vadd.f32 %v8514_v9, %v5051_v26  ;;  %v4705_v48 = vmul.f32 %v8486_v40, %v4626_v54  ;;  %v4703_v50 = vmul.f32 %v8486_v40, %v4618_v22  ;;  %v6710_v42 = vpop.f32.mrb[144].mxu1 }
 0x248   : > { %v5124_v30 = vadd.f32 %v5092_v14, %v4773_v7  ;;  %v4706_v8 = vmul.f32 %v8486_v40, %v4629_v49  ;;  %v5056_v45 = vmul.f32 %v6710_v42, %v8503_v10  ;;  %v4704_v4 = vmul.f32 %v8486_v40, %v4621_v51  ;;  %v4968_v56 = vpop.f32.mrb[145].mxu1 }
 0x249   : > { %v5122_v53 = vadd.f32 %v5090_v31, %v4771_v37  ;;  %v4744_v46 = vadd.f32 %v8492_v41, %v4705_v48  ;;  %v4742_v11 = vadd.f32 %v8492_v41, %v4703_v50  ;;  %v5054_v58 = vmul.f32 %v8503_v10, %v4968_v56  ;;  %v6711_v21 = vpop.f32.mrb[146].mxu1 }
 0x24a   : > { %v5156_v1 = vmax.f32 %v5124_v30, 0.0  ;;  %v4745_v44 = vadd.f32 %v8492_v41, %v4706_v8  ;;  %v5095_v52 = vadd.f32 %v8514_v9, %v5056_v45  ;;  %v4743_v43 = vadd.f32 %v8492_v41, %v4704_v4  ;;  %v4971_v57 = vpop.f32.mrb[147].mxu1 }
 0x24b   : > { %v6666_v33 = vpop.f32.mrb[148].mxu0  ;;  %v5154_v39 = vmax.f32 %v5122_v53, 0.0  ;;  %v4776_v24 = vmax.f32 %v4744_v46, 0.0  ;;  %v4774_v61 = vmax.f32 %v4742_v11, 0.0  ;;  %v5093_v60 = vadd.f32 %v8514_v9, %v5054_v58 }
 0x24c   : > { %v4633_v32 = vpop.f32.mrb[149].mxu0  ;;  %v6075_v19 = vpack.c.bf16 %v5156_v1, %v5155_v18  ;;  %v4777_v28 = vmax.f32 %v4745_v44, 0.0  ;;  %v4775_v17 = vmax.f32 %v4743_v43, 0.0  ;;  %v5057_v55 = vmul.f32 %v6711_v21, %v8503_v10 }
 0x24d   : > { %v6667_v38 = vpop.f32.mrb[150].mxu0  ;;  %v6070_v37 = vpack.c.bf16 %v5154_v39, %v5153_v12  ;;  %v5127_v62 = vadd.f32 %v5095_v52, %v4776_v24  ;;  %v5125_v3 = vadd.f32 %v5093_v60, %v4774_v61  ;;  %v5055_v36 = vmul.f32 %v8503_v10, %v4971_v57 }
 0x24e   : > { %v4636_v7 = vpop.f32.mrb[151].mxu0  ;;  %6123 = vst [vmem:[%s8543_s13 + $0x38] sm:$0xff] %v6075_v19   ;;  %v5096_v13 = vadd.f32 %v8514_v9, %v5057_v55  ;;  %v4642_v2 = vadd.f32 %v6666_v33, %v8459_v34  ;;  %v4634_v25 = vadd.f32 %v4633_v32, %v8453_v23  ;;  %v4645_v20 = vadd.f32 %v6667_v38, %v8461_v0 }
 0x24f   : > { %6122 = vst [vmem:[%s8543_s13 + $0x30] sm:$0xff] %v6070_v37   ;;  %v5159_v16 = vmax.f32 %v5127_v62, 0.0  ;;  %v5157_v26 = vmax.f32 %v5125_v3, 0.0  ;;  %v5094_v54 = vadd.f32 %v8514_v9, %v5055_v36  ;;  %v6714_v22 = vpop.f32.mrb[148].mxu1  ;;  %v4637_v18 = vadd.f32 %v4636_v7, %v8455_v35 }
 0x250   : > { %v5128_v14 = vadd.f32 %v5096_v13, %v4777_v28  ;;  %v4709_v49 = vmul.f32 %v8486_v40, %v4642_v2  ;;  %v4707_v51 = vmul.f32 %v8486_v40, %v4634_v25  ;;  %v4710_v12 = vmul.f32 %v8486_v40, %v4645_v20  ;;  %v4984_v34 = vpop.f32.mrb[149].mxu1 }
 0x251   : > { %v5126_v31 = vadd.f32 %v5094_v54, %v4775_v17  ;;  %v5060_v23 = vmul.f32 %v6714_v22, %v8503_v10  ;;  %v4708_v0 = vmul.f32 %v8486_v40, %v4637_v18  ;;  %v5058_v48 = vmul.f32 %v8503_v10, %v4984_v34  ;;  %v6715_v50 = vpop.f32.mrb[150].mxu1 }
 0x252   : > { %v5160_v30 = vmax.f32 %v5128_v14, 0.0  ;;  %v4748_v35 = vadd.f32 %v8492_v41, %v4709_v49  ;;  %v4746_v8 = vadd.f32 %v8492_v41, %v4707_v51  ;;  %v4749_v45 = vadd.f32 %v8492_v41, %v4710_v12  ;;  %v4987_v4 = vpop.f32.mrb[151].mxu1 }
 0x253   : > { %v6670_v42 = vpop.f32.mrb[152].mxu0  ;;  %v5158_v53 = vmax.f32 %v5126_v31, 0.0  ;;  %v5099_v46 = vadd.f32 %v8514_v9, %v5060_v23  ;;  %v4747_v11 = vadd.f32 %v8492_v41, %v4708_v0  ;;  %v5097_v58 = vadd.f32 %v8514_v9, %v5058_v48 }
 0x254   : > { %v4649_v56 = vpop.f32.mrb[153].mxu0  ;;  %v6085_v33 = vpack.c.bf16 %v5160_v30, %v5159_v16  ;;  %v4780_v1 = vmax.f32 %v4748_v35, 0.0  ;;  %v4778_v44 = vmax.f32 %v4746_v8, 0.0  ;;  %v4781_v52 = vmax.f32 %v4749_v45, 0.0 }
 0x255   : > { %v6671_v21 = vpop.f32.mrb[154].mxu0  ;;  %v6080_v57 = vpack.c.bf16 %v5158_v53, %v5157_v26  ;;  %v4779_v32 = vmax.f32 %v4747_v11, 0.0  ;;  %v5061_v39 = vmul.f32 %v6715_v50, %v8503_v10  ;;  %v5059_v24 = vmul.f32 %v8503_v10, %v4987_v4 }
 0x256   : > { %v4652_v43 = vpop.f32.mrb[155].mxu0  ;;  %6125 = vst [vmem:[%s8543_s13 + $0x48] sm:$0xff] %v6085_v33   ;;  %v5131_v61 = vadd.f32 %v5099_v46, %v4780_v1  ;;  %v5129_v60 = vadd.f32 %v5097_v58, %v4778_v44  ;;  %v4658_v38 = vadd.f32 %v6670_v42, %v8471_v27  ;;  %v4650_v19 = vadd.f32 %v4649_v56, %v8465_v5 }
 0x257   : > { %6124 = vst [vmem:[%s8543_s13 + $0x40] sm:$0xff] %v6080_v57   ;;  %v5100_v28 = vadd.f32 %v8514_v9, %v5061_v39  ;;  %v5098_v17 = vadd.f32 %v8514_v9, %v5059_v24  ;;  %v4661_v55 = vadd.f32 %v6671_v21, %v8473_v6  ;;  %v6718_v7 = vpop.f32.mrb[152].mxu1  ;;  %v4653_v37 = vadd.f32 %v4652_v43, %v8467_v63 }
 0x258   : > { %v5163_v62 = vmax.f32 %v5131_v61, 0.0  ;;  %v5161_v3 = vmax.f32 %v5129_v60, 0.0  ;;  %v4713_v36 = vmul.f32 %v8486_v40, %v4658_v38  ;;  %v4711_v13 = vmul.f32 %v8486_v40, %v4650_v19  ;;  %v5000_v2 = vpop.f32.mrb[153].mxu1 }
 0x259   : > { %v5132_v27 = vadd.f32 %v5100_v28, %v4781_v52  ;;  %v5130_v25 = vadd.f32 %v5098_v17, %v4779_v32  ;;  %v4714_v5 = vmul.f32 %v8486_v40, %v4661_v55  ;;  %v5064_v20 = vmul.f32 %v6718_v7, %v8503_v10  ;;  %v6719_v16 = vpop.f32.mrb[154].mxu1 }
 0x25a   : > { %v4752_v6 = vadd.f32 %v8492_v41, %v4713_v36  ;;  %v4750_v54 = vadd.f32 %v8492_v41, %v4711_v13  ;;  %v4712_v63 = vmul.f32 %v8486_v40, %v4653_v37  ;;  %v5062_v22 = vmul.f32 %v8503_v10, %v5000_v2  ;;  %v5003_v18 = vpop.f32.mrb[155].mxu1 }
 0x25b   : > { %v6674_v26 = vpop.f32.mrb[156].mxu0  ;;  %v5164_v49 = vmax.f32 %v5132_v27, 0.0  ;;  %v5162_v51 = vmax.f32 %v5130_v25, 0.0  ;;  %v4753_v12 = vadd.f32 %v8492_v41, %v4714_v5  ;;  %v5103_v34 = vadd.f32 %v8514_v9, %v5064_v20 }
 0x25c   : > { %v4665_v14 = vpop.f32.mrb[157].mxu0  ;;  %v4784_v23 = vmax.f32 %v4752_v6, 0.0  ;;  %v4782_v0 = vmax.f32 %v4750_v54, 0.0  ;;  %v4751_v48 = vadd.f32 %v8492_v41, %v4712_v63  ;;  %v5101_v50 = vadd.f32 %v8514_v9, %v5062_v22 }
 0x25d   : > { %v6675_v31 = vpop.f32.mrb[158].mxu0  ;;  %v6095_v30 = vpack.c.bf16 %v5164_v49, %v5163_v62  ;;  %v6090_v35 = vpack.c.bf16 %v5162_v51, %v5161_v3  ;;  %v4785_v8 = vmax.f32 %v4753_v12, 0.0  ;;  %v5065_v45 = vmul.f32 %v6719_v16, %v8503_v10 }
 0x25e   : > { %v4668_v42 = vpop.f32.mrb[159].mxu0  ;;  %v5135_v4 = vadd.f32 %v5103_v34, %v4784_v23  ;;  %v4783_v56 = vmax.f32 %v4751_v48, 0.0  ;;  %v5133_v53 = vadd.f32 %v5101_v50, %v4782_v0  ;;  %v5063_v46 = vmul.f32 %v8503_v10, %v5003_v18 }
 0x25f   : > { %6127 = vst [vmem:[%s8543_s13 + $0x58] sm:$0xff] %v6095_v30   ;;  %6126 = vst [vmem:[%s8543_s13 + $0x50] sm:$0xff] %v6090_v35   ;;  %v5104_v11 = vadd.f32 %v8514_v9, %v5065_v45  ;;  %v4674_v58 = vadd.f32 %v6674_v26, %v8495_v59  ;;  %v4666_v21 = vadd.f32 %v4665_v14, %v8477_v15  ;;  %v6722_v1 = vpop.f32.mrb[156].mxu1 }
 0x260   : > { %v4677_v33 = vadd.f32 %v6675_v31, %v8506_v47  ;;  %v5167_v44 = vmax.f32 %v5135_v4, 0.0  ;;  %v5165_v52 = vmax.f32 %v5133_v53, 0.0  ;;  %v5102_v43 = vadd.f32 %v8514_v9, %v5063_v46  ;;  %v5016_v32 = vpop.f32.mrb[157].mxu1 }
 0x261   : > { %v5068_v57 = vmul.f32 %v6722_v1, %v8503_v10  ;;  %v5136_v39 = vadd.f32 %v5104_v11, %v4785_v8  ;;  %v4717_v24 = vmul.f32 %v8486_v40, %v4674_v58  ;;  %v4715_v61 = vmul.f32 %v8486_v40, %v4666_v21  ;;  %v6723_v59 = vpop.f32.mrb[158].mxu1 }
 0x262   : > { %v4718_v60 = vmul.f32 %v8486_v40, %v4677_v33  ;;  %v5134_v38 = vadd.f32 %v5102_v43, %v4783_v56  ;;  %v4669_v47 = vadd.f32 %v4668_v42, %v8479_v29  ;;  %v5066_v19 = vmul.f32 %v8503_v10, %v5016_v32  ;;  %v5019_v28 = vpop.f32.mrb[159].mxu1 }
 0x263   : > { %v5107_v15 = vadd.f32 %v8514_v9, %v5068_v57  ;;  %v5168_v17 = vmax.f32 %v5136_v39, 0.0  ;;  %v4756_v55 = vadd.f32 %v8492_v41, %v4717_v24  ;;  %v4754_v7 = vadd.f32 %v8492_v41, %v4715_v61 }
 0x264   : > { %v4757_v37 = vadd.f32 %v8492_v41, %v4718_v60  ;;  %v5166_v62 = vmax.f32 %v5134_v38, 0.0  ;;  %v4716_v3 = vmul.f32 %v8486_v40, %v4669_v47  ;;  %v5105_v36 = vadd.f32 %v8514_v9, %v5066_v19 }
 0x265   : > { %v5069_v13 = vmul.f32 %v6723_v59, %v8503_v10  ;;  %v6105_v29 = vpack.c.bf16 %v5168_v17, %v5167_v44  ;;  %v4788_v2 = vmax.f32 %v4756_v55, 0.0  ;;  %v4786_v27 = vmax.f32 %v4754_v7, 0.0 }
 0x266   : > { %v4789_v25 = vmax.f32 %v4757_v37, 0.0  ;;  %v6100_v5 = vpack.c.bf16 %v5166_v62, %v5165_v52  ;;  %v4755_v20 = vadd.f32 %v8492_v41, %v4716_v3  ;;  %v5067_v26 = vmul.f32 %v8503_v10, %v5019_v28 }
 0x267   : > { %v5108_v16 = vadd.f32 %v8514_v9, %v5069_v13  ;;  %6129 = vst [vmem:[%s8543_s13 + $0x68] sm:$0xff] %v6105_v29   ;;  %v5139_v6 = vadd.f32 %v5107_v15, %v4788_v2  ;;  %v5137_v40 = vadd.f32 %v5105_v36, %v4786_v27 }
 0x268   : > { %6128 = vst [vmem:[%s8543_s13 + $0x60] sm:$0xff] %v6100_v5   ;;  %v4787_v54 = vmax.f32 %v4755_v20, 0.0  ;;  %v5106_v22 = vadd.f32 %v8514_v9, %v5067_v26 }
 0x269   : > { %v5140_v63 = vadd.f32 %v5108_v16, %v4789_v25  ;;  %v5171_v18 = vmax.f32 %v5139_v6, 0.0  ;;  %v5169_v51 = vmax.f32 %v5137_v40, 0.0 }
 0x26a   : > { %v5138_v49 = vadd.f32 %v5106_v22, %v4787_v54 }
 0x26b   : > { %v5172_v14 = vmax.f32 %v5140_v63, 0.0 }
 0x26c   : > { %v5170_v41 = vmax.f32 %v5138_v49, 0.0 }
 0x26d   : > { %v6115_v12 = vpack.c.bf16 %v5172_v14, %v5171_v18 }
 0x26e   : > { %v6110_v34 = vpack.c.bf16 %v5170_v41, %v5169_v51 }
 0x26f   : > { %6131 = vst [vmem:[%s8543_s13 + $0x78] sm:$0xff] %v6115_v12  }
 0x270   : > { %6130 = vst [vmem:[%s8543_s13 + $0x70] sm:$0xff] %v6110_v34  }
 0x271 PF: > { %s17_s26 = sadd.s32 1, %s6899_s26   ;;  %s8761_s24 = smov %s6895_s25 }
 0x272   : > { %p14_p5 = scmp.ge.s32.totalorder %s17_s26, 4   ;;  %s8762_s25 = smov %s8764_s27 }
 0x274   :  { %16 = sbr.rel (!%p14_p5) target bundleno = 2 (0x2), region = 81 }

</bundles_post_ra>
